<compile_context>
chip_gen: v7x
topology: tpu7x:2x2x1
jax: 0.10.0
libtpu: 0.0.40
codegen_flags: <defaults>
</compile_context>

<pallas_src>
import functools

import jax
import jax.numpy as jnp
from jax.experimental import pallas as pl
from jax.experimental.pallas import tpu as pltpu

BN_EPS = 1e-5
LEAKY_SLOPE = 0.2
GROUP_TILE_TARGET = 2048            # points (rows) per streamed tile
VMEM_LIMIT_BYTES = 32 * 1024 * 1024  # safe on v5e/v6e (128 MiB) and v7x (64 MiB)
STAT_ROWS = 8                       # sublane-padded stat block: row0=sum, row1=sumsq


def _round_up(a, m):
    return ((a + m - 1) // m) * m


# ---------------------------------------------------------------------------
# in-kernel helpers
# ---------------------------------------------------------------------------
def _bn_act(h, stat, gamma, beta, inv_count):
    """Training-mode BatchNorm (from accumulated sum / sumsq) + LeakyReLU(0.2)."""
    mean = stat[0:1, :] * inv_count
    var = jnp.maximum(stat[1:2, :] * inv_count - mean * mean, 0.0)
    scale = gamma * jax.lax.rsqrt(var + BN_EPS)
    shift = beta - mean * scale
    y = h * scale + shift
    return jnp.where(y > 0, y, LEAKY_SLOPE * y)


def _accum_stats(stat_ref, h):
    """Accumulate per-channel sum / sum-of-squares into a resident (8, C) block."""
    first = jnp.logical_and(pl.program_id(1) == 0, pl.program_id(2) == 0)

    @pl.when(first)
    def _init():
        stat_ref[...] = jnp.zeros_like(stat_ref)

    stat_ref[0:1, :] += jnp.sum(h, axis=0, keepdims=True)
    stat_ref[1:2, :] += jnp.sum(h * h, axis=0, keepdims=True)


def _row_valid_mask(rows, gbpc, gt, g_true):
    """(rows, 1) mask: True for real points, False for padding rows."""
    gg = pl.program_id(0) * gbpc + pl.program_id(1)
    local = jax.lax.broadcasted_iota(jnp.int32, (rows, 1), 0)
    return (gg * gt + local) < g_true


def _accum_maxmin(maxh_ref, minh_ref, h):
    """Per-point running max / min over the inner neighbor grid axis."""
    j = pl.program_id(2)

    @pl.when(j == 0)
    def _first():
        maxh_ref[...] = h
        minh_ref[...] = h

    @pl.when(j > 0)
    def _rest():
        maxh_ref[...] = jnp.maximum(maxh_ref[...], h)
        minh_ref[...] = jnp.minimum(minh_ref[...], h)


# ---------------------------------------------------------------------------
# kernels
# ---------------------------------------------------------------------------
def _edge_conv_stats_kernel(nbr_ref, x_ref, wa_ref, wb_ref, stat_ref):
    """Split-weight edge conv (h = nbr@Wa + ctr@Wb) + BN statistics."""
    h = (jnp.dot(nbr_ref[...], wa_ref[...], preferred_element_type=jnp.float32)
         + jnp.dot(x_ref[...], wb_ref[...], preferred_element_type=jnp.float32))
    # Pad rows are all-zero inputs -> h == 0 -> contribute nothing to the stats.
    _accum_stats(stat_ref, h)


def _edge_conv_bn_conv_kernel(nbr_ref, x_ref, wa_ref, wb_ref, s1_ref, g1_ref, b1_ref,
                              w2_ref, stat_ref, maxh_ref, minh_ref,
                              *, inv_count, gbpc, gt, g_true):
    """edge conv -> BN+LReLU -> next conv; accumulate stats + per-point max/min."""
    cd = w2_ref.dtype
    h1 = (jnp.dot(nbr_ref[...], wa_ref[...], preferred_element_type=jnp.float32)
          + jnp.dot(x_ref[...], wb_ref[...], preferred_element_type=jnp.float32))
    act1 = _bn_act(h1, s1_ref[...], g1_ref[...], b1_ref[...], inv_count)
    h2 = jnp.dot(act1.astype(cd), w2_ref[...], preferred_element_type=jnp.float32)
    valid = _row_valid_mask(h2.shape[0], gbpc, gt, g_true)
    _accum_stats(stat_ref, jnp.where(valid, h2, 0.0))
    _accum_maxmin(maxh_ref, minh_ref, h2)


def _edge_chain_conv5_kernel(nbr_ref, x_ref, wa_ref, wb_ref, s3_ref, g3_ref, b3_ref,
                             w4_ref, s4_ref, g4_ref, b4_ref, w5a_ref, w5b_ref, xk1_ref,
                             stat_ref, maxh_ref, minh_ref,
                             *, inv_count, gbpc, gt, g_true):
    """Recompute conv3->BN->conv4->BN, then split-weight conv5 with resident x_k1;
    accumulate conv5 stats + per-point max/min (no h3/h4/h5 ever hit HBM)."""
    cd = w4_ref.dtype
    h3 = (jnp.dot(nbr_ref[...], wa_ref[...], preferred_element_type=jnp.float32)
          + jnp.dot(x_ref[...], wb_ref[...], preferred_element_type=jnp.float32))
    act3 = _bn_act(h3, s3_ref[...], g3_ref[...], b3_ref[...], inv_count)
    h4 = jnp.dot(act3.astype(cd), w4_ref[...], preferred_element_type=jnp.float32)
    act4 = _bn_act(h4, s4_ref[...], g4_ref[...], b4_ref[...], inv_count)
    h5 = (jnp.dot(act4.astype(cd), w5a_ref[...], preferred_element_type=jnp.float32)
          + jnp.dot(xk1_ref[...], w5b_ref[...], preferred_element_type=jnp.float32))
    valid = _row_valid_mask(h5.shape[0], gbpc, gt, g_true)
    _accum_stats(stat_ref, jnp.where(valid, h5, 0.0))
    _accum_maxmin(maxh_ref, minh_ref, h5)


def _bn_act_dirmax_kernel(stat_ref, gamma_ref, beta_ref, maxh_ref, minh_ref, out_ref,
                          *, inv_count):
    """BN+LeakyReLU applied to the per-point max (or min if BN scale < 0)."""
    mean = stat_ref[0:1, :] * inv_count
    var = jnp.maximum(stat_ref[1:2, :] * inv_count - mean * mean, 0.0)
    scale = gamma_ref[...] * jax.lax.rsqrt(var + BN_EPS)
    shift = beta_ref[...] - mean * scale
    h = jnp.where(scale > 0, maxh_ref[...], minh_ref[...])
    y = h * scale + shift
    out_ref[...] = jnp.where(y > 0, y, LEAKY_SLOPE * y).astype(out_ref.dtype)


# ---------------------------------------------------------------------------
# pallas_call wrappers
# ---------------------------------------------------------------------------
def _grid_compiler_params():
    return pltpu.CompilerParams(
        dimension_semantics=("parallel", "arbitrary", "arbitrary"),
        vmem_limit_bytes=VMEM_LIMIT_BYTES)


def _edge_conv_stats(nbr, x_pad, wa, wb, *, nc, gbpc, gt):
    k = nbr.shape[0]
    c = x_pad.shape[1]
    d = wa.shape[1]
    row_idx = lambda p, g, j: (p * gbpc + g, 0)
    const_idx = lambda p, g, j: (0, 0)
    stat = pl.pallas_call(
        _edge_conv_stats_kernel,
        out_shape=jax.ShapeDtypeStruct((nc * STAT_ROWS, d), jnp.float32),
        grid=(nc, gbpc, k),
        in_specs=[pl.BlockSpec((None, gt, c), lambda p, g, j: (j, p * gbpc + g, 0)),
                  pl.BlockSpec((gt, c), row_idx),
                  pl.BlockSpec((c, d), const_idx),
                  pl.BlockSpec((c, d), const_idx)],
        out_specs=pl.BlockSpec((STAT_ROWS, d), lambda p, g, j: (p, 0)),
        compiler_params=_grid_compiler_params(),
    )(nbr, x_pad, wa, wb)
    return stat.reshape(nc, STAT_ROWS, d).sum(axis=0)


def _edge_conv_bn_conv(nbr, x_pad, wa, wb, s_in, gamma, beta, w2,
                       *, nc, gbpc, gt, g_true, inv_count):
    k = nbr.shape[0]
    g_pad, c = x_pad.shape
    d = wa.shape[1]
    kern = functools.partial(_edge_conv_bn_conv_kernel, inv_count=inv_count,
                             gbpc=gbpc, gt=gt, g_true=g_true)
    row_idx = lambda p, g, j: (p * gbpc + g, 0)
    const_idx = lambda p, g, j: (0, 0)
    stat, maxh, minh = pl.pallas_call(
        kern,
        out_shape=(jax.ShapeDtypeStruct((nc * STAT_ROWS, d), jnp.float32),
                   jax.ShapeDtypeStruct((g_pad, d), jnp.float32),
                   jax.ShapeDtypeStruct((g_pad, d), jnp.float32)),
        grid=(nc, gbpc, k),
        in_specs=[pl.BlockSpec((None, gt, c), lambda p, g, j: (j, p * gbpc + g, 0)),
                  pl.BlockSpec((gt, c), row_idx),
                  pl.BlockSpec((c, d), const_idx),
                  pl.BlockSpec((c, d), const_idx),
                  pl.BlockSpec((STAT_ROWS, d), const_idx),
                  pl.BlockSpec((1, d), const_idx),
                  pl.BlockSpec((1, d), const_idx),
                  pl.BlockSpec((d, d), const_idx)],
        out_specs=(pl.BlockSpec((STAT_ROWS, d), lambda p, g, j: (p, 0)),
                   pl.BlockSpec((gt, d), row_idx),
                   pl.BlockSpec((gt, d), row_idx)),
        compiler_params=_grid_compiler_params(),
    )(nbr, x_pad, wa, wb, s_in, gamma, beta, w2)
    return stat.reshape(nc, STAT_ROWS, d).sum(axis=0), maxh, minh


def _edge_chain_conv5(nbr, x_pad, wa, wb, s3, g3, b3, w4, s4, g4, b4, w5a, w5b, xk1,
                      *, nc, gbpc, gt, g_true, inv_count):
    k = nbr.shape[0]
    g_pad, c = x_pad.shape
    d = wa.shape[1]
    kern = functools.partial(_edge_chain_conv5_kernel, inv_count=inv_count,
                             gbpc=gbpc, gt=gt, g_true=g_true)
    row_idx = lambda p, g, j: (p * gbpc + g, 0)
    const_idx = lambda p, g, j: (0, 0)
    stat, maxh, minh = pl.pallas_call(
        kern,
        out_shape=(jax.ShapeDtypeStruct((nc * STAT_ROWS, d), jnp.float32),
                   jax.ShapeDtypeStruct((g_pad, d), jnp.float32),
                   jax.ShapeDtypeStruct((g_pad, d), jnp.float32)),
        grid=(nc, gbpc, k),
        in_specs=[pl.BlockSpec((None, gt, c), lambda p, g, j: (j, p * gbpc + g, 0)),
                  pl.BlockSpec((gt, c), row_idx),
                  pl.BlockSpec((c, d), const_idx),
                  pl.BlockSpec((c, d), const_idx),
                  pl.BlockSpec((STAT_ROWS, d), const_idx),
                  pl.BlockSpec((1, d), const_idx),
                  pl.BlockSpec((1, d), const_idx),
                  pl.BlockSpec((d, d), const_idx),
                  pl.BlockSpec((STAT_ROWS, d), const_idx),
                  pl.BlockSpec((1, d), const_idx),
                  pl.BlockSpec((1, d), const_idx),
                  pl.BlockSpec((d, d), const_idx),
                  pl.BlockSpec((d, d), const_idx),
                  pl.BlockSpec((gt, d), row_idx)],
        out_specs=(pl.BlockSpec((STAT_ROWS, d), lambda p, g, j: (p, 0)),
                   pl.BlockSpec((gt, d), row_idx),
                   pl.BlockSpec((gt, d), row_idx)),
        compiler_params=_grid_compiler_params(),
    )(nbr, x_pad, wa, wb, s3, g3, b3, w4, s4, g4, b4, w5a, w5b, xk1)
    return stat.reshape(nc, STAT_ROWS, d).sum(axis=0), maxh, minh


def _bn_act_dirmax(stat, gamma, beta, maxh, minh, *, gt, inv_count, out_dtype):
    g_pad, d = maxh.shape
    kern = functools.partial(_bn_act_dirmax_kernel, inv_count=inv_count)
    const_idx = lambda i: (0, 0)
    row_idx = lambda i: (i, 0)
    return pl.pallas_call(
        kern,
        out_shape=jax.ShapeDtypeStruct((g_pad, d), out_dtype),
        grid=(g_pad // gt,),
        in_specs=[pl.BlockSpec((STAT_ROWS, d), const_idx),
                  pl.BlockSpec((1, d), const_idx),
                  pl.BlockSpec((1, d), const_idx),
                  pl.BlockSpec((gt, d), row_idx),
                  pl.BlockSpec((gt, d), row_idx)],
        out_specs=pl.BlockSpec((gt, d), row_idx),
        compiler_params=pltpu.CompilerParams(
            dimension_semantics=("parallel",),
            vmem_limit_bytes=VMEM_LIMIT_BYTES),
    )(stat, gamma, beta, maxh, minh)


# ---------------------------------------------------------------------------
# XLA glue: knn + neighbor gather
# ---------------------------------------------------------------------------
# TODO(synk): k-NN top-k selection and the neighbor row gather stay in XLA
# (jax.lax.top_k / jnp.take) — no clean Pallas TPU equivalent for the dynamic gather.
def _knn_idx(x, k):
    """x: (B, C, N) -> indices of the k nearest neighbors, (B, N, k) int32."""
    inner = jnp.einsum('bcn,bcm->bnm', x, x)
    xx = jnp.sum(x * x, axis=1)                               # (B, N)
    neg_dist = -xx[:, :, None] + 2.0 * inner - xx[:, None, :]
    return jax.lax.top_k(neg_dist, k)[1]


def _gather_neighbor_rows(x_rows, idx, g_pad):
    """Neighbor rows in neighbor-major order, zero-padded: (k, g_pad, C)."""
    B, N, k = idx.shape
    G, C = x_rows.shape
    base = (jnp.arange(B, dtype=idx.dtype) * N)[:, None, None]
    gidx = jnp.transpose(idx + base, (2, 0, 1)).reshape(k * G)
    nbr = jnp.take(x_rows, gidx, axis=0).reshape(k, G, C)
    return jnp.pad(nbr, ((0, 0), (0, g_pad - G), (0, 0)))


# ---------------------------------------------------------------------------
# MGM forward (Pallas)
# ---------------------------------------------------------------------------
def _mgm_forward_impl(x, params, *, k1, k2, group_tile=GROUP_TILE_TARGET,
                      compute_dtype=jnp.bfloat16):
    (w1, g1, b1, w2, g2, b2, w3, g3, b3, w4, g4, b4, w5, g5, b5) = params
    B, C, N = x.shape
    d = w1.shape[0]
    G = B * N
    cd = compute_dtype

    gt = min(_round_up(group_tile, 8), _round_up(G, 8))
    gblocks = -(-G // gt)
    nc = 2 if gblocks >= 2 else 1          # megacore split (harmless on 1-TC chips)
    gbpc = -(-gblocks // nc)
    g_pad = nc * gbpc * gt
    dims = dict(nc=nc, gbpc=gbpc, gt=gt)

    # 1x1 conv over [x_j - x_i, x_i] rewritten as x_j @ Wa + x_i @ (Wc - Wa).
    wa1 = w1[:, :C].T.astype(cd)
    wb1 = (w1[:, C:] - w1[:, :C]).T.astype(cd)
    wa3 = w3[:, :C].T.astype(cd)
    wb3 = (w3[:, C:] - w3[:, :C]).T.astype(cd)
    w2t = w2.T.astype(cd)
    w4t = w4.T.astype(cd)
    w5a = w5[:, :d].T.astype(cd)           # acts on branch-2 activations
    w5b = w5[:, d:].T.astype(cd)           # acts on (implicitly repeated) x_k1
    row = lambda v: v.reshape(1, -1).astype(jnp.float32)

    x_rows = jnp.transpose(x, (0, 2, 1)).reshape(G, C).astype(cd)
    x_pad = jnp.pad(x_rows, ((0, g_pad - G), (0, 0)))

    idx1 = _knn_idx(x, k1)
    idx2 = _knn_idx(x, k2)
    nbr1 = _gather_neighbor_rows(x_rows, idx1, g_pad)     # (k1, g_pad, C) bf16
    nbr2 = _gather_neighbor_rows(x_rows, idx2, g_pad)     # (k2, g_pad, C) bf16

    inv1 = 1.0 / float(k1 * G)
    inv2 = 1.0 / float(k2 * G)

    # ---- branch 1: conv1 -> conv2 -> max over k1 -------------------------------
    s1 = _edge_conv_stats(nbr1, x_pad, wa1, wb1, **dims)
    s2, max2, min2 = _edge_conv_bn_conv(nbr1, x_pad, wa1, wb1, s1, row(g1), row(b1),
                                        w2t, g_true=G, inv_count=inv1, **dims)
    xk1 = _bn_act_dirmax(s2, row(g2), row(b2), max2, min2, gt=gt, inv_count=inv1,
                         out_dtype=cd)                    # (g_pad, d)

    # ---- branch 2: conv3 -> conv4 -> conv5([.,x_k1]) -> max over k2 ------------
    s3 = _edge_conv_stats(nbr2, x_pad, wa3, wb3, **dims)
    s4, _, _ = _edge_conv_bn_conv(nbr2, x_pad, wa3, wb3, s3, row(g3), row(b3),
                                  w4t, g_true=G, inv_count=inv2, **dims)
    s5, max5, min5 = _edge_chain_conv5(nbr2, x_pad, wa3, wb3, s3, row(g3), row(b3),
                                       w4t, s4, row(g4), row(b4), w5a, w5b, xk1,
                                       g_true=G, inv_count=inv2, **dims)
    out_rows = _bn_act_dirmax(s5, row(g5), row(b5), max5, min5, gt=gt,
                              inv_count=inv2, out_dtype=jnp.float32)

    return jnp.transpose(out_rows[:G].reshape(B, N, d), (0, 2, 1))   # (B, d, N)


# ---------------------------------------------------------------------------
# Pure-JAX f32 reference of the PyTorch forward (training-mode BatchNorm2d)
# ---------------------------------------------------------------------------
def _graph_feature_ref(x, idx):
    B, C, N = x.shape
    k = idx.shape[-1]
    x_t = jnp.transpose(x, (0, 2, 1))                          # (B, N, C)
    nbr = jnp.take_along_axis(x_t, idx.reshape(B, N * k, 1), axis=1).reshape(B, N, k, C)
    ctr = jnp.broadcast_to(x_t[:, :, None, :], (B, N, k, C))
    feat = jnp.concatenate([nbr - ctr, ctr], axis=-1)          # (B, N, k, 2C)
    return jnp.transpose(feat, (0, 3, 1, 2))                   # (B, 2C, N, k)


def _conv_bn_lrelu_ref(h, w, gamma, beta):
    h = jnp.einsum('oc,bcnk->bonk', w, h, precision=jax.lax.Precision.HIGHEST)
    mean = jnp.mean(h, axis=(0, 2, 3), keepdims=True)
    var = jnp.mean((h - mean) ** 2, axis=(0, 2, 3), keepdims=True)
    h = (h - mean) * jax.lax.rsqrt(var + BN_EPS)
    h = h * gamma[None, :, None, None] + beta[None, :, None, None]
    return jnp.where(h > 0, h, LEAKY_SLOPE * h)


def _mgm_ref_impl(x, params, *, k1, k2):
    (w1, g1, b1, w2, g2, b2, w3, g3, b3, w4, g4, b4, w5, g5, b5) = params
    idx1 = _knn_idx(x, k1)
    idx2 = _knn_idx(x, k2)
    h = _conv_bn_lrelu_ref(_graph_feature_ref(x, idx1), w1, g1, b1)
    h = _conv_bn_lrelu_ref(h, w2, g2, b2)
    xk1 = jnp.max(h, axis=-1)                                  # (B, d, N)
    h = _conv_bn_lrelu_ref(_graph_feature_ref(x, idx2), w3, g3, b3)
    h = _conv_bn_lrelu_ref(h, w4, g4, b4)
    xk1r = jnp.broadcast_to(xk1[..., None], (*xk1.shape, k2))
    h = _conv_bn_lrelu_ref(jnp.concatenate([h, xk1r], axis=1), w5, g5, b5)
    return jnp.max(h, axis=-1)


# ---------------------------------------------------------------------------
if __name__ == "__main__":
    B, DIM, N = 2, 64, 56        # dim = module's `dim`; N points (small test size)
    K1, K2 = 16, 8               # scaled-down k1 / k2 (must be <= N)

    key = jax.random.PRNGKey(0)
    keys = jax.random.split(key, 16)
    x = jax.random.normal(keys[0], (B, DIM, N), dtype=jnp.float32)

    def conv_w(k, cin, cout):
        return jax.random.normal(k, (cout, cin), dtype=jnp.float32) * (cin ** -0.5)

    def bn_p(kg, kb):
        gamma = 1.0 + 0.1 * jax.random.normal(kg, (DIM,), dtype=jnp.float32)
        beta = 0.1 * jax.random.normal(kb, (DIM,), dtype=jnp.float32)
        return gamma, beta

    w1 = conv_w(keys[1], 2 * DIM, DIM)
    w2 = conv_w(keys[2], DIM, DIM)
    w3 = conv_w(keys[3], 2 * DIM, DIM)
    w4 = conv_w(keys[4], DIM, DIM)
    w5 = conv_w(keys[5], 2 * DIM, DIM)
    g1, b1 = bn_p(keys[6], keys[7])
    g2, b2 = bn_p(keys[8], keys[9])
    g3, b3 = bn_p(keys[10], keys[11])
    g4, b4 = bn_p(keys[12], keys[13])
    g5, b5 = bn_p(keys[14], keys[15])
    params = (w1, g1, b1, w2, g2, b2, w3, g3, b3, w4, g4, b4, w5, g5, b5)

    # group_tile=64 keeps the test tiny while exercising the multi-tile row path,
    # the 2-wide core-parallel grid axis and the row-padding / stat-masking path
    # (G = 112 points -> padded to 128).  Production default is 2048.
    fwd = jax.jit(functools.partial(_mgm_forward_impl, k1=K1, k2=K2, group_tile=64))
    ref_fn = jax.jit(functools.partial(_mgm_ref_impl, k1=K1, k2=K2))

    out = jax.block_until_ready(fwd(x, params))
    ref = jax.block_until_ready(ref_fn(x, params))

    assert out.shape == (B, DIM, N), out.shape
    err = float(jnp.max(jnp.abs(out - ref)))
    assert bool(jnp.allclose(out, ref, rtol=5e-2, atol=5e-2)), f"max abs err {err}"
    print("KERNEL_OK")
</pallas_src>

<mosaic_0001>
module attributes {stable_mosaic.version = 11 : i64} {
  func.func @_edge_conv_stats_kernel(%arg0: i32, %arg1: i32, %arg2: i32, %arg3: memref<1x64x64xbf16, #tpu.memory_space<vmem>>, %arg4: memref<64x64xbf16, #tpu.memory_space<vmem>>, %arg5: memref<64x64xbf16, #tpu.memory_space<vmem>>, %arg6: memref<64x64xbf16, #tpu.memory_space<vmem>>, %arg7: memref<8x64xf32, #tpu.memory_space<vmem>>) attributes {dimension_semantics = [#tpu.dimension_semantics<parallel>, #tpu.dimension_semantics<arbitrary>, #tpu.dimension_semantics<arbitrary>], iteration_bounds = array<i64: 2, 1, 16>, scalar_prefetch = 0 : i64, scratch_operands = 0 : i64, tpu.core_type = #tpu.core_type<tc>, window_params = [{transform_indices = @transform_0, window_bounds = array<i64: 1, 64, 64>}, {transform_indices = @transform_1, window_bounds = array<i64: 64, 64>}, {pipeline_mode = #tpu.pipeline_mode<synchronous>, transform_indices = @transform_2, window_bounds = array<i64: 64, 64>}, {pipeline_mode = #tpu.pipeline_mode<synchronous>, transform_indices = @transform_3, window_bounds = array<i64: 64, 64>}, {transform_indices = @transform_4, window_bounds = array<i64: 8, 64>}]} {
    %c0 = arith.constant 0 : index
    %c0_0 = arith.constant 0 : index
    %c0_1 = arith.constant 0 : index
    %0 = vector.load %arg3[%c0, %c0_0, %c0_1] : memref<1x64x64xbf16, #tpu.memory_space<vmem>>, vector<1x64x64xbf16>
    %1 = vector.shape_cast %0 : vector<1x64x64xbf16> to vector<64x64xbf16>
    %c0_2 = arith.constant 0 : index
    %c0_3 = arith.constant 0 : index
    %2 = vector.load %arg5[%c0_2, %c0_3] : memref<64x64xbf16, #tpu.memory_space<vmem>>, vector<64x64xbf16>
    %cst = arith.constant dense<0.000000e+00> : vector<64x64xf32>
    %3 = tpu.matmul %1, %2, %cst {dimension_numbers = #tpu.dot_dimension_numbers<[1], [0], [0], [1], [0, 0, 1, 1], [], []>} : vector<64x64xbf16>, vector<64x64xbf16>, vector<64x64xf32> -> vector<64x64xf32>
    %c0_4 = arith.constant 0 : index
    %c0_5 = arith.constant 0 : index
    %4 = vector.load %arg4[%c0_4, %c0_5] : memref<64x64xbf16, #tpu.memory_space<vmem>>, vector<64x64xbf16>
    %c0_6 = arith.constant 0 : index
    %c0_7 = arith.constant 0 : index
    %5 = vector.load %arg6[%c0_6, %c0_7] : memref<64x64xbf16, #tpu.memory_space<vmem>>, vector<64x64xbf16>
    %cst_8 = arith.constant dense<0.000000e+00> : vector<64x64xf32>
    %6 = tpu.matmul %4, %5, %cst_8 {dimension_numbers = #tpu.dot_dimension_numbers<[1], [0], [0], [1], [0, 0, 1, 1], [], []>} : vector<64x64xbf16>, vector<64x64xbf16>, vector<64x64xf32> -> vector<64x64xf32>
    %7 = arith.addf %3, %6 : vector<64x64xf32>
    %c0_i32 = arith.constant 0 : i32
    %8 = arith.cmpi eq, %arg1, %c0_i32 : i32
    %c0_i32_9 = arith.constant 0 : i32
    %9 = arith.cmpi eq, %arg2, %c0_i32_9 : i32
    %10 = arith.andi %8, %9 : i1
    %11 = arith.extui %10 : i1 to i32
    %c0_i32_10 = arith.constant 0 : i32
    %12 = arith.cmpi ne, %11, %c0_i32_10 : i32
    scf.if %12 {
      %cst_20 = arith.constant 0.000000e+00 : f32
      %24 = vector.broadcast %cst_20 : f32 to vector<8x64xf32>
      %c0_21 = arith.constant 0 : index
      %c0_22 = arith.constant 0 : index
      %25 = vector.load %arg7[%c0_21, %c0_22] : memref<8x64xf32, #tpu.memory_space<vmem>>, vector<8x64xf32>
      tpu.vector_store %arg7[%c0_21, %c0_22], %24 {strides = array<i32>} : memref<8x64xf32, #tpu.memory_space<vmem>>, vector<8x64xf32>,
    } else {
    }
    %c0_11 = arith.constant 0 : index
    %c0_12 = arith.constant 0 : index
    %13 = vector.load %arg7[%c0_11, %c0_12] : memref<8x64xf32, #tpu.memory_space<vmem>>, vector<1x64xf32>
    %cst_13 = arith.constant dense<0.000000e+00> : vector<64xf32>
    %14 = vector.multi_reduction <add>, %7, %cst_13 [0] : vector<64x64xf32> to vector<64xf32>
    %15 = vector.shape_cast %14 : vector<64xf32> to vector<1x64xf32>
    %16 = arith.addf %13, %15 : vector<1x64xf32>
    %c0_14 = arith.constant 0 : index
    %c0_15 = arith.constant 0 : index
    %17 = vector.load %arg7[%c0_14, %c0_15] : memref<8x64xf32, #tpu.memory_space<vmem>>, vector<1x64xf32>
    tpu.vector_store %arg7[%c0_14, %c0_15], %16 {strides = array<i32>} : memref<8x64xf32, #tpu.memory_space<vmem>>, vector<1x64xf32>,
    %c1 = arith.constant 1 : index
    %c0_16 = arith.constant 0 : index
    %18 = vector.load %arg7[%c1, %c0_16] : memref<8x64xf32, #tpu.memory_space<vmem>>, vector<1x64xf32>
    %19 = arith.mulf %7, %7 : vector<64x64xf32>
    %cst_17 = arith.constant dense<0.000000e+00> : vector<64xf32>
    %20 = vector.multi_reduction <add>, %19, %cst_17 [0] : vector<64x64xf32> to vector<64xf32>
    %21 = vector.shape_cast %20 : vector<64xf32> to vector<1x64xf32>
    %22 = arith.addf %18, %21 : vector<1x64xf32>
    %c1_18 = arith.constant 1 : index
    %c0_19 = arith.constant 0 : index
    %23 = vector.load %arg7[%c1_18, %c0_19] : memref<8x64xf32, #tpu.memory_space<vmem>>, vector<1x64xf32>
    tpu.vector_store %arg7[%c1_18, %c0_19], %22 {strides = array<i32>} : memref<8x64xf32, #tpu.memory_space<vmem>>, vector<1x64xf32>,
    return
  }
  func.func @transform_0(%arg0: i32, %arg1: i32, %arg2: i32) -> (i32, i32, i32) {
    %c1_i32 = arith.constant 1 : i32
    %0 = arith.muli %arg0, %c1_i32 : i32
    %1 = arith.addi %0, %arg1 : i32
    %c0_i32 = arith.constant 0 : i32
    %c0_i32_0 = arith.constant 0 : i32
    return %arg2, %1, %c0_i32 : i32, i32, i32
  }
  func.func @transform_1(%arg0: i32, %arg1: i32, %arg2: i32) -> (i32, i32) {
    %c1_i32 = arith.constant 1 : i32
    %0 = arith.muli %arg0, %c1_i32 : i32
    %1 = arith.addi %0, %arg1 : i32
    %c0_i32 = arith.constant 0 : i32
    %c0_i32_0 = arith.constant 0 : i32
    return %1, %c0_i32 : i32, i32
  }
  func.func @transform_2(%arg0: i32, %arg1: i32, %arg2: i32) -> (i32, i32) {
    %c0_i32 = arith.constant 0 : i32
    %c0_i32_0 = arith.constant 0 : i32
    %c0_i32_1 = arith.constant 0 : i32
    return %c0_i32, %c0_i32_0 : i32, i32
  }
  func.func @transform_3(%arg0: i32, %arg1: i32, %arg2: i32) -> (i32, i32) {
    %c0_i32 = arith.constant 0 : i32
    %c0_i32_0 = arith.constant 0 : i32
    %c0_i32_1 = arith.constant 0 : i32
    return %c0_i32, %c0_i32_0 : i32, i32
  }
  func.func @transform_4(%arg0: i32, %arg1: i32, %arg2: i32) -> (i32, i32) {
    %c0_i32 = arith.constant 0 : i32
    %c0_i32_0 = arith.constant 0 : i32
    return %arg0, %c0_i32 : i32, i32
  }
}

module attributes {stable_mosaic.version = 11 : i64} {
  func.func @_bn_act_dirmax_kernel(%arg0: i32, %arg1: memref<8x64xf32, #tpu.memory_space<vmem>>, %arg2: memref<1x64xf32, #tpu.memory_space<vmem>>, %arg3: memref<1x64xf32, #tpu.memory_space<vmem>>, %arg4: memref<64x64xf32, #tpu.memory_space<vmem>>, %arg5: memref<64x64xf32, #tpu.memory_space<vmem>>, %arg6: memref<64x64xbf16, #tpu.memory_space<vmem>>) attributes {dimension_semantics = [#tpu.dimension_semantics<parallel>], iteration_bounds = array<i64: 2>, scalar_prefetch = 0 : i64, scratch_operands = 0 : i64, tpu.core_type = #tpu.core_type<tc>, window_params = [{pipeline_mode = #tpu.pipeline_mode<synchronous>, transform_indices = @transform_0, window_bounds = array<i64: 8, 64>}, {pipeline_mode = #tpu.pipeline_mode<synchronous>, transform_indices = @transform_1, window_bounds = array<i64: 1, 64>}, {pipeline_mode = #tpu.pipeline_mode<synchronous>, transform_indices = @transform_2, window_bounds = array<i64: 1, 64>}, {transform_indices = @transform_3, window_bounds = array<i64: 64, 64>}, {transform_indices = @transform_4, window_bounds = array<i64: 64, 64>}, {transform_indices = @transform_5, window_bounds = array<i64: 64, 64>}]} {
    %c0 = arith.constant 0 : index
    %c0_0 = arith.constant 0 : index
    %0 = vector.load %arg1[%c0, %c0_0] : memref<8x64xf32, #tpu.memory_space<vmem>>, vector<1x64xf32>
    %cst = arith.constant 5.58035739E-4 : f32
    %1 = vector.broadcast %cst : f32 to vector<1x64xf32>
    %2 = arith.mulf %0, %1 : vector<1x64xf32>
    %c1 = arith.constant 1 : index
    %c0_1 = arith.constant 0 : index
    %3 = vector.load %arg1[%c1, %c0_1] : memref<8x64xf32, #tpu.memory_space<vmem>>, vector<1x64xf32>
    %cst_2 = arith.constant 5.58035739E-4 : f32
    %4 = vector.broadcast %cst_2 : f32 to vector<1x64xf32>
    %5 = arith.mulf %3, %4 : vector<1x64xf32>
    %6 = arith.mulf %2, %2 : vector<1x64xf32>
    %7 = arith.subf %5, %6 : vector<1x64xf32>
    %cst_3 = arith.constant 0.000000e+00 : f32
    %8 = vector.broadcast %cst_3 : f32 to vector<1x64xf32>
    %9 = arith.maximumf %7, %8 : vector<1x64xf32>
    %c0_4 = arith.constant 0 : index
    %c0_5 = arith.constant 0 : index
    %10 = vector.load %arg2[%c0_4, %c0_5] : memref<1x64xf32, #tpu.memory_space<vmem>>, vector<1x64xf32>
    %cst_6 = arith.constant 9.99999974E-6 : f32
    %11 = vector.broadcast %cst_6 : f32 to vector<1x64xf32>
    %12 = arith.addf %9, %11 : vector<1x64xf32>
    %13 = math.rsqrt %12 : vector<1x64xf32>
    %14 = arith.mulf %10, %13 : vector<1x64xf32>
    %c0_7 = arith.constant 0 : index
    %c0_8 = arith.constant 0 : index
    %15 = vector.load %arg3[%c0_7, %c0_8] : memref<1x64xf32, #tpu.memory_space<vmem>>, vector<1x64xf32>
    %16 = arith.mulf %2, %14 : vector<1x64xf32>
    %17 = arith.subf %15, %16 : vector<1x64xf32>
    %cst_9 = arith.constant 0.000000e+00 : f32
    %18 = vector.broadcast %cst_9 : f32 to vector<1x64xf32>
    %19 = arith.cmpf ogt, %14, %18 : vector<1x64xf32>
    %c0_10 = arith.constant 0 : index
    %c0_11 = arith.constant 0 : index
    %20 = vector.load %arg4[%c0_10, %c0_11] : memref<64x64xf32, #tpu.memory_space<vmem>>, vector<64x64xf32>
    %c0_12 = arith.constant 0 : index
    %c0_13 = arith.constant 0 : index
    %21 = vector.load %arg5[%c0_12, %c0_13] : memref<64x64xf32, #tpu.memory_space<vmem>>, vector<64x64xf32>
    %22 = vector.shape_cast %19 : vector<1x64xi1> to vector<1x64xi1>
    %23 = vector.broadcast %22 : vector<1x64xi1> to vector<64x64xi1>
    %24 = arith.select %23, %20, %21 : vector<64x64xi1>, vector<64x64xf32>
    %25 = vector.broadcast %14 : vector<1x64xf32> to vector<64x64xf32>
    %26 = arith.mulf %24, %25 : vector<64x64xf32>
    %27 = vector.broadcast %17 : vector<1x64xf32> to vector<64x64xf32>
    %28 = arith.addf %26, %27 : vector<64x64xf32>
    %cst_14 = arith.constant 0.000000e+00 : f32
    %29 = vector.broadcast %cst_14 : f32 to vector<64x64xf32>
    %30 = arith.cmpf ogt, %28, %29 : vector<64x64xf32>
    %cst_15 = arith.constant 2.000000e-01 : f32
    %31 = vector.broadcast %cst_15 : f32 to vector<64x64xf32>
    %32 = arith.mulf %31, %28 : vector<64x64xf32>
    %33 = arith.select %30, %28, %32 : vector<64x64xi1>, vector<64x64xf32>
    %34 = arith.truncf %33 : vector<64x64xf32> to vector<64x64xbf16>
    %c0_16 = arith.constant 0 : index
    %c0_17 = arith.constant 0 : index
    %35 = vector.load %arg6[%c0_16, %c0_17] : memref<64x64xbf16, #tpu.memory_space<vmem>>, vector<64x64xbf16>
    tpu.vector_store %arg6[%c0_16, %c0_17], %34 {strides = array<i32>} : memref<64x64xbf16, #tpu.memory_space<vmem>>, vector<64x64xbf16>,
    return
  }
  func.func @transform_0(%arg0: i32) -> (i32, i32) {
    %c0_i32 = arith.constant 0 : i32
    %c0_i32_0 = arith.constant 0 : i32
    %c0_i32_1 = arith.constant 0 : i32
    return %c0_i32, %c0_i32_0 : i32, i32
  }
  func.func @transform_1(%arg0: i32) -> (i32, i32) {
    %c0_i32 = arith.constant 0 : i32
    %c0_i32_0 = arith.constant 0 : i32
    %c0_i32_1 = arith.constant 0 : i32
    return %c0_i32, %c0_i32_0 : i32, i32
  }
  func.func @transform_2(%arg0: i32) -> (i32, i32) {
    %c0_i32 = arith.constant 0 : i32
    %c0_i32_0 = arith.constant 0 : i32
    %c0_i32_1 = arith.constant 0 : i32
    return %c0_i32, %c0_i32_0 : i32, i32
  }
  func.func @transform_3(%arg0: i32) -> (i32, i32) {
    %c0_i32 = arith.constant 0 : i32
    %c0_i32_0 = arith.constant 0 : i32
    return %arg0, %c0_i32 : i32, i32
  }
  func.func @transform_4(%arg0: i32) -> (i32, i32) {
    %c0_i32 = arith.constant 0 : i32
    %c0_i32_0 = arith.constant 0 : i32
    return %arg0, %c0_i32 : i32, i32
  }
  func.func @transform_5(%arg0: i32) -> (i32, i32) {
    %c0_i32 = arith.constant 0 : i32
    %c0_i32_0 = arith.constant 0 : i32
    return %arg0, %c0_i32 : i32, i32
  }
}

module attributes {stable_mosaic.version = 11 : i64} {
  func.func @_edge_conv_bn_conv_kernel(%arg0: i32, %arg1: i32, %arg2: i32, %arg3: memref<1x64x64xbf16, #tpu.memory_space<vmem>>, %arg4: memref<64x64xbf16, #tpu.memory_space<vmem>>, %arg5: memref<64x64xbf16, #tpu.memory_space<vmem>>, %arg6: memref<64x64xbf16, #tpu.memory_space<vmem>>, %arg7: memref<8x64xf32, #tpu.memory_space<vmem>>, %arg8: memref<1x64xf32, #tpu.memory_space<vmem>>, %arg9: memref<1x64xf32, #tpu.memory_space<vmem>>, %arg10: memref<64x64xbf16, #tpu.memory_space<vmem>>, %arg11: memref<8x64xf32, #tpu.memory_space<vmem>>, %arg12: memref<64x64xf32, #tpu.memory_space<vmem>>, %arg13: memref<64x64xf32, #tpu.memory_space<vmem>>) attributes {dimension_semantics = [#tpu.dimension_semantics<parallel>, #tpu.dimension_semantics<arbitrary>, #tpu.dimension_semantics<arbitrary>], iteration_bounds = array<i64: 2, 1, 16>, scalar_prefetch = 0 : i64, scratch_operands = 0 : i64, tpu.core_type = #tpu.core_type<tc>, window_params = [{transform_indices = @transform_0, window_bounds = array<i64: 1, 64, 64>}, {transform_indices = @transform_1, window_bounds = array<i64: 64, 64>}, {pipeline_mode = #tpu.pipeline_mode<synchronous>, transform_indices = @transform_2, window_bounds = array<i64: 64, 64>}, {pipeline_mode = #tpu.pipeline_mode<synchronous>, transform_indices = @transform_3, window_bounds = array<i64: 64, 64>}, {pipeline_mode = #tpu.pipeline_mode<synchronous>, transform_indices = @transform_4, window_bounds = array<i64: 8, 64>}, {pipeline_mode = #tpu.pipeline_mode<synchronous>, transform_indices = @transform_5, window_bounds = array<i64: 1, 64>}, {pipeline_mode = #tpu.pipeline_mode<synchronous>, transform_indices = @transform_6, window_bounds = array<i64: 1, 64>}, {pipeline_mode = #tpu.pipeline_mode<synchronous>, transform_indices = @transform_7, window_bounds = array<i64: 64, 64>}, {transform_indices = @transform_8, window_bounds = array<i64: 8, 64>}, {transform_indices = @transform_9, window_bounds = array<i64: 64, 64>}, {transform_indices = @transform_10, window_bounds = array<i64: 64, 64>}]} {
    %c0 = arith.constant 0 : index
    %c0_0 = arith.constant 0 : index
    %c0_1 = arith.constant 0 : index
    %0 = vector.load %arg3[%c0, %c0_0, %c0_1] : memref<1x64x64xbf16, #tpu.memory_space<vmem>>, vector<1x64x64xbf16>
    %1 = vector.shape_cast %0 : vector<1x64x64xbf16> to vector<64x64xbf16>
    %c0_2 = arith.constant 0 : index
    %c0_3 = arith.constant 0 : index
    %2 = vector.load %arg5[%c0_2, %c0_3] : memref<64x64xbf16, #tpu.memory_space<vmem>>, vector<64x64xbf16>
    %cst = arith.constant dense<0.000000e+00> : vector<64x64xf32>
    %3 = tpu.matmul %1, %2, %cst {dimension_numbers = #tpu.dot_dimension_numbers<[1], [0], [0], [1], [0, 0, 1, 1], [], []>} : vector<64x64xbf16>, vector<64x64xbf16>, vector<64x64xf32> -> vector<64x64xf32>
    %c0_4 = arith.constant 0 : index
    %c0_5 = arith.constant 0 : index
    %4 = vector.load %arg4[%c0_4, %c0_5] : memref<64x64xbf16, #tpu.memory_space<vmem>>, vector<64x64xbf16>
    %c0_6 = arith.constant 0 : index
    %c0_7 = arith.constant 0 : index
    %5 = vector.load %arg6[%c0_6, %c0_7] : memref<64x64xbf16, #tpu.memory_space<vmem>>, vector<64x64xbf16>
    %cst_8 = arith.constant dense<0.000000e+00> : vector<64x64xf32>
    %6 = tpu.matmul %4, %5, %cst_8 {dimension_numbers = #tpu.dot_dimension_numbers<[1], [0], [0], [1], [0, 0, 1, 1], [], []>} : vector<64x64xbf16>, vector<64x64xbf16>, vector<64x64xf32> -> vector<64x64xf32>
    %7 = arith.addf %3, %6 : vector<64x64xf32>
    %c0_9 = arith.constant 0 : index
    %c0_10 = arith.constant 0 : index
    %8 = vector.load %arg7[%c0_9, %c0_10] : memref<8x64xf32, #tpu.memory_space<vmem>>, vector<8x64xf32>
    %c0_11 = arith.constant 0 : index
    %c0_12 = arith.constant 0 : index
    %9 = vector.load %arg8[%c0_11, %c0_12] : memref<1x64xf32, #tpu.memory_space<vmem>>, vector<1x64xf32>
    %c0_13 = arith.constant 0 : index
    %c0_14 = arith.constant 0 : index
    %10 = vector.load %arg9[%c0_13, %c0_14] : memref<1x64xf32, #tpu.memory_space<vmem>>, vector<1x64xf32>
    %11 = vector.extract_strided_slice %8 {offsets = [0, 0], sizes = [1, 64], strides = [1, 1]} : vector<8x64xf32> to vector<1x64xf32>
    %cst_15 = arith.constant 5.58035739E-4 : f32
    %12 = vector.broadcast %cst_15 : f32 to vector<1x64xf32>
    %13 = arith.mulf %11, %12 : vector<1x64xf32>
    %14 = vector.extract_strided_slice %8 {offsets = [1, 0], sizes = [1, 64], strides = [1, 1]} : vector<8x64xf32> to vector<1x64xf32>
    %cst_16 = arith.constant 5.58035739E-4 : f32
    %15 = vector.broadcast %cst_16 : f32 to vector<1x64xf32>
    %16 = arith.mulf %14, %15 : vector<1x64xf32>
    %17 = arith.mulf %13, %13 : vector<1x64xf32>
    %18 = arith.subf %16, %17 : vector<1x64xf32>
    %cst_17 = arith.constant 0.000000e+00 : f32
    %19 = vector.broadcast %cst_17 : f32 to vector<1x64xf32>
    %20 = arith.maximumf %18, %19 : vector<1x64xf32>
    %cst_18 = arith.constant 9.99999974E-6 : f32
    %21 = vector.broadcast %cst_18 : f32 to vector<1x64xf32>
    %22 = arith.addf %20, %21 : vector<1x64xf32>
    %23 = math.rsqrt %22 : vector<1x64xf32>
    %24 = arith.mulf %9, %23 : vector<1x64xf32>
    %25 = arith.mulf %13, %24 : vector<1x64xf32>
    %26 = arith.subf %10, %25 : vector<1x64xf32>
    %27 = vector.broadcast %24 : vector<1x64xf32> to vector<64x64xf32>
    %28 = arith.mulf %7, %27 : vector<64x64xf32>
    %29 = vector.broadcast %26 : vector<1x64xf32> to vector<64x64xf32>
    %30 = arith.addf %28, %29 : vector<64x64xf32>
    %cst_19 = arith.constant 0.000000e+00 : f32
    %31 = vector.broadcast %cst_19 : f32 to vector<64x64xf32>
    %32 = arith.cmpf ogt, %30, %31 : vector<64x64xf32>
    %cst_20 = arith.constant 2.000000e-01 : f32
    %33 = vector.broadcast %cst_20 : f32 to vector<64x64xf32>
    %34 = arith.mulf %33, %30 : vector<64x64xf32>
    %35 = arith.select %32, %30, %34 : vector<64x64xi1>, vector<64x64xf32>
    %36 = arith.truncf %35 : vector<64x64xf32> to vector<64x64xbf16>
    %c0_21 = arith.constant 0 : index
    %c0_22 = arith.constant 0 : index
    %37 = vector.load %arg10[%c0_21, %c0_22] : memref<64x64xbf16, #tpu.memory_space<vmem>>, vector<64x64xbf16>
    %cst_23 = arith.constant dense<0.000000e+00> : vector<64x64xf32>
    %38 = tpu.matmul %36, %37, %cst_23 {dimension_numbers = #tpu.dot_dimension_numbers<[1], [0], [0], [1], [0, 0, 1, 1], [], []>} : vector<64x64xbf16>, vector<64x64xbf16>, vector<64x64xf32> -> vector<64x64xf32>
    %c1_i32 = arith.constant 1 : i32
    %39 = arith.muli %arg0, %c1_i32 : i32
    %40 = arith.addi %39, %arg1 : i32
    %41 = tpu.iota {dimensions = array<i32: 0>} : vector<64x1xi32>
    %c64_i32 = arith.constant 64 : i32
    %42 = arith.muli %40, %c64_i32 : i32
    %43 = vector.broadcast %42 : i32 to vector<64x1xi32>
    %44 = arith.addi %43, %41 : vector<64x1xi32>
    %c112_i32 = arith.constant 112 : i32
    %45 = vector.broadcast %c112_i32 : i32 to vector<64x1xi32>
    %46 = arith.cmpi slt, %44, %45 : vector<64x1xi32>
    %cst_24 = arith.constant 0.000000e+00 : f32
    %47 = vector.shape_cast %46 : vector<64x1xi1> to vector<64x1xi1>
    %48 = vector.broadcast %47 : vector<64x1xi1> to vector<64x64xi1>
    %49 = vector.broadcast %cst_24 : f32 to vector<64x64xf32>
    %50 = arith.select %48, %38, %49 : vector<64x64xi1>, vector<64x64xf32>
    %c0_i32 = arith.constant 0 : i32
    %51 = arith.cmpi eq, %arg1, %c0_i32 : i32
    %c0_i32_25 = arith.constant 0 : i32
    %52 = arith.cmpi eq, %arg2, %c0_i32_25 : i32
    %53 = arith.andi %51, %52 : i1
    %54 = arith.extui %53 : i1 to i32
    %c0_i32_26 = arith.constant 0 : i32
    %55 = arith.cmpi ne, %54, %c0_i32_26 : i32
    scf.if %55 {
      %cst_40 = arith.constant 0.000000e+00 : f32
      %73 = vector.broadcast %cst_40 : f32 to vector<8x64xf32>
      %c0_41 = arith.constant 0 : index
      %c0_42 = arith.constant 0 : index
      %74 = vector.load %arg11[%c0_41, %c0_42] : memref<8x64xf32, #tpu.memory_space<vmem>>, vector<8x64xf32>
      tpu.vector_store %arg11[%c0_41, %c0_42], %73 {strides = array<i32>} : memref<8x64xf32, #tpu.memory_space<vmem>>, vector<8x64xf32>,
    } else {
    }
    %c0_27 = arith.constant 0 : index
    %c0_28 = arith.constant 0 : index
    %56 = vector.load %arg11[%c0_27, %c0_28] : memref<8x64xf32, #tpu.memory_space<vmem>>, vector<1x64xf32>
    %cst_29 = arith.constant dense<0.000000e+00> : vector<64xf32>
    %57 = vector.multi_reduction <add>, %50, %cst_29 [0] : vector<64x64xf32> to vector<64xf32>
    %58 = vector.shape_cast %57 : vector<64xf32> to vector<1x64xf32>
    %59 = arith.addf %56, %58 : vector<1x64xf32>
    %c0_30 = arith.constant 0 : index
    %c0_31 = arith.constant 0 : index
    %60 = vector.load %arg11[%c0_30, %c0_31] : memref<8x64xf32, #tpu.memory_space<vmem>>, vector<1x64xf32>
    tpu.vector_store %arg11[%c0_30, %c0_31], %59 {strides = array<i32>} : memref<8x64xf32, #tpu.memory_space<vmem>>, vector<1x64xf32>,
    %c1 = arith.constant 1 : index
    %c0_32 = arith.constant 0 : index
    %61 = vector.load %arg11[%c1, %c0_32] : memref<8x64xf32, #tpu.memory_space<vmem>>, vector<1x64xf32>
    %62 = arith.mulf %50, %50 : vector<64x64xf32>
    %cst_33 = arith.constant dense<0.000000e+00> : vector<64xf32>
    %63 = vector.multi_reduction <add>, %62, %cst_33 [0] : vector<64x64xf32> to vector<64xf32>
    %64 = vector.shape_cast %63 : vector<64xf32> to vector<1x64xf32>
    %65 = arith.addf %61, %64 : vector<1x64xf32>
    %c1_34 = arith.constant 1 : index
    %c0_35 = arith.constant 0 : index
    %66 = vector.load %arg11[%c1_34, %c0_35] : memref<8x64xf32, #tpu.memory_space<vmem>>, vector<1x64xf32>
    tpu.vector_store %arg11[%c1_34, %c0_35], %65 {strides = array<i32>} : memref<8x64xf32, #tpu.memory_space<vmem>>, vector<1x64xf32>,
    %c0_i32_36 = arith.constant 0 : i32
    %67 = arith.cmpi eq, %arg2, %c0_i32_36 : i32
    %68 = arith.extui %67 : i1 to i32
    %c0_i32_37 = arith.constant 0 : i32
    %69 = arith.cmpi ne, %68, %c0_i32_37 : i32
    scf.if %69 {
      %c0_40 = arith.constant 0 : index
      %c0_41 = arith.constant 0 : index
      %73 = vector.load %arg12[%c0_40, %c0_41] : memref<64x64xf32, #tpu.memory_space<vmem>>, vector<64x64xf32>
      tpu.vector_store %arg12[%c0_40, %c0_41], %38 {strides = array<i32>} : memref<64x64xf32, #tpu.memory_space<vmem>>, vector<64x64xf32>,
      %c0_42 = arith.constant 0 : index
      %c0_43 = arith.constant 0 : index
      %74 = vector.load %arg13[%c0_42, %c0_43] : memref<64x64xf32, #tpu.memory_space<vmem>>, vector<64x64xf32>
      tpu.vector_store %arg13[%c0_42, %c0_43], %38 {strides = array<i32>} : memref<64x64xf32, #tpu.memory_space<vmem>>, vector<64x64xf32>,
    } else {
    }
    %c0_i32_38 = arith.constant 0 : i32
    %70 = arith.cmpi sgt, %arg2, %c0_i32_38 : i32
    %71 = arith.extui %70 : i1 to i32
    %c0_i32_39 = arith.constant 0 : i32
    %72 = arith.cmpi ne, %71, %c0_i32_39 : i32
    scf.if %72 {
      %c0_40 = arith.constant 0 : index
      %c0_41 = arith.constant 0 : index
      %73 = vector.load %arg12[%c0_40, %c0_41] : memref<64x64xf32, #tpu.memory_space<vmem>>, vector<64x64xf32>
      %74 = arith.maximumf %73, %38 : vector<64x64xf32>
      %c0_42 = arith.constant 0 : index
      %c0_43 = arith.constant 0 : index
      %75 = vector.load %arg12[%c0_42, %c0_43] : memref<64x64xf32, #tpu.memory_space<vmem>>, vector<64x64xf32>
      tpu.vector_store %arg12[%c0_42, %c0_43], %74 {strides = array<i32>} : memref<64x64xf32, #tpu.memory_space<vmem>>, vector<64x64xf32>,
      %c0_44 = arith.constant 0 : index
      %c0_45 = arith.constant 0 : index
      %76 = vector.load %arg13[%c0_44, %c0_45] : memref<64x64xf32, #tpu.memory_space<vmem>>, vector<64x64xf32>
      %77 = arith.minimumf %76, %38 : vector<64x64xf32>
      %c0_46 = arith.constant 0 : index
      %c0_47 = arith.constant 0 : index
      %78 = vector.load %arg13[%c0_46, %c0_47] : memref<64x64xf32, #tpu.memory_space<vmem>>, vector<64x64xf32>
      tpu.vector_store %arg13[%c0_46, %c0_47], %77 {strides = array<i32>} : memref<64x64xf32, #tpu.memory_space<vmem>>, vector<64x64xf32>,
    } else {
    }
    return
  }
  func.func @transform_0(%arg0: i32, %arg1: i32, %arg2: i32) -> (i32, i32, i32) {
    %c1_i32 = arith.constant 1 : i32
    %0 = arith.muli %arg0, %c1_i32 : i32
    %1 = arith.addi %0, %arg1 : i32
    %c0_i32 = arith.constant 0 : i32
    %c0_i32_0 = arith.constant 0 : i32
    return %arg2, %1, %c0_i32 : i32, i32, i32
  }
  func.func @transform_1(%arg0: i32, %arg1: i32, %arg2: i32) -> (i32, i32) {
    %c1_i32 = arith.constant 1 : i32
    %0 = arith.muli %arg0, %c1_i32 : i32
    %1 = arith.addi %0, %arg1 : i32
    %c0_i32 = arith.constant 0 : i32
    %c0_i32_0 = arith.constant 0 : i32
    return %1, %c0_i32 : i32, i32
  }
  func.func @transform_2(%arg0: i32, %arg1: i32, %arg2: i32) -> (i32, i32) {
    %c0_i32 = arith.constant 0 : i32
    %c0_i32_0 = arith.constant 0 : i32
    %c0_i32_1 = arith.constant 0 : i32
    return %c0_i32, %c0_i32_0 : i32, i32
  }
  func.func @transform_3(%arg0: i32, %arg1: i32, %arg2: i32) -> (i32, i32) {
    %c0_i32 = arith.constant 0 : i32
    %c0_i32_0 = arith.constant 0 : i32
    %c0_i32_1 = arith.constant 0 : i32
    return %c0_i32, %c0_i32_0 : i32, i32
  }
  func.func @transform_4(%arg0: i32, %arg1: i32, %arg2: i32) -> (i32, i32) {
    %c0_i32 = arith.constant 0 : i32
    %c0_i32_0 = arith.constant 0 : i32
    %c0_i32_1 = arith.constant 0 : i32
    return %c0_i32, %c0_i32_0 : i32, i32
  }
  func.func @transform_5(%arg0: i32, %arg1: i32, %arg2: i32) -> (i32, i32) {
    %c0_i32 = arith.constant 0 : i32
    %c0_i32_0 = arith.constant 0 : i32
    %c0_i32_1 = arith.constant 0 : i32
    return %c0_i32, %c0_i32_0 : i32, i32
  }
  func.func @transform_6(%arg0: i32, %arg1: i32, %arg2: i32) -> (i32, i32) {
    %c0_i32 = arith.constant 0 : i32
    %c0_i32_0 = arith.constant 0 : i32
    %c0_i32_1 = arith.constant 0 : i32
    return %c0_i32, %c0_i32_0 : i32, i32
  }
  func.func @transform_7(%arg0: i32, %arg1: i32, %arg2: i32) -> (i32, i32) {
    %c0_i32 = arith.constant 0 : i32
    %c0_i32_0 = arith.constant 0 : i32
    %c0_i32_1 = arith.constant 0 : i32
    return %c0_i32, %c0_i32_0 : i32, i32
  }
  func.func @transform_8(%arg0: i32, %arg1: i32, %arg2: i32) -> (i32, i32) {
    %c0_i32 = arith.constant 0 : i32
    %c0_i32_0 = arith.constant 0 : i32
    return %arg0, %c0_i32 : i32, i32
  }
  func.func @transform_9(%arg0: i32, %arg1: i32, %arg2: i32) -> (i32, i32) {
    %c1_i32 = arith.constant 1 : i32
    %0 = arith.muli %arg0, %c1_i32 : i32
    %1 = arith.addi %0, %arg1 : i32
    %c0_i32 = arith.constant 0 : i32
    %c0_i32_0 = arith.constant 0 : i32
    return %1, %c0_i32 : i32, i32
  }
  func.func @transform_10(%arg0: i32, %arg1: i32, %arg2: i32) -> (i32, i32) {
    %c1_i32 = arith.constant 1 : i32
    %0 = arith.muli %arg0, %c1_i32 : i32
    %1 = arith.addi %0, %arg1 : i32
    %c0_i32 = arith.constant 0 : i32
    %c0_i32_0 = arith.constant 0 : i32
    return %1, %c0_i32 : i32, i32
  }
}

module attributes {stable_mosaic.version = 11 : i64} {
  func.func @_edge_conv_stats_kernel(%arg0: i32, %arg1: i32, %arg2: i32, %arg3: memref<1x64x64xbf16, #tpu.memory_space<vmem>>, %arg4: memref<64x64xbf16, #tpu.memory_space<vmem>>, %arg5: memref<64x64xbf16, #tpu.memory_space<vmem>>, %arg6: memref<64x64xbf16, #tpu.memory_space<vmem>>, %arg7: memref<8x64xf32, #tpu.memory_space<vmem>>) attributes {dimension_semantics = [#tpu.dimension_semantics<parallel>, #tpu.dimension_semantics<arbitrary>, #tpu.dimension_semantics<arbitrary>], iteration_bounds = array<i64: 2, 1, 8>, scalar_prefetch = 0 : i64, scratch_operands = 0 : i64, tpu.core_type = #tpu.core_type<tc>, window_params = [{transform_indices = @transform_0, window_bounds = array<i64: 1, 64, 64>}, {transform_indices = @transform_1, window_bounds = array<i64: 64, 64>}, {pipeline_mode = #tpu.pipeline_mode<synchronous>, transform_indices = @transform_2, window_bounds = array<i64: 64, 64>}, {pipeline_mode = #tpu.pipeline_mode<synchronous>, transform_indices = @transform_3, window_bounds = array<i64: 64, 64>}, {transform_indices = @transform_4, window_bounds = array<i64: 8, 64>}]} {
    %c0 = arith.constant 0 : index
    %c0_0 = arith.constant 0 : index
    %c0_1 = arith.constant 0 : index
    %0 = vector.load %arg3[%c0, %c0_0, %c0_1] : memref<1x64x64xbf16, #tpu.memory_space<vmem>>, vector<1x64x64xbf16>
    %1 = vector.shape_cast %0 : vector<1x64x64xbf16> to vector<64x64xbf16>
    %c0_2 = arith.constant 0 : index
    %c0_3 = arith.constant 0 : index
    %2 = vector.load %arg5[%c0_2, %c0_3] : memref<64x64xbf16, #tpu.memory_space<vmem>>, vector<64x64xbf16>
    %cst = arith.constant dense<0.000000e+00> : vector<64x64xf32>
    %3 = tpu.matmul %1, %2, %cst {dimension_numbers = #tpu.dot_dimension_numbers<[1], [0], [0], [1], [0, 0, 1, 1], [], []>} : vector<64x64xbf16>, vector<64x64xbf16>, vector<64x64xf32> -> vector<64x64xf32>
    %c0_4 = arith.constant 0 : index
    %c0_5 = arith.constant 0 : index
    %4 = vector.load %arg4[%c0_4, %c0_5] : memref<64x64xbf16, #tpu.memory_space<vmem>>, vector<64x64xbf16>
    %c0_6 = arith.constant 0 : index
    %c0_7 = arith.constant 0 : index
    %5 = vector.load %arg6[%c0_6, %c0_7] : memref<64x64xbf16, #tpu.memory_space<vmem>>, vector<64x64xbf16>
    %cst_8 = arith.constant dense<0.000000e+00> : vector<64x64xf32>
    %6 = tpu.matmul %4, %5, %cst_8 {dimension_numbers = #tpu.dot_dimension_numbers<[1], [0], [0], [1], [0, 0, 1, 1], [], []>} : vector<64x64xbf16>, vector<64x64xbf16>, vector<64x64xf32> -> vector<64x64xf32>
    %7 = arith.addf %3, %6 : vector<64x64xf32>
    %c0_i32 = arith.constant 0 : i32
    %8 = arith.cmpi eq, %arg1, %c0_i32 : i32
    %c0_i32_9 = arith.constant 0 : i32
    %9 = arith.cmpi eq, %arg2, %c0_i32_9 : i32
    %10 = arith.andi %8, %9 : i1
    %11 = arith.extui %10 : i1 to i32
    %c0_i32_10 = arith.constant 0 : i32
    %12 = arith.cmpi ne, %11, %c0_i32_10 : i32
    scf.if %12 {
      %cst_20 = arith.constant 0.000000e+00 : f32
      %24 = vector.broadcast %cst_20 : f32 to vector<8x64xf32>
      %c0_21 = arith.constant 0 : index
      %c0_22 = arith.constant 0 : index
      %25 = vector.load %arg7[%c0_21, %c0_22] : memref<8x64xf32, #tpu.memory_space<vmem>>, vector<8x64xf32>
      tpu.vector_store %arg7[%c0_21, %c0_22], %24 {strides = array<i32>} : memref<8x64xf32, #tpu.memory_space<vmem>>, vector<8x64xf32>,
    } else {
    }
    %c0_11 = arith.constant 0 : index
    %c0_12 = arith.constant 0 : index
    %13 = vector.load %arg7[%c0_11, %c0_12] : memref<8x64xf32, #tpu.memory_space<vmem>>, vector<1x64xf32>
    %cst_13 = arith.constant dense<0.000000e+00> : vector<64xf32>
    %14 = vector.multi_reduction <add>, %7, %cst_13 [0] : vector<64x64xf32> to vector<64xf32>
    %15 = vector.shape_cast %14 : vector<64xf32> to vector<1x64xf32>
    %16 = arith.addf %13, %15 : vector<1x64xf32>
    %c0_14 = arith.constant 0 : index
    %c0_15 = arith.constant 0 : index
    %17 = vector.load %arg7[%c0_14, %c0_15] : memref<8x64xf32, #tpu.memory_space<vmem>>, vector<1x64xf32>
    tpu.vector_store %arg7[%c0_14, %c0_15], %16 {strides = array<i32>} : memref<8x64xf32, #tpu.memory_space<vmem>>, vector<1x64xf32>,
    %c1 = arith.constant 1 : index
    %c0_16 = arith.constant 0 : index
    %18 = vector.load %arg7[%c1, %c0_16] : memref<8x64xf32, #tpu.memory_space<vmem>>, vector<1x64xf32>
    %19 = arith.mulf %7, %7 : vector<64x64xf32>
    %cst_17 = arith.constant dense<0.000000e+00> : vector<64xf32>
    %20 = vector.multi_reduction <add>, %19, %cst_17 [0] : vector<64x64xf32> to vector<64xf32>
    %21 = vector.shape_cast %20 : vector<64xf32> to vector<1x64xf32>
    %22 = arith.addf %18, %21 : vector<1x64xf32>
    %c1_18 = arith.constant 1 : index
    %c0_19 = arith.constant 0 : index
    %23 = vector.load %arg7[%c1_18, %c0_19] : memref<8x64xf32, #tpu.memory_space<vmem>>, vector<1x64xf32>
    tpu.vector_store %arg7[%c1_18, %c0_19], %22 {strides = array<i32>} : memref<8x64xf32, #tpu.memory_space<vmem>>, vector<1x64xf32>,
    return
  }
  func.func @transform_0(%arg0: i32, %arg1: i32, %arg2: i32) -> (i32, i32, i32) {
    %c1_i32 = arith.constant 1 : i32
    %0 = arith.muli %arg0, %c1_i32 : i32
    %1 = arith.addi %0, %arg1 : i32
    %c0_i32 = arith.constant 0 : i32
    %c0_i32_0 = arith.constant 0 : i32
    return %arg2, %1, %c0_i32 : i32, i32, i32
  }
  func.func @transform_1(%arg0: i32, %arg1: i32, %arg2: i32) -> (i32, i32) {
    %c1_i32 = arith.constant 1 : i32
    %0 = arith.muli %arg0, %c1_i32 : i32
    %1 = arith.addi %0, %arg1 : i32
    %c0_i32 = arith.constant 0 : i32
    %c0_i32_0 = arith.constant 0 : i32
    return %1, %c0_i32 : i32, i32
  }
  func.func @transform_2(%arg0: i32, %arg1: i32, %arg2: i32) -> (i32, i32) {
    %c0_i32 = arith.constant 0 : i32
    %c0_i32_0 = arith.constant 0 : i32
    %c0_i32_1 = arith.constant 0 : i32
    return %c0_i32, %c0_i32_0 : i32, i32
  }
  func.func @transform_3(%arg0: i32, %arg1: i32, %arg2: i32) -> (i32, i32) {
    %c0_i32 = arith.constant 0 : i32
    %c0_i32_0 = arith.constant 0 : i32
    %c0_i32_1 = arith.constant 0 : i32
    return %c0_i32, %c0_i32_0 : i32, i32
  }
  func.func @transform_4(%arg0: i32, %arg1: i32, %arg2: i32) -> (i32, i32) {
    %c0_i32 = arith.constant 0 : i32
    %c0_i32_0 = arith.constant 0 : i32
    return %arg0, %c0_i32 : i32, i32
  }
}

module attributes {stable_mosaic.version = 11 : i64} {
  func.func @_edge_conv_bn_conv_kernel(%arg0: i32, %arg1: i32, %arg2: i32, %arg3: memref<1x64x64xbf16, #tpu.memory_space<vmem>>, %arg4: memref<64x64xbf16, #tpu.memory_space<vmem>>, %arg5: memref<64x64xbf16, #tpu.memory_space<vmem>>, %arg6: memref<64x64xbf16, #tpu.memory_space<vmem>>, %arg7: memref<8x64xf32, #tpu.memory_space<vmem>>, %arg8: memref<1x64xf32, #tpu.memory_space<vmem>>, %arg9: memref<1x64xf32, #tpu.memory_space<vmem>>, %arg10: memref<64x64xbf16, #tpu.memory_space<vmem>>, %arg11: memref<8x64xf32, #tpu.memory_space<vmem>>, %arg12: memref<64x64xf32, #tpu.memory_space<vmem>>, %arg13: memref<64x64xf32, #tpu.memory_space<vmem>>) attributes {dimension_semantics = [#tpu.dimension_semantics<parallel>, #tpu.dimension_semantics<arbitrary>, #tpu.dimension_semantics<arbitrary>], iteration_bounds = array<i64: 2, 1, 8>, scalar_prefetch = 0 : i64, scratch_operands = 0 : i64, tpu.core_type = #tpu.core_type<tc>, window_params = [{transform_indices = @transform_0, window_bounds = array<i64: 1, 64, 64>}, {transform_indices = @transform_1, window_bounds = array<i64: 64, 64>}, {pipeline_mode = #tpu.pipeline_mode<synchronous>, transform_indices = @transform_2, window_bounds = array<i64: 64, 64>}, {pipeline_mode = #tpu.pipeline_mode<synchronous>, transform_indices = @transform_3, window_bounds = array<i64: 64, 64>}, {pipeline_mode = #tpu.pipeline_mode<synchronous>, transform_indices = @transform_4, window_bounds = array<i64: 8, 64>}, {pipeline_mode = #tpu.pipeline_mode<synchronous>, transform_indices = @transform_5, window_bounds = array<i64: 1, 64>}, {pipeline_mode = #tpu.pipeline_mode<synchronous>, transform_indices = @transform_6, window_bounds = array<i64: 1, 64>}, {pipeline_mode = #tpu.pipeline_mode<synchronous>, transform_indices = @transform_7, window_bounds = array<i64: 64, 64>}, {transform_indices = @transform_8, window_bounds = array<i64: 8, 64>}, {transform_indices = @transform_9, window_bounds = array<i64: 64, 64>}, {transform_indices = @transform_10, window_bounds = array<i64: 64, 64>}]} {
    %c0 = arith.constant 0 : index
    %c0_0 = arith.constant 0 : index
    %c0_1 = arith.constant 0 : index
    %0 = vector.load %arg3[%c0, %c0_0, %c0_1] : memref<1x64x64xbf16, #tpu.memory_space<vmem>>, vector<1x64x64xbf16>
    %1 = vector.shape_cast %0 : vector<1x64x64xbf16> to vector<64x64xbf16>
    %c0_2 = arith.constant 0 : index
    %c0_3 = arith.constant 0 : index
    %2 = vector.load %arg5[%c0_2, %c0_3] : memref<64x64xbf16, #tpu.memory_space<vmem>>, vector<64x64xbf16>
    %cst = arith.constant dense<0.000000e+00> : vector<64x64xf32>
    %3 = tpu.matmul %1, %2, %cst {dimension_numbers = #tpu.dot_dimension_numbers<[1], [0], [0], [1], [0, 0, 1, 1], [], []>} : vector<64x64xbf16>, vector<64x64xbf16>, vector<64x64xf32> -> vector<64x64xf32>
    %c0_4 = arith.constant 0 : index
    %c0_5 = arith.constant 0 : index
    %4 = vector.load %arg4[%c0_4, %c0_5] : memref<64x64xbf16, #tpu.memory_space<vmem>>, vector<64x64xbf16>
    %c0_6 = arith.constant 0 : index
    %c0_7 = arith.constant 0 : index
    %5 = vector.load %arg6[%c0_6, %c0_7] : memref<64x64xbf16, #tpu.memory_space<vmem>>, vector<64x64xbf16>
    %cst_8 = arith.constant dense<0.000000e+00> : vector<64x64xf32>
    %6 = tpu.matmul %4, %5, %cst_8 {dimension_numbers = #tpu.dot_dimension_numbers<[1], [0], [0], [1], [0, 0, 1, 1], [], []>} : vector<64x64xbf16>, vector<64x64xbf16>, vector<64x64xf32> -> vector<64x64xf32>
    %7 = arith.addf %3, %6 : vector<64x64xf32>
    %c0_9 = arith.constant 0 : index
    %c0_10 = arith.constant 0 : index
    %8 = vector.load %arg7[%c0_9, %c0_10] : memref<8x64xf32, #tpu.memory_space<vmem>>, vector<8x64xf32>
    %c0_11 = arith.constant 0 : index
    %c0_12 = arith.constant 0 : index
    %9 = vector.load %arg8[%c0_11, %c0_12] : memref<1x64xf32, #tpu.memory_space<vmem>>, vector<1x64xf32>
    %c0_13 = arith.constant 0 : index
    %c0_14 = arith.constant 0 : index
    %10 = vector.load %arg9[%c0_13, %c0_14] : memref<1x64xf32, #tpu.memory_space<vmem>>, vector<1x64xf32>
    %11 = vector.extract_strided_slice %8 {offsets = [0, 0], sizes = [1, 64], strides = [1, 1]} : vector<8x64xf32> to vector<1x64xf32>
    %cst_15 = arith.constant 0.00111607148 : f32
    %12 = vector.broadcast %cst_15 : f32 to vector<1x64xf32>
    %13 = arith.mulf %11, %12 : vector<1x64xf32>
    %14 = vector.extract_strided_slice %8 {offsets = [1, 0], sizes = [1, 64], strides = [1, 1]} : vector<8x64xf32> to vector<1x64xf32>
    %cst_16 = arith.constant 0.00111607148 : f32
    %15 = vector.broadcast %cst_16 : f32 to vector<1x64xf32>
    %16 = arith.mulf %14, %15 : vector<1x64xf32>
    %17 = arith.mulf %13, %13 : vector<1x64xf32>
    %18 = arith.subf %16, %17 : vector<1x64xf32>
    %cst_17 = arith.constant 0.000000e+00 : f32
    %19 = vector.broadcast %cst_17 : f32 to vector<1x64xf32>
    %20 = arith.maximumf %18, %19 : vector<1x64xf32>
    %cst_18 = arith.constant 9.99999974E-6 : f32
    %21 = vector.broadcast %cst_18 : f32 to vector<1x64xf32>
    %22 = arith.addf %20, %21 : vector<1x64xf32>
    %23 = math.rsqrt %22 : vector<1x64xf32>
    %24 = arith.mulf %9, %23 : vector<1x64xf32>
    %25 = arith.mulf %13, %24 : vector<1x64xf32>
    %26 = arith.subf %10, %25 : vector<1x64xf32>
    %27 = vector.broadcast %24 : vector<1x64xf32> to vector<64x64xf32>
    %28 = arith.mulf %7, %27 : vector<64x64xf32>
    %29 = vector.broadcast %26 : vector<1x64xf32> to vector<64x64xf32>
    %30 = arith.addf %28, %29 : vector<64x64xf32>
    %cst_19 = arith.constant 0.000000e+00 : f32
    %31 = vector.broadcast %cst_19 : f32 to vector<64x64xf32>
    %32 = arith.cmpf ogt, %30, %31 : vector<64x64xf32>
    %cst_20 = arith.constant 2.000000e-01 : f32
    %33 = vector.broadcast %cst_20 : f32 to vector<64x64xf32>
    %34 = arith.mulf %33, %30 : vector<64x64xf32>
    %35 = arith.select %32, %30, %34 : vector<64x64xi1>, vector<64x64xf32>
    %36 = arith.truncf %35 : vector<64x64xf32> to vector<64x64xbf16>
    %c0_21 = arith.constant 0 : index
    %c0_22 = arith.constant 0 : index
    %37 = vector.load %arg10[%c0_21, %c0_22] : memref<64x64xbf16, #tpu.memory_space<vmem>>, vector<64x64xbf16>
    %cst_23 = arith.constant dense<0.000000e+00> : vector<64x64xf32>
    %38 = tpu.matmul %36, %37, %cst_23 {dimension_numbers = #tpu.dot_dimension_numbers<[1], [0], [0], [1], [0, 0, 1, 1], [], []>} : vector<64x64xbf16>, vector<64x64xbf16>, vector<64x64xf32> -> vector<64x64xf32>
    %c1_i32 = arith.constant 1 : i32
    %39 = arith.muli %arg0, %c1_i32 : i32
    %40 = arith.addi %39, %arg1 : i32
    %41 = tpu.iota {dimensions = array<i32: 0>} : vector<64x1xi32>
    %c64_i32 = arith.constant 64 : i32
    %42 = arith.muli %40, %c64_i32 : i32
    %43 = vector.broadcast %42 : i32 to vector<64x1xi32>
    %44 = arith.addi %43, %41 : vector<64x1xi32>
    %c112_i32 = arith.constant 112 : i32
    %45 = vector.broadcast %c112_i32 : i32 to vector<64x1xi32>
    %46 = arith.cmpi slt, %44, %45 : vector<64x1xi32>
    %cst_24 = arith.constant 0.000000e+00 : f32
    %47 = vector.shape_cast %46 : vector<64x1xi1> to vector<64x1xi1>
    %48 = vector.broadcast %47 : vector<64x1xi1> to vector<64x64xi1>
    %49 = vector.broadcast %cst_24 : f32 to vector<64x64xf32>
    %50 = arith.select %48, %38, %49 : vector<64x64xi1>, vector<64x64xf32>
    %c0_i32 = arith.constant 0 : i32
    %51 = arith.cmpi eq, %arg1, %c0_i32 : i32
    %c0_i32_25 = arith.constant 0 : i32
    %52 = arith.cmpi eq, %arg2, %c0_i32_25 : i32
    %53 = arith.andi %51, %52 : i1
    %54 = arith.extui %53 : i1 to i32
    %c0_i32_26 = arith.constant 0 : i32
    %55 = arith.cmpi ne, %54, %c0_i32_26 : i32
    scf.if %55 {
      %cst_40 = arith.constant 0.000000e+00 : f32
      %73 = vector.broadcast %cst_40 : f32 to vector<8x64xf32>
      %c0_41 = arith.constant 0 : index
      %c0_42 = arith.constant 0 : index
      %74 = vector.load %arg11[%c0_41, %c0_42] : memref<8x64xf32, #tpu.memory_space<vmem>>, vector<8x64xf32>
      tpu.vector_store %arg11[%c0_41, %c0_42], %73 {strides = array<i32>} : memref<8x64xf32, #tpu.memory_space<vmem>>, vector<8x64xf32>,
    } else {
    }
    %c0_27 = arith.constant 0 : index
    %c0_28 = arith.constant 0 : index
    %56 = vector.load %arg11[%c0_27, %c0_28] : memref<8x64xf32, #tpu.memory_space<vmem>>, vector<1x64xf32>
    %cst_29 = arith.constant dense<0.000000e+00> : vector<64xf32>
    %57 = vector.multi_reduction <add>, %50, %cst_29 [0] : vector<64x64xf32> to vector<64xf32>
    %58 = vector.shape_cast %57 : vector<64xf32> to vector<1x64xf32>
    %59 = arith.addf %56, %58 : vector<1x64xf32>
    %c0_30 = arith.constant 0 : index
    %c0_31 = arith.constant 0 : index
    %60 = vector.load %arg11[%c0_30, %c0_31] : memref<8x64xf32, #tpu.memory_space<vmem>>, vector<1x64xf32>
    tpu.vector_store %arg11[%c0_30, %c0_31], %59 {strides = array<i32>} : memref<8x64xf32, #tpu.memory_space<vmem>>, vector<1x64xf32>,
    %c1 = arith.constant 1 : index
    %c0_32 = arith.constant 0 : index
    %61 = vector.load %arg11[%c1, %c0_32] : memref<8x64xf32, #tpu.memory_space<vmem>>, vector<1x64xf32>
    %62 = arith.mulf %50, %50 : vector<64x64xf32>
    %cst_33 = arith.constant dense<0.000000e+00> : vector<64xf32>
    %63 = vector.multi_reduction <add>, %62, %cst_33 [0] : vector<64x64xf32> to vector<64xf32>
    %64 = vector.shape_cast %63 : vector<64xf32> to vector<1x64xf32>
    %65 = arith.addf %61, %64 : vector<1x64xf32>
    %c1_34 = arith.constant 1 : index
    %c0_35 = arith.constant 0 : index
    %66 = vector.load %arg11[%c1_34, %c0_35] : memref<8x64xf32, #tpu.memory_space<vmem>>, vector<1x64xf32>
    tpu.vector_store %arg11[%c1_34, %c0_35], %65 {strides = array<i32>} : memref<8x64xf32, #tpu.memory_space<vmem>>, vector<1x64xf32>,
    %c0_i32_36 = arith.constant 0 : i32
    %67 = arith.cmpi eq, %arg2, %c0_i32_36 : i32
    %68 = arith.extui %67 : i1 to i32
    %c0_i32_37 = arith.constant 0 : i32
    %69 = arith.cmpi ne, %68, %c0_i32_37 : i32
    scf.if %69 {
      %c0_40 = arith.constant 0 : index
      %c0_41 = arith.constant 0 : index
      %73 = vector.load %arg12[%c0_40, %c0_41] : memref<64x64xf32, #tpu.memory_space<vmem>>, vector<64x64xf32>
      tpu.vector_store %arg12[%c0_40, %c0_41], %38 {strides = array<i32>} : memref<64x64xf32, #tpu.memory_space<vmem>>, vector<64x64xf32>,
      %c0_42 = arith.constant 0 : index
      %c0_43 = arith.constant 0 : index
      %74 = vector.load %arg13[%c0_42, %c0_43] : memref<64x64xf32, #tpu.memory_space<vmem>>, vector<64x64xf32>
      tpu.vector_store %arg13[%c0_42, %c0_43], %38 {strides = array<i32>} : memref<64x64xf32, #tpu.memory_space<vmem>>, vector<64x64xf32>,
    } else {
    }
    %c0_i32_38 = arith.constant 0 : i32
    %70 = arith.cmpi sgt, %arg2, %c0_i32_38 : i32
    %71 = arith.extui %70 : i1 to i32
    %c0_i32_39 = arith.constant 0 : i32
    %72 = arith.cmpi ne, %71, %c0_i32_39 : i32
    scf.if %72 {
      %c0_40 = arith.constant 0 : index
      %c0_41 = arith.constant 0 : index
      %73 = vector.load %arg12[%c0_40, %c0_41] : memref<64x64xf32, #tpu.memory_space<vmem>>, vector<64x64xf32>
      %74 = arith.maximumf %73, %38 : vector<64x64xf32>
      %c0_42 = arith.constant 0 : index
      %c0_43 = arith.constant 0 : index
      %75 = vector.load %arg12[%c0_42, %c0_43] : memref<64x64xf32, #tpu.memory_space<vmem>>, vector<64x64xf32>
      tpu.vector_store %arg12[%c0_42, %c0_43], %74 {strides = array<i32>} : memref<64x64xf32, #tpu.memory_space<vmem>>, vector<64x64xf32>,
      %c0_44 = arith.constant 0 : index
      %c0_45 = arith.constant 0 : index
      %76 = vector.load %arg13[%c0_44, %c0_45] : memref<64x64xf32, #tpu.memory_space<vmem>>, vector<64x64xf32>
      %77 = arith.minimumf %76, %38 : vector<64x64xf32>
      %c0_46 = arith.constant 0 : index
      %c0_47 = arith.constant 0 : index
      %78 = vector.load %arg13[%c0_46, %c0_47] : memref<64x64xf32, #tpu.memory_space<vmem>>, vector<64x64xf32>
      tpu.vector_store %arg13[%c0_46, %c0_47], %77 {strides = array<i32>} : memref<64x64xf32, #tpu.memory_space<vmem>>, vector<64x64xf32>,
    } else {
    }
    return
  }
  func.func @transform_0(%arg0: i32, %arg1: i32, %arg2: i32) -> (i32, i32, i32) {
    %c1_i32 = arith.constant 1 : i32
    %0 = arith.muli %arg0, %c1_i32 : i32
    %1 = arith.addi %0, %arg1 : i32
    %c0_i32 = arith.constant 0 : i32
    %c0_i32_0 = arith.constant 0 : i32
    return %arg2, %1, %c0_i32 : i32, i32, i32
  }
  func.func @transform_1(%arg0: i32, %arg1: i32, %arg2: i32) -> (i32, i32) {
    %c1_i32 = arith.constant 1 : i32
    %0 = arith.muli %arg0, %c1_i32 : i32
    %1 = arith.addi %0, %arg1 : i32
    %c0_i32 = arith.constant 0 : i32
    %c0_i32_0 = arith.constant 0 : i32
    return %1, %c0_i32 : i32, i32
  }
  func.func @transform_2(%arg0: i32, %arg1: i32, %arg2: i32) -> (i32, i32) {
    %c0_i32 = arith.constant 0 : i32
    %c0_i32_0 = arith.constant 0 : i32
    %c0_i32_1 = arith.constant 0 : i32
    return %c0_i32, %c0_i32_0 : i32, i32
  }
  func.func @transform_3(%arg0: i32, %arg1: i32, %arg2: i32) -> (i32, i32) {
    %c0_i32 = arith.constant 0 : i32
    %c0_i32_0 = arith.constant 0 : i32
    %c0_i32_1 = arith.constant 0 : i32
    return %c0_i32, %c0_i32_0 : i32, i32
  }
  func.func @transform_4(%arg0: i32, %arg1: i32, %arg2: i32) -> (i32, i32) {
    %c0_i32 = arith.constant 0 : i32
    %c0_i32_0 = arith.constant 0 : i32
    %c0_i32_1 = arith.constant 0 : i32
    return %c0_i32, %c0_i32_0 : i32, i32
  }
  func.func @transform_5(%arg0: i32, %arg1: i32, %arg2: i32) -> (i32, i32) {
    %c0_i32 = arith.constant 0 : i32
    %c0_i32_0 = arith.constant 0 : i32
    %c0_i32_1 = arith.constant 0 : i32
    return %c0_i32, %c0_i32_0 : i32, i32
  }
  func.func @transform_6(%arg0: i32, %arg1: i32, %arg2: i32) -> (i32, i32) {
    %c0_i32 = arith.constant 0 : i32
    %c0_i32_0 = arith.constant 0 : i32
    %c0_i32_1 = arith.constant 0 : i32
    return %c0_i32, %c0_i32_0 : i32, i32
  }
  func.func @transform_7(%arg0: i32, %arg1: i32, %arg2: i32) -> (i32, i32) {
    %c0_i32 = arith.constant 0 : i32
    %c0_i32_0 = arith.constant 0 : i32
    %c0_i32_1 = arith.constant 0 : i32
    return %c0_i32, %c0_i32_0 : i32, i32
  }
  func.func @transform_8(%arg0: i32, %arg1: i32, %arg2: i32) -> (i32, i32) {
    %c0_i32 = arith.constant 0 : i32
    %c0_i32_0 = arith.constant 0 : i32
    return %arg0, %c0_i32 : i32, i32
  }
  func.func @transform_9(%arg0: i32, %arg1: i32, %arg2: i32) -> (i32, i32) {
    %c1_i32 = arith.constant 1 : i32
    %0 = arith.muli %arg0, %c1_i32 : i32
    %1 = arith.addi %0, %arg1 : i32
    %c0_i32 = arith.constant 0 : i32
    %c0_i32_0 = arith.constant 0 : i32
    return %1, %c0_i32 : i32, i32
  }
  func.func @transform_10(%arg0: i32, %arg1: i32, %arg2: i32) -> (i32, i32) {
    %c1_i32 = arith.constant 1 : i32
    %0 = arith.muli %arg0, %c1_i32 : i32
    %1 = arith.addi %0, %arg1 : i32
    %c0_i32 = arith.constant 0 : i32
    %c0_i32_0 = arith.constant 0 : i32
    return %1, %c0_i32 : i32, i32
  }
}

module attributes {stable_mosaic.version = 11 : i64} {
  func.func @_bn_act_dirmax_kernel(%arg0: i32, %arg1: memref<8x64xf32, #tpu.memory_space<vmem>>, %arg2: memref<1x64xf32, #tpu.memory_space<vmem>>, %arg3: memref<1x64xf32, #tpu.memory_space<vmem>>, %arg4: memref<64x64xf32, #tpu.memory_space<vmem>>, %arg5: memref<64x64xf32, #tpu.memory_space<vmem>>, %arg6: memref<64x64xf32, #tpu.memory_space<vmem>>) attributes {dimension_semantics = [#tpu.dimension_semantics<parallel>], iteration_bounds = array<i64: 2>, scalar_prefetch = 0 : i64, scratch_operands = 0 : i64, tpu.core_type = #tpu.core_type<tc>, window_params = [{pipeline_mode = #tpu.pipeline_mode<synchronous>, transform_indices = @transform_0, window_bounds = array<i64: 8, 64>}, {pipeline_mode = #tpu.pipeline_mode<synchronous>, transform_indices = @transform_1, window_bounds = array<i64: 1, 64>}, {pipeline_mode = #tpu.pipeline_mode<synchronous>, transform_indices = @transform_2, window_bounds = array<i64: 1, 64>}, {transform_indices = @transform_3, window_bounds = array<i64: 64, 64>}, {transform_indices = @transform_4, window_bounds = array<i64: 64, 64>}, {transform_indices = @transform_5, window_bounds = array<i64: 64, 64>}]} {
    %c0 = arith.constant 0 : index
    %c0_0 = arith.constant 0 : index
    %0 = vector.load %arg1[%c0, %c0_0] : memref<8x64xf32, #tpu.memory_space<vmem>>, vector<1x64xf32>
    %cst = arith.constant 0.00111607148 : f32
    %1 = vector.broadcast %cst : f32 to vector<1x64xf32>
    %2 = arith.mulf %0, %1 : vector<1x64xf32>
    %c1 = arith.constant 1 : index
    %c0_1 = arith.constant 0 : index
    %3 = vector.load %arg1[%c1, %c0_1] : memref<8x64xf32, #tpu.memory_space<vmem>>, vector<1x64xf32>
    %cst_2 = arith.constant 0.00111607148 : f32
    %4 = vector.broadcast %cst_2 : f32 to vector<1x64xf32>
    %5 = arith.mulf %3, %4 : vector<1x64xf32>
    %6 = arith.mulf %2, %2 : vector<1x64xf32>
    %7 = arith.subf %5, %6 : vector<1x64xf32>
    %cst_3 = arith.constant 0.000000e+00 : f32
    %8 = vector.broadcast %cst_3 : f32 to vector<1x64xf32>
    %9 = arith.maximumf %7, %8 : vector<1x64xf32>
    %c0_4 = arith.constant 0 : index
    %c0_5 = arith.constant 0 : index
    %10 = vector.load %arg2[%c0_4, %c0_5] : memref<1x64xf32, #tpu.memory_space<vmem>>, vector<1x64xf32>
    %cst_6 = arith.constant 9.99999974E-6 : f32
    %11 = vector.broadcast %cst_6 : f32 to vector<1x64xf32>
    %12 = arith.addf %9, %11 : vector<1x64xf32>
    %13 = math.rsqrt %12 : vector<1x64xf32>
    %14 = arith.mulf %10, %13 : vector<1x64xf32>
    %c0_7 = arith.constant 0 : index
    %c0_8 = arith.constant 0 : index
    %15 = vector.load %arg3[%c0_7, %c0_8] : memref<1x64xf32, #tpu.memory_space<vmem>>, vector<1x64xf32>
    %16 = arith.mulf %2, %14 : vector<1x64xf32>
    %17 = arith.subf %15, %16 : vector<1x64xf32>
    %cst_9 = arith.constant 0.000000e+00 : f32
    %18 = vector.broadcast %cst_9 : f32 to vector<1x64xf32>
    %19 = arith.cmpf ogt, %14, %18 : vector<1x64xf32>
    %c0_10 = arith.constant 0 : index
    %c0_11 = arith.constant 0 : index
    %20 = vector.load %arg4[%c0_10, %c0_11] : memref<64x64xf32, #tpu.memory_space<vmem>>, vector<64x64xf32>
    %c0_12 = arith.constant 0 : index
    %c0_13 = arith.constant 0 : index
    %21 = vector.load %arg5[%c0_12, %c0_13] : memref<64x64xf32, #tpu.memory_space<vmem>>, vector<64x64xf32>
    %22 = vector.shape_cast %19 : vector<1x64xi1> to vector<1x64xi1>
    %23 = vector.broadcast %22 : vector<1x64xi1> to vector<64x64xi1>
    %24 = arith.select %23, %20, %21 : vector<64x64xi1>, vector<64x64xf32>
    %25 = vector.broadcast %14 : vector<1x64xf32> to vector<64x64xf32>
    %26 = arith.mulf %24, %25 : vector<64x64xf32>
    %27 = vector.broadcast %17 : vector<1x64xf32> to vector<64x64xf32>
    %28 = arith.addf %26, %27 : vector<64x64xf32>
    %cst_14 = arith.constant 0.000000e+00 : f32
    %29 = vector.broadcast %cst_14 : f32 to vector<64x64xf32>
    %30 = arith.cmpf ogt, %28, %29 : vector<64x64xf32>
    %cst_15 = arith.constant 2.000000e-01 : f32
    %31 = vector.broadcast %cst_15 : f32 to vector<64x64xf32>
    %32 = arith.mulf %31, %28 : vector<64x64xf32>
    %33 = arith.select %30, %28, %32 : vector<64x64xi1>, vector<64x64xf32>
    %c0_16 = arith.constant 0 : index
    %c0_17 = arith.constant 0 : index
    %34 = vector.load %arg6[%c0_16, %c0_17] : memref<64x64xf32, #tpu.memory_space<vmem>>, vector<64x64xf32>
    tpu.vector_store %arg6[%c0_16, %c0_17], %33 {strides = array<i32>} : memref<64x64xf32, #tpu.memory_space<vmem>>, vector<64x64xf32>,
    return
  }
  func.func @transform_0(%arg0: i32) -> (i32, i32) {
    %c0_i32 = arith.constant 0 : i32
    %c0_i32_0 = arith.constant 0 : i32
    %c0_i32_1 = arith.constant 0 : i32
    return %c0_i32, %c0_i32_0 : i32, i32
  }
  func.func @transform_1(%arg0: i32) -> (i32, i32) {
    %c0_i32 = arith.constant 0 : i32
    %c0_i32_0 = arith.constant 0 : i32
    %c0_i32_1 = arith.constant 0 : i32
    return %c0_i32, %c0_i32_0 : i32, i32
  }
  func.func @transform_2(%arg0: i32) -> (i32, i32) {
    %c0_i32 = arith.constant 0 : i32
    %c0_i32_0 = arith.constant 0 : i32
    %c0_i32_1 = arith.constant 0 : i32
    return %c0_i32, %c0_i32_0 : i32, i32
  }
  func.func @transform_3(%arg0: i32) -> (i32, i32) {
    %c0_i32 = arith.constant 0 : i32
    %c0_i32_0 = arith.constant 0 : i32
    return %arg0, %c0_i32 : i32, i32
  }
  func.func @transform_4(%arg0: i32) -> (i32, i32) {
    %c0_i32 = arith.constant 0 : i32
    %c0_i32_0 = arith.constant 0 : i32
    return %arg0, %c0_i32 : i32, i32
  }
  func.func @transform_5(%arg0: i32) -> (i32, i32) {
    %c0_i32 = arith.constant 0 : i32
    %c0_i32_0 = arith.constant 0 : i32
    return %arg0, %c0_i32 : i32, i32
  }
}

module attributes {stable_mosaic.version = 11 : i64} {
  func.func @_edge_chain_conv5_kernel(%arg0: i32, %arg1: i32, %arg2: i32, %arg3: memref<1x64x64xbf16, #tpu.memory_space<vmem>>, %arg4: memref<64x64xbf16, #tpu.memory_space<vmem>>, %arg5: memref<64x64xbf16, #tpu.memory_space<vmem>>, %arg6: memref<64x64xbf16, #tpu.memory_space<vmem>>, %arg7: memref<8x64xf32, #tpu.memory_space<vmem>>, %arg8: memref<1x64xf32, #tpu.memory_space<vmem>>, %arg9: memref<1x64xf32, #tpu.memory_space<vmem>>, %arg10: memref<64x64xbf16, #tpu.memory_space<vmem>>, %arg11: memref<8x64xf32, #tpu.memory_space<vmem>>, %arg12: memref<1x64xf32, #tpu.memory_space<vmem>>, %arg13: memref<1x64xf32, #tpu.memory_space<vmem>>, %arg14: memref<64x64xbf16, #tpu.memory_space<vmem>>, %arg15: memref<64x64xbf16, #tpu.memory_space<vmem>>, %arg16: memref<64x64xbf16, #tpu.memory_space<vmem>>, %arg17: memref<8x64xf32, #tpu.memory_space<vmem>>, %arg18: memref<64x64xf32, #tpu.memory_space<vmem>>, %arg19: memref<64x64xf32, #tpu.memory_space<vmem>>) attributes {dimension_semantics = [#tpu.dimension_semantics<parallel>, #tpu.dimension_semantics<arbitrary>, #tpu.dimension_semantics<arbitrary>], iteration_bounds = array<i64: 2, 1, 8>, scalar_prefetch = 0 : i64, scratch_operands = 0 : i64, tpu.core_type = #tpu.core_type<tc>, window_params = [{transform_indices = @transform_0, window_bounds = array<i64: 1, 64, 64>}, {transform_indices = @transform_1, window_bounds = array<i64: 64, 64>}, {pipeline_mode = #tpu.pipeline_mode<synchronous>, transform_indices = @transform_2, window_bounds = array<i64: 64, 64>}, {pipeline_mode = #tpu.pipeline_mode<synchronous>, transform_indices = @transform_3, window_bounds = array<i64: 64, 64>}, {pipeline_mode = #tpu.pipeline_mode<synchronous>, transform_indices = @transform_4, window_bounds = array<i64: 8, 64>}, {pipeline_mode = #tpu.pipeline_mode<synchronous>, transform_indices = @transform_5, window_bounds = array<i64: 1, 64>}, {pipeline_mode = #tpu.pipeline_mode<synchronous>, transform_indices = @transform_6, window_bounds = array<i64: 1, 64>}, {pipeline_mode = #tpu.pipeline_mode<synchronous>, transform_indices = @transform_7, window_bounds = array<i64: 64, 64>}, {pipeline_mode = #tpu.pipeline_mode<synchronous>, transform_indices = @transform_8, window_bounds = array<i64: 8, 64>}, {pipeline_mode = #tpu.pipeline_mode<synchronous>, transform_indices = @transform_9, window_bounds = array<i64: 1, 64>}, {pipeline_mode = #tpu.pipeline_mode<synchronous>, transform_indices = @transform_10, window_bounds = array<i64: 1, 64>}, {pipeline_mode = #tpu.pipeline_mode<synchronous>, transform_indices = @transform_11, window_bounds = array<i64: 64, 64>}, {pipeline_mode = #tpu.pipeline_mode<synchronous>, transform_indices = @transform_12, window_bounds = array<i64: 64, 64>}, {transform_indices = @transform_13, window_bounds = array<i64: 64, 64>}, {transform_indices = @transform_14, window_bounds = array<i64: 8, 64>}, {transform_indices = @transform_15, window_bounds = array<i64: 64, 64>}, {transform_indices = @transform_16, window_bounds = array<i64: 64, 64>}]} {
    %c0 = arith.constant 0 : index
    %c0_0 = arith.constant 0 : index
    %c0_1 = arith.constant 0 : index
    %0 = vector.load %arg3[%c0, %c0_0, %c0_1] : memref<1x64x64xbf16, #tpu.memory_space<vmem>>, vector<1x64x64xbf16>
    %1 = vector.shape_cast %0 : vector<1x64x64xbf16> to vector<64x64xbf16>
    %c0_2 = arith.constant 0 : index
    %c0_3 = arith.constant 0 : index
    %2 = vector.load %arg5[%c0_2, %c0_3] : memref<64x64xbf16, #tpu.memory_space<vmem>>, vector<64x64xbf16>
    %cst = arith.constant dense<0.000000e+00> : vector<64x64xf32>
    %3 = tpu.matmul %1, %2, %cst {dimension_numbers = #tpu.dot_dimension_numbers<[1], [0], [0], [1], [0, 0, 1, 1], [], []>} : vector<64x64xbf16>, vector<64x64xbf16>, vector<64x64xf32> -> vector<64x64xf32>
    %c0_4 = arith.constant 0 : index
    %c0_5 = arith.constant 0 : index
    %4 = vector.load %arg4[%c0_4, %c0_5] : memref<64x64xbf16, #tpu.memory_space<vmem>>, vector<64x64xbf16>
    %c0_6 = arith.constant 0 : index
    %c0_7 = arith.constant 0 : index
    %5 = vector.load %arg6[%c0_6, %c0_7] : memref<64x64xbf16, #tpu.memory_space<vmem>>, vector<64x64xbf16>
    %cst_8 = arith.constant dense<0.000000e+00> : vector<64x64xf32>
    %6 = tpu.matmul %4, %5, %cst_8 {dimension_numbers = #tpu.dot_dimension_numbers<[1], [0], [0], [1], [0, 0, 1, 1], [], []>} : vector<64x64xbf16>, vector<64x64xbf16>, vector<64x64xf32> -> vector<64x64xf32>
    %7 = arith.addf %3, %6 : vector<64x64xf32>
    %c0_9 = arith.constant 0 : index
    %c0_10 = arith.constant 0 : index
    %8 = vector.load %arg7[%c0_9, %c0_10] : memref<8x64xf32, #tpu.memory_space<vmem>>, vector<8x64xf32>
    %c0_11 = arith.constant 0 : index
    %c0_12 = arith.constant 0 : index
    %9 = vector.load %arg8[%c0_11, %c0_12] : memref<1x64xf32, #tpu.memory_space<vmem>>, vector<1x64xf32>
    %c0_13 = arith.constant 0 : index
    %c0_14 = arith.constant 0 : index
    %10 = vector.load %arg9[%c0_13, %c0_14] : memref<1x64xf32, #tpu.memory_space<vmem>>, vector<1x64xf32>
    %11 = vector.extract_strided_slice %8 {offsets = [0, 0], sizes = [1, 64], strides = [1, 1]} : vector<8x64xf32> to vector<1x64xf32>
    %cst_15 = arith.constant 0.00111607148 : f32
    %12 = vector.broadcast %cst_15 : f32 to vector<1x64xf32>
    %13 = arith.mulf %11, %12 : vector<1x64xf32>
    %14 = vector.extract_strided_slice %8 {offsets = [1, 0], sizes = [1, 64], strides = [1, 1]} : vector<8x64xf32> to vector<1x64xf32>
    %cst_16 = arith.constant 0.00111607148 : f32
    %15 = vector.broadcast %cst_16 : f32 to vector<1x64xf32>
    %16 = arith.mulf %14, %15 : vector<1x64xf32>
    %17 = arith.mulf %13, %13 : vector<1x64xf32>
    %18 = arith.subf %16, %17 : vector<1x64xf32>
    %cst_17 = arith.constant 0.000000e+00 : f32
    %19 = vector.broadcast %cst_17 : f32 to vector<1x64xf32>
    %20 = arith.maximumf %18, %19 : vector<1x64xf32>
    %cst_18 = arith.constant 9.99999974E-6 : f32
    %21 = vector.broadcast %cst_18 : f32 to vector<1x64xf32>
    %22 = arith.addf %20, %21 : vector<1x64xf32>
    %23 = math.rsqrt %22 : vector<1x64xf32>
    %24 = arith.mulf %9, %23 : vector<1x64xf32>
    %25 = arith.mulf %13, %24 : vector<1x64xf32>
    %26 = arith.subf %10, %25 : vector<1x64xf32>
    %27 = vector.broadcast %24 : vector<1x64xf32> to vector<64x64xf32>
    %28 = arith.mulf %7, %27 : vector<64x64xf32>
    %29 = vector.broadcast %26 : vector<1x64xf32> to vector<64x64xf32>
    %30 = arith.addf %28, %29 : vector<64x64xf32>
    %cst_19 = arith.constant 0.000000e+00 : f32
    %31 = vector.broadcast %cst_19 : f32 to vector<64x64xf32>
    %32 = arith.cmpf ogt, %30, %31 : vector<64x64xf32>
    %cst_20 = arith.constant 2.000000e-01 : f32
    %33 = vector.broadcast %cst_20 : f32 to vector<64x64xf32>
    %34 = arith.mulf %33, %30 : vector<64x64xf32>
    %35 = arith.select %32, %30, %34 : vector<64x64xi1>, vector<64x64xf32>
    %36 = arith.truncf %35 : vector<64x64xf32> to vector<64x64xbf16>
    %c0_21 = arith.constant 0 : index
    %c0_22 = arith.constant 0 : index
    %37 = vector.load %arg10[%c0_21, %c0_22] : memref<64x64xbf16, #tpu.memory_space<vmem>>, vector<64x64xbf16>
    %cst_23 = arith.constant dense<0.000000e+00> : vector<64x64xf32>
    %38 = tpu.matmul %36, %37, %cst_23 {dimension_numbers = #tpu.dot_dimension_numbers<[1], [0], [0], [1], [0, 0, 1, 1], [], []>} : vector<64x64xbf16>, vector<64x64xbf16>, vector<64x64xf32> -> vector<64x64xf32>
    %c0_24 = arith.constant 0 : index
    %c0_25 = arith.constant 0 : index
    %39 = vector.load %arg11[%c0_24, %c0_25] : memref<8x64xf32, #tpu.memory_space<vmem>>, vector<8x64xf32>
    %c0_26 = arith.constant 0 : index
    %c0_27 = arith.constant 0 : index
    %40 = vector.load %arg12[%c0_26, %c0_27] : memref<1x64xf32, #tpu.memory_space<vmem>>, vector<1x64xf32>
    %c0_28 = arith.constant 0 : index
    %c0_29 = arith.constant 0 : index
    %41 = vector.load %arg13[%c0_28, %c0_29] : memref<1x64xf32, #tpu.memory_space<vmem>>, vector<1x64xf32>
    %42 = vector.extract_strided_slice %39 {offsets = [0, 0], sizes = [1, 64], strides = [1, 1]} : vector<8x64xf32> to vector<1x64xf32>
    %cst_30 = arith.constant 0.00111607148 : f32
    %43 = vector.broadcast %cst_30 : f32 to vector<1x64xf32>
    %44 = arith.mulf %42, %43 : vector<1x64xf32>
    %45 = vector.extract_strided_slice %39 {offsets = [1, 0], sizes = [1, 64], strides = [1, 1]} : vector<8x64xf32> to vector<1x64xf32>
    %cst_31 = arith.constant 0.00111607148 : f32
    %46 = vector.broadcast %cst_31 : f32 to vector<1x64xf32>
    %47 = arith.mulf %45, %46 : vector<1x64xf32>
    %48 = arith.mulf %44, %44 : vector<1x64xf32>
    %49 = arith.subf %47, %48 : vector<1x64xf32>
    %cst_32 = arith.constant 0.000000e+00 : f32
    %50 = vector.broadcast %cst_32 : f32 to vector<1x64xf32>
    %51 = arith.maximumf %49, %50 : vector<1x64xf32>
    %cst_33 = arith.constant 9.99999974E-6 : f32
    %52 = vector.broadcast %cst_33 : f32 to vector<1x64xf32>
    %53 = arith.addf %51, %52 : vector<1x64xf32>
    %54 = math.rsqrt %53 : vector<1x64xf32>
    %55 = arith.mulf %40, %54 : vector<1x64xf32>
    %56 = arith.mulf %44, %55 : vector<1x64xf32>
    %57 = arith.subf %41, %56 : vector<1x64xf32>
    %58 = vector.broadcast %55 : vector<1x64xf32> to vector<64x64xf32>
    %59 = arith.mulf %38, %58 : vector<64x64xf32>
    %60 = vector.broadcast %57 : vector<1x64xf32> to vector<64x64xf32>
    %61 = arith.addf %59, %60 : vector<64x64xf32>
    %cst_34 = arith.constant 0.000000e+00 : f32
    %62 = vector.broadcast %cst_34 : f32 to vector<64x64xf32>
    %63 = arith.cmpf ogt, %61, %62 : vector<64x64xf32>
    %cst_35 = arith.constant 2.000000e-01 : f32
    %64 = vector.broadcast %cst_35 : f32 to vector<64x64xf32>
    %65 = arith.mulf %64, %61 : vector<64x64xf32>
    %66 = arith.select %63, %61, %65 : vector<64x64xi1>, vector<64x64xf32>
    %67 = arith.truncf %66 : vector<64x64xf32> to vector<64x64xbf16>
    %c0_36 = arith.constant 0 : index
    %c0_37 = arith.constant 0 : index
    %68 = vector.load %arg14[%c0_36, %c0_37] : memref<64x64xbf16, #tpu.memory_space<vmem>>, vector<64x64xbf16>
    %cst_38 = arith.constant dense<0.000000e+00> : vector<64x64xf32>
    %69 = tpu.matmul %67, %68, %cst_38 {dimension_numbers = #tpu.dot_dimension_numbers<[1], [0], [0], [1], [0, 0, 1, 1], [], []>} : vector<64x64xbf16>, vector<64x64xbf16>, vector<64x64xf32> -> vector<64x64xf32>
    %c0_39 = arith.constant 0 : index
    %c0_40 = arith.constant 0 : index
    %70 = vector.load %arg16[%c0_39, %c0_40] : memref<64x64xbf16, #tpu.memory_space<vmem>>, vector<64x64xbf16>
    %c0_41 = arith.constant 0 : index
    %c0_42 = arith.constant 0 : index
    %71 = vector.load %arg15[%c0_41, %c0_42] : memref<64x64xbf16, #tpu.memory_space<vmem>>, vector<64x64xbf16>
    %cst_43 = arith.constant dense<0.000000e+00> : vector<64x64xf32>
    %72 = tpu.matmul %70, %71, %cst_43 {dimension_numbers = #tpu.dot_dimension_numbers<[1], [0], [0], [1], [0, 0, 1, 1], [], []>} : vector<64x64xbf16>, vector<64x64xbf16>, vector<64x64xf32> -> vector<64x64xf32>
    %73 = arith.addf %69, %72 : vector<64x64xf32>
    %c1_i32 = arith.constant 1 : i32
    %74 = arith.muli %arg0, %c1_i32 : i32
    %75 = arith.addi %74, %arg1 : i32
    %76 = tpu.iota {dimensions = array<i32: 0>} : vector<64x1xi32>
    %c64_i32 = arith.constant 64 : i32
    %77 = arith.muli %75, %c64_i32 : i32
    %78 = vector.broadcast %77 : i32 to vector<64x1xi32>
    %79 = arith.addi %78, %76 : vector<64x1xi32>
    %c112_i32 = arith.constant 112 : i32
    %80 = vector.broadcast %c112_i32 : i32 to vector<64x1xi32>
    %81 = arith.cmpi slt, %79, %80 : vector<64x1xi32>
    %cst_44 = arith.constant 0.000000e+00 : f32
    %82 = vector.shape_cast %81 : vector<64x1xi1> to vector<64x1xi1>
    %83 = vector.broadcast %82 : vector<64x1xi1> to vector<64x64xi1>
    %84 = vector.broadcast %cst_44 : f32 to vector<64x64xf32>
    %85 = arith.select %83, %73, %84 : vector<64x64xi1>, vector<64x64xf32>
    %c0_i32 = arith.constant 0 : i32
    %86 = arith.cmpi eq, %arg1, %c0_i32 : i32
    %c0_i32_45 = arith.constant 0 : i32
    %87 = arith.cmpi eq, %arg2, %c0_i32_45 : i32
    %88 = arith.andi %86, %87 : i1
    %89 = arith.extui %88 : i1 to i32
    %c0_i32_46 = arith.constant 0 : i32
    %90 = arith.cmpi ne, %89, %c0_i32_46 : i32
    scf.if %90 {
      %cst_60 = arith.constant 0.000000e+00 : f32
      %108 = vector.broadcast %cst_60 : f32 to vector<8x64xf32>
      %c0_61 = arith.constant 0 : index
      %c0_62 = arith.constant 0 : index
      %109 = vector.load %arg17[%c0_61, %c0_62] : memref<8x64xf32, #tpu.memory_space<vmem>>, vector<8x64xf32>
      tpu.vector_store %arg17[%c0_61, %c0_62], %108 {strides = array<i32>} : memref<8x64xf32, #tpu.memory_space<vmem>>, vector<8x64xf32>,
    } else {
    }
    %c0_47 = arith.constant 0 : index
    %c0_48 = arith.constant 0 : index
    %91 = vector.load %arg17[%c0_47, %c0_48] : memref<8x64xf32, #tpu.memory_space<vmem>>, vector<1x64xf32>
    %cst_49 = arith.constant dense<0.000000e+00> : vector<64xf32>
    %92 = vector.multi_reduction <add>, %85, %cst_49 [0] : vector<64x64xf32> to vector<64xf32>
    %93 = vector.shape_cast %92 : vector<64xf32> to vector<1x64xf32>
    %94 = arith.addf %91, %93 : vector<1x64xf32>
    %c0_50 = arith.constant 0 : index
    %c0_51 = arith.constant 0 : index
    %95 = vector.load %arg17[%c0_50, %c0_51] : memref<8x64xf32, #tpu.memory_space<vmem>>, vector<1x64xf32>
    tpu.vector_store %arg17[%c0_50, %c0_51], %94 {strides = array<i32>} : memref<8x64xf32, #tpu.memory_space<vmem>>, vector<1x64xf32>,
    %c1 = arith.constant 1 : index
    %c0_52 = arith.constant 0 : index
    %96 = vector.load %arg17[%c1, %c0_52] : memref<8x64xf32, #tpu.memory_space<vmem>>, vector<1x64xf32>
    %97 = arith.mulf %85, %85 : vector<64x64xf32>
    %cst_53 = arith.constant dense<0.000000e+00> : vector<64xf32>
    %98 = vector.multi_reduction <add>, %97, %cst_53 [0] : vector<64x64xf32> to vector<64xf32>
    %99 = vector.shape_cast %98 : vector<64xf32> to vector<1x64xf32>
    %100 = arith.addf %96, %99 : vector<1x64xf32>
    %c1_54 = arith.constant 1 : index
    %c0_55 = arith.constant 0 : index
    %101 = vector.load %arg17[%c1_54, %c0_55] : memref<8x64xf32, #tpu.memory_space<vmem>>, vector<1x64xf32>
    tpu.vector_store %arg17[%c1_54, %c0_55], %100 {strides = array<i32>} : memref<8x64xf32, #tpu.memory_space<vmem>>, vector<1x64xf32>,
    %c0_i32_56 = arith.constant 0 : i32
    %102 = arith.cmpi eq, %arg2, %c0_i32_56 : i32
    %103 = arith.extui %102 : i1 to i32
    %c0_i32_57 = arith.constant 0 : i32
    %104 = arith.cmpi ne, %103, %c0_i32_57 : i32
    scf.if %104 {
      %c0_60 = arith.constant 0 : index
      %c0_61 = arith.constant 0 : index
      %108 = vector.load %arg18[%c0_60, %c0_61] : memref<64x64xf32, #tpu.memory_space<vmem>>, vector<64x64xf32>
      tpu.vector_store %arg18[%c0_60, %c0_61], %73 {strides = array<i32>} : memref<64x64xf32, #tpu.memory_space<vmem>>, vector<64x64xf32>,
      %c0_62 = arith.constant 0 : index
      %c0_63 = arith.constant 0 : index
      %109 = vector.load %arg19[%c0_62, %c0_63] : memref<64x64xf32, #tpu.memory_space<vmem>>, vector<64x64xf32>
      tpu.vector_store %arg19[%c0_62, %c0_63], %73 {strides = array<i32>} : memref<64x64xf32, #tpu.memory_space<vmem>>, vector<64x64xf32>,
    } else {
    }
    %c0_i32_58 = arith.constant 0 : i32
    %105 = arith.cmpi sgt, %arg2, %c0_i32_58 : i32
    %106 = arith.extui %105 : i1 to i32
    %c0_i32_59 = arith.constant 0 : i32
    %107 = arith.cmpi ne, %106, %c0_i32_59 : i32
    scf.if %107 {
      %c0_60 = arith.constant 0 : index
      %c0_61 = arith.constant 0 : index
      %108 = vector.load %arg18[%c0_60, %c0_61] : memref<64x64xf32, #tpu.memory_space<vmem>>, vector<64x64xf32>
      %109 = arith.maximumf %108, %73 : vector<64x64xf32>
      %c0_62 = arith.constant 0 : index
      %c0_63 = arith.constant 0 : index
      %110 = vector.load %arg18[%c0_62, %c0_63] : memref<64x64xf32, #tpu.memory_space<vmem>>, vector<64x64xf32>
      tpu.vector_store %arg18[%c0_62, %c0_63], %109 {strides = array<i32>} : memref<64x64xf32, #tpu.memory_space<vmem>>, vector<64x64xf32>,
      %c0_64 = arith.constant 0 : index
      %c0_65 = arith.constant 0 : index
      %111 = vector.load %arg19[%c0_64, %c0_65] : memref<64x64xf32, #tpu.memory_space<vmem>>, vector<64x64xf32>
      %112 = arith.minimumf %111, %73 : vector<64x64xf32>
      %c0_66 = arith.constant 0 : index
      %c0_67 = arith.constant 0 : index
      %113 = vector.load %arg19[%c0_66, %c0_67] : memref<64x64xf32, #tpu.memory_space<vmem>>, vector<64x64xf32>
      tpu.vector_store %arg19[%c0_66, %c0_67], %112 {strides = array<i32>} : memref<64x64xf32, #tpu.memory_space<vmem>>, vector<64x64xf32>,
    } else {
    }
    return
  }
  func.func @transform_0(%arg0: i32, %arg1: i32, %arg2: i32) -> (i32, i32, i32) {
    %c1_i32 = arith.constant 1 : i32
    %0 = arith.muli %arg0, %c1_i32 : i32
    %1 = arith.addi %0, %arg1 : i32
    %c0_i32 = arith.constant 0 : i32
    %c0_i32_0 = arith.constant 0 : i32
    return %arg2, %1, %c0_i32 : i32, i32, i32
  }
  func.func @transform_1(%arg0: i32, %arg1: i32, %arg2: i32) -> (i32, i32) {
    %c1_i32 = arith.constant 1 : i32
    %0 = arith.muli %arg0, %c1_i32 : i32
    %1 = arith.addi %0, %arg1 : i32
    %c0_i32 = arith.constant 0 : i32
    %c0_i32_0 = arith.constant 0 : i32
    return %1, %c0_i32 : i32, i32
  }
  func.func @transform_2(%arg0: i32, %arg1: i32, %arg2: i32) -> (i32, i32) {
    %c0_i32 = arith.constant 0 : i32
    %c0_i32_0 = arith.constant 0 : i32
    %c0_i32_1 = arith.constant 0 : i32
    return %c0_i32, %c0_i32_0 : i32, i32
  }
  func.func @transform_3(%arg0: i32, %arg1: i32, %arg2: i32) -> (i32, i32) {
    %c0_i32 = arith.constant 0 : i32
    %c0_i32_0 = arith.constant 0 : i32
    %c0_i32_1 = arith.constant 0 : i32
    return %c0_i32, %c0_i32_0 : i32, i32
  }
  func.func @transform_4(%arg0: i32, %arg1: i32, %arg2: i32) -> (i32, i32) {
    %c0_i32 = arith.constant 0 : i32
    %c0_i32_0 = arith.constant 0 : i32
    %c0_i32_1 = arith.constant 0 : i32
    return %c0_i32, %c0_i32_0 : i32, i32
  }
  func.func @transform_5(%arg0: i32, %arg1: i32, %arg2: i32) -> (i32, i32) {
    %c0_i32 = arith.constant 0 : i32
    %c0_i32_0 = arith.constant 0 : i32
    %c0_i32_1 = arith.constant 0 : i32
    return %c0_i32, %c0_i32_0 : i32, i32
  }
  func.func @transform_6(%arg0: i32, %arg1: i32, %arg2: i32) -> (i32, i32) {
    %c0_i32 = arith.constant 0 : i32
    %c0_i32_0 = arith.constant 0 : i32
    %c0_i32_1 = arith.constant 0 : i32
    return %c0_i32, %c0_i32_0 : i32, i32
  }
  func.func @transform_7(%arg0: i32, %arg1: i32, %arg2: i32) -> (i32, i32) {
    %c0_i32 = arith.constant 0 : i32
    %c0_i32_0 = arith.constant 0 : i32
    %c0_i32_1 = arith.constant 0 : i32
    return %c0_i32, %c0_i32_0 : i32, i32
  }
  func.func @transform_8(%arg0: i32, %arg1: i32, %arg2: i32) -> (i32, i32) {
    %c0_i32 = arith.constant 0 : i32
    %c0_i32_0 = arith.constant 0 : i32
    %c0_i32_1 = arith.constant 0 : i32
    return %c0_i32, %c0_i32_0 : i32, i32
  }
  func.func @transform_9(%arg0: i32, %arg1: i32, %arg2: i32) -> (i32, i32) {
    %c0_i32 = arith.constant 0 : i32
    %c0_i32_0 = arith.constant 0 : i32
    %c0_i32_1 = arith.constant 0 : i32
    return %c0_i32, %c0_i32_0 : i32, i32
  }
  func.func @transform_10(%arg0: i32, %arg1: i32, %arg2: i32) -> (i32, i32) {
    %c0_i32 = arith.constant 0 : i32
    %c0_i32_0 = arith.constant 0 : i32
    %c0_i32_1 = arith.constant 0 : i32
    return %c0_i32, %c0_i32_0 : i32, i32
  }
  func.func @transform_11(%arg0: i32, %arg1: i32, %arg2: i32) -> (i32, i32) {
    %c0_i32 = arith.constant 0 : i32
    %c0_i32_0 = arith.constant 0 : i32
    %c0_i32_1 = arith.constant 0 : i32
    return %c0_i32, %c0_i32_0 : i32, i32
  }
  func.func @transform_12(%arg0: i32, %arg1: i32, %arg2: i32) -> (i32, i32) {
    %c0_i32 = arith.constant 0 : i32
    %c0_i32_0 = arith.constant 0 : i32
    %c0_i32_1 = arith.constant 0 : i32
    return %c0_i32, %c0_i32_0 : i32, i32
  }
  func.func @transform_13(%arg0: i32, %arg1: i32, %arg2: i32) -> (i32, i32) {
    %c1_i32 = arith.constant 1 : i32
    %0 = arith.muli %arg0, %c1_i32 : i32
    %1 = arith.addi %0, %arg1 : i32
    %c0_i32 = arith.constant 0 : i32
    %c0_i32_0 = arith.constant 0 : i32
    return %1, %c0_i32 : i32, i32
  }
  func.func @transform_14(%arg0: i32, %arg1: i32, %arg2: i32) -> (i32, i32) {
    %c0_i32 = arith.constant 0 : i32
    %c0_i32_0 = arith.constant 0 : i32
    return %arg0, %c0_i32 : i32, i32
  }
  func.func @transform_15(%arg0: i32, %arg1: i32, %arg2: i32) -> (i32, i32) {
    %c1_i32 = arith.constant 1 : i32
    %0 = arith.muli %arg0, %c1_i32 : i32
    %1 = arith.addi %0, %arg1 : i32
    %c0_i32 = arith.constant 0 : i32
    %c0_i32_0 = arith.constant 0 : i32
    return %1, %c0_i32 : i32, i32
  }
  func.func @transform_16(%arg0: i32, %arg1: i32, %arg2: i32) -> (i32, i32) {
    %c1_i32 = arith.constant 1 : i32
    %0 = arith.muli %arg0, %c1_i32 : i32
    %1 = arith.addi %0, %arg1 : i32
    %c0_i32 = arith.constant 0 : i32
    %c0_i32_0 = arith.constant 0 : i32
    return %1, %c0_i32 : i32, i32
  }
}

</mosaic_0001>

<bundles_post_ra>
// kernel: neg.6
= control target key start
LH: loop header
LB: loop body
LE: loop exit
PB: predicated region body
PF: predicated region fallthrough
CT: control target
= control target key end

     0   :  { %s24_s0 = inlined_call_operand.vmem [shape: f32[2,56], index: 0, kind: input, shape index: {}]   ;;  %s25_s1 = inlined_call_operand.vmem [shape: f32[2,56], index: 1, kind: output, shape index: {}]  }
   0x1   :  { %v2_v0 = vld [vmem:[%s24_s0] sm:$0x3] }
   0x2   :  { %v5_v1 = vxor.u32 2147483648, %v2_v0 }
   0x4   :  { %7 = vst [vmem:[%s25_s1] sm:$0x3] %v5_v1 }

// kernel: _mgm_forward_impl.9
= control target key start
LH: loop header
LB: loop body
LE: loop exit
PB: predicated region body
PF: predicated region fallthrough
CT: control target
= control target key end

     0   :  { %s535_s18 = smov 0   ;;  %s609_s0 = inlined_call_operand.vmem [shape: f32[8,64], index: 0, kind: input, shape index: {}]   ;;  %s610_s1 = inlined_call_operand.vmem [shape: f32[1,64], index: 1, kind: input, shape index: {}]   ;;  %s611_s2 = inlined_call_operand.vmem [shape: f32[1,64], index: 2, kind: input, shape index: {}]   ;;  %s612_s3 = inlined_call_operand.vmem [shape: f32[128,64], index: 3, kind: input, shape index: {}]   ;;  %s613_s4 = inlined_call_operand.vmem [shape: f32[128,64], index: 4, kind: input, shape index: {}]   ;;  %s614_s5 = inlined_call_operand.vmem [shape: bf16[128,64], index: 5, kind: output, shape index: {}]  }
   0x1 LB: > { %s456_s19 = sadd.s32 4294967295, %s502_s18   ;;  %p460_p0 = scmp.ge.s32.totalorder %s502_s18, 1  ;;  %s502_s18 = sphi %s535_s18, %s15_s18  }
   0x2   : > { %p199_p1 = scmp.lt.s32.totalorder %s502_s18, 3 }
   0x4   : > { %p200_p2 = pnand %p460_p0, %p199_p1 }
   0x5   : > { %v250_v0 = vld [vmem:[%s609_s0] sm:$0x1] (!%p200_p2)  ;;  %v252_v1 = vld [vmem:[%s609_s0 + $0x1] sm:$0x1] (!%p200_p2)  ;;  %s461_s24 = sshll.u32 (!%p200_p2), %s456_s19, 3  ;;  %v282_v8 = vlaneseq (!%p200_p2)  ;;  %v504_v20 = vmov (!%p200_p2), 0  }
   0x6   : > { %203 = sbr.rel (%p200_p2) target bundleno = 53 (0x35), region = 40  ;;  %v251_v2 = vmul.f32 (!%p200_p2), 0.00055803574, %v250_v0  ;;  %v253_v3 = vmul.f32 (!%p200_p2), 0.00055803574, %v252_v1  ;;  %p233_p3 = scmp.lt.s32.totalorder (!%p200_p2), %s461_s24, 15 }
   0x7   : > { %v283_v9 = vshrl.u32 (!%p200_p2), %v282_v8, 7  ;;  %v257_v10 = vld [vmem:[%s610_s1] sm:$0x1] (!%p200_p2)  ;;  %vm379_vm2 = vcmask (!%p200_p2), 519168  }
   0x8   : > { %v254_v4 = vmul.f32 (!%p200_p2), %v251_v2, %v251_v2  ;;  %v261_v14 = vld [vmem:[%s611_s2] sm:$0x1] (!%p200_p2) }
   0x9   : > { %v284_v13 = vsub.s32 (!%p200_p2), 0, %v283_v9 }
   0xa   : > { %v255_v5 = vsub.f32 (!%p200_p2), %v253_v3, %v254_v4 }
   0xc   : > { %v256_v6 = vmax.f32 (!%p200_p2), %v255_v5, 0.0 }
   0xd   : > { %s618_s24 = smov (!%p233_p3, %s461_s24), 15 }
   0xe   : > { %v258_v7 = vadd.f32 1e-05, %v256_v6  ;;  %s462_s25 = sshll.u32 %s618_s24, 3  ;;  %s466_s11 = sshll.u32 %s618_s24, 2 }
   0xf   : > { %s236_s30 = scalar_lea.vmem %s612_s3, %s462_s25  ;;  %s242_s8 = scalar_lea.vmem %s613_s4, %s462_s25 }
  0x10   : > { %494 = vrsqrt.f32 %v258_v7  ;;  %v265_v16 = vld [vmem:[%s236_s30] sm:$0xff]  ;;  %v266_v18 = vld [vmem:[%s236_s30 + $0x8] sm:$0xff]  ;;  %v267_v22 = vld [vmem:[%s236_s30 + $0x10] sm:$0xff]  ;;  %s588_s14 = scalar_lea.vmem %s614_s5, %s466_s11 }
  0x11   : > { %v273_v17 = vld [vmem:[%s242_s8] sm:$0xff]  ;;  %v274_v19 = vld [vmem:[%s242_s8 + $0x8] sm:$0xff]  ;;  %v275_v23 = vld [vmem:[%s242_s8 + $0x10] sm:$0xff] }
  0x12   : > { %v268_v24 = vld [vmem:[%s236_s30 + $0x18] sm:$0xff]  ;;  %v269_v29 = vld [vmem:[%s236_s30 + $0x20] sm:$0xff]  ;;  %v270_v31 = vld [vmem:[%s236_s30 + $0x28] sm:$0xff] }
  0x13   : > { %v276_v28 = vld [vmem:[%s242_s8 + $0x18] sm:$0xff]  ;;  %v277_v30 = vld [vmem:[%s242_s8 + $0x20] sm:$0xff]  ;;  %v278_v32 = vld [vmem:[%s242_s8 + $0x28] sm:$0xff] }
  0x14   : > { %v271_v33 = vld [vmem:[%s236_s30 + $0x30] sm:$0xff]  ;;  %v272_v37 = vld [vmem:[%s236_s30 + $0x38] sm:$0xff] }
  0x15   : > { %v279_v36 = vld [vmem:[%s242_s8 + $0x30] sm:$0xff]  ;;  %v280_v38 = vld [vmem:[%s242_s8 + $0x38] sm:$0xff] }
  0x1a   : > { %v495_v11 = vpop.eup %494 }
  0x1b   : > { %v260_v12 = vmul.f32 %v495_v11, %v257_v10 }
  0x1d   : > { %v262_v15 = vmul.f32 %v260_v12, %v251_v2  ;;  %vm264_vm0 = vcmp.gt.f32.partialorder %v260_v12, 0.0  ;;  %v299_v27 = vrot.slane %v260_v12, %v284_v13 }
  0x1e   : > { %v281_v21 = vsel %vm264_vm0, 1, %v504_v20 }
  0x1f   : > { %v263_v25 = vsub.f32 %v261_v14, %v262_v15  ;;  %v285_v26 = vrot.slane %v281_v21, %v284_v13 }
  0x21   : > { %vm564_vm1 = vcmp.eq.s32.totalorder %v285_v26, 1  ;;  %v313_v35 = vrot.slane %v263_v25, %v284_v13 }
  0x22   : > { %v287_v39 = vsel %vm564_vm1, %v265_v16, %v273_v17  ;;  %v288_v40 = vsel %vm564_vm1, %v266_v18, %v274_v19  ;;  %v289_v41 = vsel %vm564_vm1, %v267_v22, %v275_v23  ;;  %v290_v42 = vsel %vm564_vm1, %v268_v24, %v276_v28 }
  0x23   : > { %v301_v43 = vmul.f32 %v299_v27, %v287_v39  ;;  %v302_v44 = vmul.f32 %v299_v27, %v288_v40  ;;  %v303_v45 = vmul.f32 %v299_v27, %v289_v41  ;;  %v304_v46 = vmul.f32 %v299_v27, %v290_v42 }
  0x24   : > { %v291_v47 = vsel %vm564_vm1, %v269_v29, %v277_v30  ;;  %v292_v48 = vsel %vm564_vm1, %v270_v31, %v278_v32  ;;  %v293_v49 = vsel %vm564_vm1, %v271_v33, %v279_v36  ;;  %v294_v50 = vsel %vm564_vm1, %v272_v37, %v280_v38 }
  0x25   : > { %v315_v51 = vadd.f32 %v313_v35, %v301_v43  ;;  %v316_v52 = vadd.f32 %v313_v35, %v302_v44  ;;  %v317_v53 = vadd.f32 %v313_v35, %v303_v45  ;;  %v318_v54 = vadd.f32 %v313_v35, %v304_v46 }
  0x26   : > { %v305_v55 = vmul.f32 %v299_v27, %v291_v47  ;;  %v306_v56 = vmul.f32 %v299_v27, %v292_v48  ;;  %v307_v57 = vmul.f32 %v299_v27, %v293_v49  ;;  %v308_v58 = vmul.f32 %v299_v27, %v294_v50 }
  0x27   : > { %vm323_vm3 = vcmp.gt.f32.partialorder %v315_v51, 0.0  ;;  %v331_v59 = vmul.f32 0.2, %v315_v51  ;;  %vm324_vm4 = vcmp.gt.f32.partialorder %v316_v52, 0.0  ;;  %v332_v60 = vmul.f32 0.2, %v316_v52 }
  0x28   : > { %vm325_vm5 = vcmp.gt.f32.partialorder %v317_v53, 0.0  ;;  %v333_v61 = vmul.f32 0.2, %v317_v53  ;;  %vm326_vm6 = vcmp.gt.f32.partialorder %v318_v54, 0.0  ;;  %v334_v62 = vmul.f32 0.2, %v318_v54 }
  0x29   : > { %v339_v63 = vsel %vm323_vm3, %v315_v51, %v331_v59  ;;  %v340_v0 = vsel %vm324_vm4, %v316_v52, %v332_v60  ;;  %v319_v1 = vadd.f32 %v313_v35, %v305_v55  ;;  %v320_v2 = vadd.f32 %v313_v35, %v306_v56 }
  0x2a   : > { %v477_v3 = vpack.c.bf16 %v339_v63, %v339_v63  ;;  %v478_v4 = vpack.c.bf16 %v340_v0, %v340_v0  ;;  %v341_v5 = vsel %vm325_vm5, %v317_v53, %v333_v61  ;;  %v342_v6 = vsel %vm326_vm6, %v318_v54, %v334_v62 }
  0x2b   : > { %v479_v7 = vpack.c.bf16 %v341_v5, %v341_v5  ;;  %v480_v8 = vpack.c.bf16 %v342_v6, %v342_v6  ;;  %vm327_vm7 = vcmp.gt.f32.partialorder %v319_v1, 0.0  ;;  %v335_v9 = vmul.f32 0.2, %v319_v1 }
  0x2c   : > { %380 = vst.msk [vmem:[%s588_s14] sm:$0xf] %vm379_vm2, %v477_v3  ;;  %381 = vst.msk [vmem:[%s588_s14 + $0x4] sm:$0xf] %vm379_vm2, %v478_v4  ;;  %vm328_vm8 = vcmp.gt.f32.partialorder %v320_v2, 0.0  ;;  %v321_v11 = vadd.f32 %v313_v35, %v307_v57  ;;  %v322_v12 = vadd.f32 %v313_v35, %v308_v58 }
  0x2d   : > { %v336_v10 = vmul.f32 0.2, %v320_v2  ;;  %382 = vst.msk [vmem:[%s588_s14 + $0x8] sm:$0xf] %vm379_vm2, %v479_v7  ;;  %383 = vst.msk [vmem:[%s588_s14 + $0xc] sm:$0xf] %vm379_vm2, %v480_v8  ;;  %v343_v13 = vsel %vm327_vm7, %v319_v1, %v335_v9 }
  0x2e   : > { %v481_v14 = vpack.c.bf16 %v343_v13, %v343_v13  ;;  %vm329_vm9 = vcmp.gt.f32.partialorder %v321_v11, 0.0  ;;  %v337_v16 = vmul.f32 0.2, %v321_v11  ;;  %vm330_vm10 = vcmp.gt.f32.partialorder %v322_v12, 0.0 }
  0x2f   : > { %v344_v15 = vsel %vm328_vm8, %v320_v2, %v336_v10  ;;  %v338_v18 = vmul.f32 0.2, %v322_v12 }
  0x30   : > { %v482_v17 = vpack.c.bf16 %v344_v15, %v344_v15  ;;  %384 = vst.msk [vmem:[%s588_s14 + $0x10] sm:$0xf] %vm379_vm2, %v481_v14  ;;  %v345_v19 = vsel %vm329_vm9, %v321_v11, %v337_v16 }
  0x31   : > { %v483_v20 = vpack.c.bf16 %v345_v19, %v345_v19  ;;  %v346_v21 = vsel %vm330_vm10, %v322_v12, %v338_v18 }
  0x32   : > { %385 = vst.msk [vmem:[%s588_s14 + $0x14] sm:$0xf] %vm379_vm2, %v482_v17  ;;  %v484_v22 = vpack.c.bf16 %v346_v21, %v346_v21 }
  0x33   : > { %386 = vst.msk [vmem:[%s588_s14 + $0x18] sm:$0xf] %vm379_vm2, %v483_v20 }
  0x34   : > { %387 = vst.msk [vmem:[%s588_s14 + $0x1c] sm:$0xf] %vm379_vm2, %v484_v22 }
  0x35 PF: > { %s15_s18 = sadd.s32 1, %s502_s18  }
  0x36   : > { %p12_p4 = scmp.ge.s32.totalorder %s15_s18, 4  }
  0x38   :  { %14 = sbr.rel (!%p12_p4) target bundleno = 1 (0x1), region = 73 }

// kernel: _mgm_forward_impl.7
= control target key start
LH: loop header
LB: loop body
LE: loop exit
PB: predicated region body
PF: predicated region fallthrough
CT: control target
= control target key end

     0   :  { %s910_s15 = smov 0   ;;  %s912_s16 = smov 0   ;;  %s1032_s0 = inlined_call_operand.vmem [shape: bf16[16,128,64], index: 0, kind: input, shape index: {}]   ;;  %s1033_s1 = inlined_call_operand.vmem [shape: bf16[128,64], index: 1, kind: input, shape index: {}]   ;;  %s1034_s2 = inlined_call_operand.vmem [shape: bf16[64,64], index: 2, kind: input, shape index: {}]   ;;  %s1035_s3 = inlined_call_operand.vmem [shape: bf16[64,64], index: 3, kind: input, shape index: {}]   ;;  %s1036_s4 = inlined_call_operand.vmem [shape: f32[16,64], index: 4, kind: output, shape index: {}]  }
   0x1   :  { %s914_s17 = smov 0   ;;  %s916_s18 = smov 0  }
   0x2   :  { %s918_s19 = smov 0  }
   0x3 LB: > { %s26_s20 = sadd.s32 1, %s874_s17  ;;  %s33_s21 = sadd.s32 1, %s878_s18  ;;  %s882_s19 = sphi %s918_s19, %s14_s19   ;;  %s878_s18 = sphi %s916_s18, %s1040_s18   ;;  %s874_s17 = sphi %s914_s17, %s1039_s17   ;;  %s870_s16 = sphi %s912_s16, %s1038_s16   ;;  %s866_s15 = sphi %s910_s15, %s1037_s15  }
   0x4   : > { %p27_p0 = scmp.ge.s32.totalorder %s26_s20, 16  ;;  %p696_p1 = scmp.ge.s32.totalorder %s882_s19, 1 }
   0x5   : > { %p207_p2 = scmp.lt.s32.totalorder %s882_s19, 33 }
   0x6   : > { %s1042_s20 = smov (%p27_p0, %s26_s20), 0  ;;  %s1044_s21 = smov (!%p27_p0, %s33_s21), %s878_s18 }
   0x7   : > { %p208_p3 = pnand %p696_p1, %p207_p2  ;;  %p35_p4 = scmp.ge.s32.totalorder %s1044_s21, 2 }
   0x8   : > { %p263_p5 = scmp.lt.s32.totalorder (!%p208_p3), %s870_s16, 1  ;;  %v828_v0 = vld [vmem:[%s1035_s3] sm:$0xff] (!%p208_p3)   ;;  %s697_s26 = sshll.u32 (!%p208_p3), %s870_s16, 3  ;;  %v830_v2 = vld [vmem:[%s1035_s3 + $0x8] sm:$0xff] (!%p208_p3)   ;;  %v832_v4 = vld [vmem:[%s1035_s3 + $0x10] sm:$0xff] (!%p208_p3)   ;;  %vm344_vm0 = vcmask (!%p208_p3), 523264  }
   0x9   : > { %s1046_s21 = smov (%p35_p4, %s1044_s21), 0  ;;  %211 = sbr.rel (%p208_p3) target bundleno = 284 (0x11c), region = 36 }
   0xa   : > { %v829_v1 = vld [vmem:[%s1034_s2] sm:$0xff] (!%p208_p3)   ;;  %747 = vmatprep.subr.bf16.mxu1 (!%p208_p3), %v828_v0  ;;  %v831_v3 = vld [vmem:[%s1034_s2 + $0x8] sm:$0xff] (!%p208_p3)   ;;  %p247_p6 = scmp.lt.s32.totalorder (!%p208_p3), %s697_s26, 15  ;;  %v833_v5 = vld [vmem:[%s1034_s2 + $0x10] sm:$0xff] (!%p208_p3)   ;;  %p245_p7 = scmp.lt.s32.totalorder (!%p208_p3), %s866_s15, 15 }
   0xb   : > { %763 = vmatprep.subr.bf16.mxu0 (!%p208_p3), %v829_v1  ;;  %748 = vmatpush3.bf16.msra.mxu1 (!%p208_p3), %v828_v0  ;;  %v834_v6 = vld [vmem:[%s1035_s3 + $0x18] sm:$0xff] (!%p208_p3)   ;;  %p544_p8 = scmp.eq.s32.totalorder (!%p208_p3), %s866_s15, 0 }
   0xc   : > { %764 = vmatpush3.bf16.msra.mxu0 (!%p208_p3), %v829_v1  ;;  %749 = vmatprep.subr.bf16.mxu1 (!%p208_p3), %v830_v2  ;;  %v835_v7 = vld [vmem:[%s1034_s2 + $0x18] sm:$0xff] (!%p208_p3)  }
   0xd   : > { %765 = vmatprep.subr.bf16.mxu0 (!%p208_p3), %v831_v3 }
   0xf   : > { %750 = vmatpush3.bf16.msra.mxu1 (!%p208_p3), %v830_v2 }
  0x10   : > { %s1048_s16 = smov (!%p263_p5, %s870_s16), 1  ;;  %s1050_s26 = smov (!%p247_p6, %s697_s26), 15  ;;  %766 = vmatpush3.bf16.msra.mxu0 %v831_v3  ;;  %751 = vmatprep.subr.bf16.mxu1 %v832_v4 }
  0x11   : > { %s702_s5 = sshll.u32 %s1048_s16, 3  ;;  %s701_s16 = sshll.u32 %s1050_s26, 2  ;;  %767 = vmatprep.subr.bf16.mxu0 %v833_v5  ;;  %v884_v40 = vmov (%p544_p8), 0.0  }
  0x12   : > { %s965_s10 = scalar_lea.vmem %s1036_s4, %s702_s5  ;;  %s260_s27 = scalar_lea.vmem %s1033_s1, %s701_s16 }
  0x13   : > { %v836_v8 = vld [vmem:[%s260_s27] sm:$0xff]   ;;  %s246_s28 = scalar_select %p245_p7, %s866_s15, 15  ;;  %752 = vmatpush3.bf16.msra.mxu1 %v832_v4  ;;  %v838_v9 = vld [vmem:[%s260_s27 + $0x8] sm:$0xff]   ;;  %v840_v10 = vld [vmem:[%s260_s27 + $0x10] sm:$0xff]  }
  0x14   : > { %768 = vmatpush3.bf16.msra.mxu0 %v833_v5  ;;  %753 = vmatprep.subr.bf16.mxu1 %v834_v6  ;;  %v842_v14 = vld [vmem:[%s260_s27 + $0x18] sm:$0xff]   ;;  %549 = vst.msk [vmem:[%s965_s10] sm:$0xff] (%p544_p8), %vm344_vm0, %v884_v40 }
  0x15   : > { %s698_s29 = sshll.u32 %s246_s28, 4  ;;  %769 = vmatprep.subr.bf16.mxu0 %v835_v7  ;;  %755 = vmatprep.mubr.msk.bf16.mxu1 %vm344_vm0, %v836_v8 }
  0x16   : > { %s250_s30 = sadd.s32 %s698_s29, %s1050_s26 }
  0x17   : > { %s699_s5 = sshll.u32 %s250_s30, 2  ;;  %754 = vmatpush3.bf16.msra.mxu1 %v834_v6 }
  0x18   : > { %s252_s8 = scalar_lea.vmem %s1032_s0, %s699_s5  ;;  %770 = vmatpush3.bf16.msra.mxu0 %v835_v7 }
  0x19   : > { %v837_v11 = vld [vmem:[%s252_s8] sm:$0xff]   ;;  %v839_v12 = vld [vmem:[%s252_s8 + $0x8] sm:$0xff]   ;;  %v841_v13 = vld [vmem:[%s252_s8 + $0x10] sm:$0xff]  }
  0x1a   : > { %771 = vmatprep.mubr.msk.bf16.mxu0 %vm344_vm0, %v837_v11  ;;  %756 = vmatmul.mubr.msk.bf16.vlgmr.msra.gmra.mrb[0].mxu1 %vm344_vm0, %v838_v9  ;;  %v843_v15 = vld [vmem:[%s252_s8 + $0x18] sm:$0xff]  }
  0x1b   : > { %772 = vmatmul.mubr.msk.bf16.vlgmr.msra.gmra.mrb[0].mxu0 %vm344_vm0, %v839_v12  ;;  %759 = vmatprep.mubr.msk.bf16.mxu1 %vm344_vm0, %v840_v10 }
  0x1c   : > { %775 = vmatprep.mubr.msk.bf16.mxu0 %vm344_vm0, %v841_v13 }
  0x22   : > { %760 = vmatmul.mubr.msk.bf16.gmra.mrb[4].mxu1 %vm344_vm0, %v842_v14 }
  0x23   : > { %776 = vmatmul.mubr.msk.bf16.gmra.mrb[4].mxu0 %vm344_vm0, %v843_v15 }
  0xed   : > { %v757_v16 = vpop.f32.mrb[0].mxu1 }
  0xee   : > { %v773_v17 = vpop.f32.mrb[0].mxu0  ;;  %v391_v18 = vpop.f32.mrb[1].mxu1 }
  0xef   : > { %v521_v19 = vadd.f32 %v773_v17, %v757_v16  ;;  %v512_v20 = vpop.f32.mrb[1].mxu0  ;;  %v758_v21 = vpop.f32.mrb[2].mxu1 }
  0xf0   : > { %v513_v22 = vadd.f32 %v512_v20, %v391_v18  ;;  %v774_v23 = vpop.f32.mrb[2].mxu0  ;;  %v394_v24 = vpop.f32.mrb[3].mxu1 }
  0xf1   : > { %v524_v25 = vadd.f32 %v774_v23, %v758_v21  ;;  %v515_v26 = vpop.f32.mrb[3].mxu0 }
  0xf2   : > { %v516_v27 = vadd.f32 %v515_v26, %v394_v24 }
  0xf4   : > { %548 = sbr.rel (!%p544_p8) target bundleno = 251 (0xfb), region = 40 }
  0xf5   : > { %v761_v28 = vpop.f32.mrb[4].mxu1 }
  0xf6   : > { %v777_v29 = vpop.f32.mrb[4].mxu0  ;;  %v407_v30 = vpop.f32.mrb[5].mxu1 }
  0xf7   : > { %v537_v31 = vadd.f32 %v777_v29, %v761_v28  ;;  %v528_v32 = vpop.f32.mrb[5].mxu0  ;;  %v762_v33 = vpop.f32.mrb[6].mxu1 }
  0xf8   : > { %v529_v34 = vadd.f32 %v528_v32, %v407_v30  ;;  %v778_v35 = vpop.f32.mrb[6].mxu0  ;;  %v410_v36 = vpop.f32.mrb[7].mxu1 }
  0xf9   : > { %v540_v37 = vadd.f32 %v778_v35, %v762_v33  ;;  %v531_v38 = vpop.f32.mrb[7].mxu0 }
  0xfa   : > { %v532_v39 = vadd.f32 %v531_v38, %v410_v36 }
  0xfb PF: > { %v551_v41 = vsel %vm344_vm0, %v513_v22, 0.0  ;;  %v552_v42 = vsel %vm344_vm0, %v516_v27, 0.0  ;;  %v554_v43 = vsel %vm344_vm0, %v521_v19, 0.0  ;;  %v556_v45 = vsel %vm344_vm0, %v524_v25, 0.0  ;;  %v575_v28 = vld [vmem:[%s965_s10 + $0x1] sm:$0x1] }
  0xfc   : > { %v553_v44 = vadd.f32 %v552_v42, %v551_v41  ;;  %v576_v46 = vmul.f32 %v513_v22, %v513_v22  ;;  %v577_v47 = vmul.f32 %v516_v27, %v516_v27  ;;  %v578_v49 = vmul.f32 %v521_v19, %v521_v19  ;;  %v550_v22 = vld [vmem:[%s965_s10] sm:$0x1] }
  0xfd   : > { %v579_v50 = vmul.f32 %v524_v25, %v524_v25  ;;  %v558_v51 = vsel %vm344_vm0, %v529_v34, 0.0  ;;  %v580_v54 = vmul.f32 %v529_v34, %v529_v34  ;;  %v560_v57 = vsel %vm344_vm0, %v532_v39, 0.0 }
  0xfe   : > { %v555_v48 = vadd.f32 %v554_v43, %v553_v44  ;;  %v584_v52 = vsel %vm344_vm0, %v576_v46, 0.0  ;;  %v585_v55 = vsel %vm344_vm0, %v577_v47, 0.0  ;;  %v587_v56 = vsel %vm344_vm0, %v578_v49, 0.0 }
  0xff   : > { %v586_v58 = vadd.f32 %v585_v55, %v584_v52  ;;  %v581_v60 = vmul.f32 %v532_v39, %v532_v39  ;;  %v589_v61 = vsel %vm344_vm0, %v579_v50, 0.0  ;;  %v562_v62 = vsel %vm344_vm0, %v537_v31, 0.0 }
 0x100   : > { %v557_v53 = vadd.f32 %v556_v45, %v555_v48  ;;  %v582_v1 = vmul.f32 %v537_v31, %v537_v31  ;;  %v591_v2 = vsel %vm344_vm0, %v580_v54, 0.0  ;;  %v564_v3 = vsel %vm344_vm0, %v540_v37, 0.0 }
 0x101   : > { %v588_v63 = vadd.f32 %v587_v56, %v586_v58  ;;  %v583_v6 = vmul.f32 %v540_v37, %v540_v37  ;;  %v593_v7 = vsel %vm344_vm0, %v581_v60, 0.0  ;;  %vm573_vm1 = vcmask 516096  }
 0x102   : > { %v559_v59 = vadd.f32 %v558_v51, %v557_v53  ;;  %v595_v10 = vsel %vm344_vm0, %v582_v1, 0.0 }
 0x103   : > { %v590_v4 = vadd.f32 %v589_v61, %v588_v63  ;;  %v597_v13 = vsel %vm344_vm0, %v583_v6, 0.0 }
 0x104   : > { %v561_v0 = vadd.f32 %v560_v57, %v559_v59 }
 0x105   : > { %v592_v8 = vadd.f32 %v591_v2, %v590_v4 }
 0x106   : > { %v563_v5 = vadd.f32 %v562_v62, %v561_v0 }
 0x107   : > { %v594_v11 = vadd.f32 %v593_v7, %v592_v8 }
 0x108   : > { %v565_v9 = vadd.f32 %v564_v3, %v563_v5 }
 0x109   : > { %v596_v14 = vadd.f32 %v595_v10, %v594_v11 }
 0x10a   : > { %v566_v12 = vrot.slane %v565_v9, 4 }
 0x10b   : > { %v598_v16 = vadd.f32 %v597_v13, %v596_v14 }
 0x10c   : > { %v567_v15 = vadd.f32 %v566_v12, %v565_v9 }
 0x10d   : > { %v599_v18 = vrot.slane %v598_v16, 4 }
 0x10e   : > { %v568_v17 = vrot.slane %v567_v15, 2 }
 0x10f   : > { %v600_v20 = vadd.f32 %v599_v18, %v598_v16 }
 0x110   : > { %v569_v19 = vadd.f32 %v568_v17, %v567_v15 }
 0x111   : > { %v601_v23 = vrot.slane %v600_v20, 2 }
 0x112   : > { %v570_v21 = vrot.slane %v569_v19, 1 }
 0x113   : > { %v602_v25 = vadd.f32 %v601_v23, %v600_v20 }
 0x114   : > { %v571_v24 = vadd.f32 %v570_v21, %v569_v19 }
 0x115   : > { %v603_v27 = vrot.slane %v602_v25, 1 }
 0x116   : > { %v572_v26 = vadd.f32 %v571_v24, %v550_v22 }
 0x117   : > { %v604_v29 = vadd.f32 %v603_v27, %v602_v25 }
 0x118   : > { %574 = vst.msk [vmem:[%s965_s10] sm:$0x1] %vm573_vm1, %v572_v26 }
 0x119   : > { %v605_v30 = vadd.f32 %v604_v29, %v575_v28 }
 0x11b   : > { %606 = vst.msk [vmem:[%s965_s10 + $0x1] sm:$0x1] %vm573_vm1, %v605_v30 }
 0x11c PF: > { %s14_s19 = sadd.s32 1, %s882_s19   ;;  %s1037_s15 = smov %s874_s17 }
 0x11d   : > { %p11_p9 = scmp.ge.s32.totalorder %s14_s19, 34   ;;  %s1038_s16 = smov %s878_s18 }
 0x11e   : > { %s1039_s17 = smov %s1042_s20  ;;  %s1040_s18 = smov %s1046_s21 }
 0x11f   :  { %13 = sbr.rel (!%p11_p9) target bundleno = 3 (0x3), region = 73 }

// kernel: _mgm_forward_impl.8
= control target key start
LH: loop header
LB: loop body
LE: loop exit
PB: predicated region body
PF: predicated region fallthrough
CT: control target
= control target key end

     0   :  { %s1581_s13 = smov 0   ;;  %s1583_s14 = smov 0   ;;  %s1889_s0 = inlined_call_operand.vmem [shape: bf16[16,128,64], index: 0, kind: input, shape index: {}]   ;;  %s1890_s1 = inlined_call_operand.vmem [shape: bf16[128,64], index: 1, kind: input, shape index: {}]   ;;  %s1891_s2 = inlined_call_operand.vmem [shape: bf16[64,64], index: 2, kind: input, shape index: {}]   ;;  %s1892_s3 = inlined_call_operand.vmem [shape: bf16[64,64], index: 3, kind: input, shape index: {}]   ;;  %s1893_s4 = inlined_call_operand.vmem [shape: f32[8,64], index: 4, kind: input, shape index: {}]   ;;  %s1894_s5 = inlined_call_operand.vmem [shape: f32[1,64], index: 5, kind: input, shape index: {}]   ;;  %s1895_s6 = inlined_call_operand.vmem [shape: f32[1,64], index: 6, kind: input, shape index: {}]   ;;  %s1896_s7 = inlined_call_operand.vmem [shape: bf16[64,64], index: 7, kind: input, shape index: {}]   ;;  %s1897_s8 = inlined_call_operand.vmem [shape: f32[16,64], index: 8, kind: output, shape index: {0}]   ;;  %s1898_s9 = inlined_call_operand.vmem [shape: f32[128,64], index: 9, kind: output, shape index: {1}]   ;;  %s1899_s10 = inlined_call_operand.vmem [shape: f32[128,64], index: 10, kind: output, shape index: {2}]  }
   0x1   :  { %1900 = sst [smem:[#allocation4_spill]] %s1892_s3  ;;  %s1585_s15 = smov 0  }
   0x2   :  { %1901 = sst [smem:[#allocation5_spill]] %s1897_s8  ;;  %s1587_s16 = smov 0  }
   0x3   :  { %s1589_s17 = smov 0  }
   0x4 LB: > { %s33_s18 = sadd.s32 1, %s1514_s15  ;;  %s40_s19 = sadd.s32 1, %s1518_s16  ;;  %s1522_s17 = sphi %s1589_s17, %s21_s17   ;;  %s1518_s16 = sphi %s1587_s16, %s1911_s16   ;;  %s1514_s15 = sphi %s1585_s15, %s1910_s15   ;;  %s1510_s14 = sphi %s1583_s14, %s1909_s14   ;;  %s1506_s13 = sphi %s1581_s13, %s1908_s13  }
   0x5   : > { %p34_p0 = scmp.ge.s32.totalorder %s33_s18, 16  ;;  %p1290_p1 = scmp.ge.s32.totalorder %s1522_s17, 1 }
   0x6   : > { %p366_p2 = scmp.lt.s32.totalorder %s1522_s17, 33 }
   0x7   : > { %s1913_s18 = smov (%p34_p0, %s33_s18), 0  ;;  %s1915_s19 = smov (!%p34_p0, %s40_s19), %s1518_s16 }
   0x8   : > { %1902 = sst [smem:[#allocation2_spill]] %s1913_s18  ;;  %p367_p3 = pnand %p1290_p1, %p366_p2 }
   0x9   : > { %p42_p4 = scmp.ge.s32.totalorder %s1915_s19, 2  ;;  %p446_p5 = scmp.lt.s32.totalorder (!%p367_p3), %s1510_s14, 1  ;;  %vm543_vm0 = vcmask (!%p367_p3), 523264   ;;  %v1478_v4 = vld [vmem:[%s1896_s7] sm:$0xff] (!%p367_p3)   ;;  %v1469_v9 = vld [vmem:[%s1891_s2 + $0x8] sm:$0xff] (!%p367_p3)   ;;  %v1472_v10 = vld [vmem:[%s1891_s2 + $0x10] sm:$0xff] (!%p367_p3)   ;;  %v758_v29 = vlaneseq (!%p367_p3) }
   0xa   : > { %370 = sbr.rel (%p367_p3) target bundleno = 543 (0x21f), region = 52  ;;  %s1904_s3 = sld [smem:[#allocation4_spill]] (!%p367_p3)  ;;  %1396 = vmatprep.subr.bf16.mxu1 (!%p367_p3), %v1478_v4  ;;  %v1468_v6 = vld [vmem:[%s1891_s2] sm:$0xff] (!%p367_p3)   ;;  %v1473_v13 = vld [vmem:[%s1891_s2 + $0x18] sm:$0xff] (!%p367_p3)   ;;  %v1479_v17 = vld [vmem:[%s1896_s7 + $0x8] sm:$0xff] (!%p367_p3)  }
   0xb   : > { %s1917_s19 = smov (%p42_p4, %s1915_s19), 0  ;;  %s1291_s24 = sshll.u32 (!%p367_p3), %s1510_s14, 3  ;;  %1397 = vmatpush3.bf16.msra.mxu1 (!%p367_p3), %v1478_v4  ;;  %v1480_v18 = vld [vmem:[%s1896_s7 + $0x10] sm:$0xff] (!%p367_p3)   ;;  %v1481_v19 = vld [vmem:[%s1896_s7 + $0x18] sm:$0xff] (!%p367_p3)   ;;  %v742_v20 = vld [vmem:[%s1893_s4] sm:$0xff] (!%p367_p3)  ;;  %v1688_v31 = vshrl.u32 (!%p367_p3), %v758_v29, 7 }
   0xc   : > { %1903 = sst [smem:[#allocation3_spill]] %s1917_s19  ;;  %p430_p6 = scmp.lt.s32.totalorder (!%p367_p3), %s1291_s24, 15  ;;  %1398 = vmatprep.subr.bf16.mxu1 (!%p367_p3), %v1479_v17  ;;  %v745_v21 = vmul.f32 (!%p367_p3), 0.00055803574, %v742_v20  ;;  %v1524_v27 = vmov (!%p367_p3), 1966171168  }
   0xd   : > { %s1905_s8 = sld [smem:[#allocation5_spill]] (!%p367_p3)  ;;  %p428_p7 = scmp.lt.s32.totalorder (!%p367_p3), %s1506_s13, 15  ;;  %v756_v28 = vunpack.c.l.s4 (!%p367_p3), %v1524_v27  ;;  %v743_v37 = vld [vmem:[%s1894_s5] sm:$0x1] (!%p367_p3)  ;;  %v777_v41 = vsub.s32 (!%p367_p3), 0, %v1688_v31  ;;  %v944_v27 = vadd.s32 (!%p367_p3), 24, %v1688_v31 }
   0xe   : > { %v746_v22 = vmul.f32 (!%p367_p3), %v745_v21, %v745_v21  ;;  %v744_v40 = vld [vmem:[%s1895_s6] sm:$0x1] (!%p367_p3)  ;;  %p992_p8 = scmp.eq.s32.totalorder (!%p367_p3), %s1506_s13, 0  ;;  %s1333_s12 = sshll.u32 (!%p367_p3), %s1510_s14, 6 }
   0xf   : > { %1399 = vmatpush3.bf16.msra.mxu1 (!%p367_p3), %v1479_v17  ;;  %v757_v30 = vunpack.c.0.s8 (!%p367_p3), %v756_v28  ;;  %v942_v28 = vadd.s32 (!%p367_p3), 8, %v1688_v31 }
  0x10   : > { %v1462_v0 = vld [vmem:[%s1904_s3] sm:$0xff] (!%p367_p3)   ;;  %v1463_v1 = vld [vmem:[%s1904_s3 + $0x8] sm:$0xff] (!%p367_p3)   ;;  %v1464_v2 = vld [vmem:[%s1904_s3 + $0x10] sm:$0xff] (!%p367_p3)   ;;  %1400 = vmatprep.subr.bf16.mxu1 (!%p367_p3), %v1480_v18  ;;  %v748_v23 = vrot.slane (!%p367_p3), %v746_v22, 7 }
  0x11   : > { %s447_s25 = scalar_select %p446_p5, %s1510_s14, 1  ;;  %1364 = vmatprep.subr.bf16.mxu0 %v1462_v0  ;;  %v1465_v3 = vld [vmem:[%s1904_s3 + $0x18] sm:$0xff]   ;;  %v760_v32 = vsub.s32 %v757_v30, %v1688_v31 }
  0x12   : > { %1365 = vmatpush3.bf16.msra.mxu0 %v1462_v0  ;;  %s1919_s24 = smov (!%p430_p6, %s1291_s24), 15  ;;  %v750_v24 = vsub.f32 %v745_v21, %v748_v23 }
  0x13   : > { %s1296_s26 = sshll.u32 %s447_s25, 3  ;;  %1366 = vmatprep.subr.bf16.mxu0 %v1463_v1  ;;  %s1295_s22 = sshll.u32 %s1919_s24, 2  ;;  %1401 = vmatpush3.bf16.msra.mxu1 %v1480_v18 }
  0x14   : > { %s1630_s11 = scalar_lea.vmem %s1905_s8, %s1296_s26  ;;  %s1298_s23 = sshll.u32 %s1919_s24, 3  ;;  %1402 = vmatprep.subr.bf16.mxu1 %v1481_v19  ;;  %v751_v25 = vmax.f32 %v750_v24, 0.0 }
  0x15   : > { %s429_s21 = scalar_select %p428_p7, %s1506_s13, 15 }
  0x16   : > { %1367 = vmatpush3.bf16.msra.mxu0 %v1463_v1  ;;  %s443_s26 = scalar_lea.vmem %s1890_s1, %s1295_s22  ;;  %s1646_s19 = scalar_lea.vmem %s1898_s9, %s1298_s23  ;;  %v752_v26 = vadd.f32 1e-05, %v751_v25  ;;  %v943_v25 = vadd.s32 16, %v1688_v31 }
  0x17   : > { %1368 = vmatprep.subr.bf16.mxu0 %v1464_v2  ;;  %s1651_s3 = scalar_lea.vmem %s1899_s10, %s1298_s23  ;;  %v1466_v5 = vld [vmem:[%s443_s26] sm:$0xff]   ;;  %s1292_s18 = sshll.u32 %s429_s21, 4  ;;  %v1467_v7 = vld [vmem:[%s443_s26 + $0x8] sm:$0xff]   ;;  %v1470_v8 = vld [vmem:[%s443_s26 + $0x10] sm:$0xff]   ;;  %1403 = vmatpush3.bf16.msra.mxu1 %v1481_v19 }
  0x18   : > { %s433_s25 = sadd.s32 %s1292_s18, %s1919_s24  ;;  %1372 = vmatprep.mubr.msk.bf16.mxu0 %vm543_vm0, %v1466_v5  ;;  %v1471_v11 = vld [vmem:[%s443_s26 + $0x18] sm:$0xff]   ;;  %1482 = vrsqrt.f32 %v752_v26  ;;  %v950_v26 = vstv %s1333_s12 }
  0x19   : > { %s1293_s8 = sshll.u32 %s433_s25, 2  ;;  %v953_v29 = vadd.s32 %v950_v26, %v943_v25  ;;  %v951_v30 = vadd.s32 %v950_v26, %v1688_v31 }
  0x1a   : > { %1369 = vmatpush3.bf16.msra.mxu0 %v1464_v2  ;;  %s435_s30 = scalar_lea.vmem %s1889_s0, %s1293_s8 }
  0x1b   : > { %1370 = vmatprep.subr.bf16.mxu0 %v1465_v3  ;;  %v1474_v12 = vld [vmem:[%s435_s30] sm:$0xff]   ;;  %v1475_v14 = vld [vmem:[%s435_s30 + $0x8] sm:$0xff]   ;;  %v1476_v15 = vld [vmem:[%s435_s30 + $0x10] sm:$0xff]   ;;  %vm961_vm9 = vcmp.lt.s32.totalorder %v953_v29, 112  ;;  %vm959_vm10 = vcmp.lt.s32.totalorder %v951_v30, 112 }
  0x1c   : > { %v1477_v16 = vld [vmem:[%s435_s30 + $0x18] sm:$0xff]  }
  0x1e   : > { %1371 = vmatpush3.bf16.msra.mxu0 %v1465_v3 }
  0x1f   : > { %1380 = vmatprep.subr.bf16.mxu0 %v1468_v6 }
  0x21   : > { %1373 = vmatmul.mubr.msk.bf16.vlgmr.msra.gmra.mrb[0].mxu0 %vm543_vm0, %v1467_v7 }
  0x22   : > { %1381 = vmatpush3.bf16.msra.mxu0 %v1468_v6  ;;  %1376 = vmatprep.mubr.msk.bf16.mxu0 %vm543_vm0, %v1470_v8  ;;  %v1483_v33 = vpop.eup %1482 }
  0x23   : > { %1382 = vmatprep.subr.bf16.mxu0 %v1469_v9  ;;  %v761_v34 = vrot.slane %v1483_v33, %v760_v32  ;;  %v952_v33 = vadd.s32 %v950_v26, %v942_v28 }
  0x25   : > { %v762_v35 = vcombine.high %v761_v34, %v761_v34  ;;  %v947_v34 = vadd.s32 48, %v1688_v31  ;;  %vm960_vm12 = vcmp.lt.s32.totalorder %v952_v33, 112 }
  0x26   : > { %1383 = vmatpush3.bf16.msra.mxu0 %v1469_v9 }
  0x27   : > { %1384 = vmatprep.subr.bf16.mxu0 %v1472_v10  ;;  %v769_v36 = vrot.slane %v762_v35, %v760_v32  ;;  %v954_v32 = vadd.s32 %v950_v26, %v944_v27  ;;  %v945_v35 = vadd.s32 32, %v1688_v31 }
  0x29   : > { %1377 = vmatmul.mubr.msk.bf16.gmra.mrb[4].mxu0 %vm543_vm0, %v1471_v11  ;;  %v771_v38 = vmul.f32 %v769_v36, %v743_v37  ;;  %vm962_vm11 = vcmp.lt.s32.totalorder %v954_v32, 112  ;;  %v948_v37 = vadd.s32 56, %v1688_v31 }
  0x2a   : > { %1385 = vmatpush3.bf16.msra.mxu0 %v1472_v10  ;;  %1388 = vmatprep.mubr.msk.bf16.mxu0 %vm543_vm0, %v1474_v12 }
  0x2b   : > { %1386 = vmatprep.subr.bf16.mxu0 %v1473_v13  ;;  %v772_v39 = vmul.f32 %v771_v38, %v745_v21  ;;  %v778_v43 = vrot.slane %v771_v38, %v777_v41 }
  0x2d   : > { %v773_v42 = vsub.f32 %v744_v40, %v772_v39  ;;  %v946_v40 = vadd.s32 40, %v1688_v31 }
  0x2e   : > { %1387 = vmatpush3.bf16.msra.mxu0 %v1473_v13 }
  0x2f   : > { %v792_v44 = vrot.slane %v773_v42, %v777_v41 }
  0x31   : > { %1389 = vmatmul.mubr.msk.bf16.vlgmr.msra.gmra.mrb[0].mxu0 %vm543_vm0, %v1475_v14 }
  0x32   : > { %1392 = vmatprep.mubr.msk.bf16.mxu0 %vm543_vm0, %v1476_v15 }
  0x39   : > { %1393 = vmatmul.mubr.msk.bf16.gmra.mrb[4].mxu0 %vm543_vm0, %v1477_v16 }
 0x104   : > { %v1390_v45 = vpop.f32.mrb[0].mxu0 }
 0x105   : > { %v782_v46 = vmul.f32 %v1390_v45, %v778_v43  ;;  %v711_v47 = vpop.f32.mrb[1].mxu0 }
 0x106   : > { %v780_v48 = vmul.f32 %v778_v43, %v711_v47  ;;  %v1391_v49 = vpop.f32.mrb[2].mxu0 }
 0x107   : > { %v796_v50 = vadd.f32 %v792_v44, %v782_v46  ;;  %v783_v51 = vmul.f32 %v1391_v49, %v778_v43  ;;  %v714_v52 = vpop.f32.mrb[3].mxu0  ;;  %v955_v46 = vadd.s32 %v950_v26, %v945_v35  ;;  %v956_v49 = vadd.s32 %v950_v26, %v946_v40 }
 0x108   : > { %v794_v53 = vadd.f32 %v792_v44, %v780_v48  ;;  %v781_v54 = vmul.f32 %v778_v43, %v714_v52  ;;  %v958_v48 = vadd.s32 %v950_v26, %v948_v37 }
 0x109   : > { %v812_v55 = vmul.f32 0.2, %v796_v50  ;;  %v797_v56 = vadd.f32 %v792_v44, %v783_v51  ;;  %vm804_vm1 = vcmp.gt.f32.partialorder %v796_v50, 0.0  ;;  %vm963_vm14 = vcmp.lt.s32.totalorder %v955_v46, 112 }
 0x10a   : > { %v795_v57 = vadd.f32 %v792_v44, %v781_v54  ;;  %v810_v58 = vmul.f32 0.2, %v794_v53  ;;  %vm802_vm3 = vcmp.gt.f32.partialorder %v794_v53, 0.0  ;;  %vm966_vm15 = vcmp.lt.s32.totalorder %v958_v48, 112 }
 0x10b   : > { %vm805_vm2 = vcmp.gt.f32.partialorder %v797_v56, 0.0  ;;  %v813_v59 = vmul.f32 0.2, %v797_v56  ;;  %v820_v62 = vsel %vm804_vm1, %v796_v50, %v812_v55  ;;  %vm964_vm1 = vcmp.lt.s32.totalorder %v956_v49, 112 }
 0x10c   : > { %v1394_v60 = vpop.f32.mrb[4].mxu0  ;;  %vm803_vm4 = vcmp.gt.f32.partialorder %v795_v57, 0.0  ;;  %v811_v61 = vmul.f32 0.2, %v795_v57  ;;  %v818_v4 = vsel %vm802_vm3, %v794_v53, %v810_v58 }
 0x10d   : > { %v821_v63 = vsel %vm805_vm2, %v797_v56, %v813_v59  ;;  %v786_v0 = vmul.f32 %v1394_v60, %v778_v43  ;;  %v727_v1 = vpop.f32.mrb[5].mxu0 }
 0x10e   : > { %v784_v2 = vmul.f32 %v778_v43, %v727_v1  ;;  %v1395_v3 = vpop.f32.mrb[6].mxu0  ;;  %v819_v5 = vsel %vm803_vm4, %v795_v57, %v811_v61  ;;  %v827_v6 = vpack.c.bf16 %v821_v63, %v820_v62  ;;  %v1525_v57 = vmov (%p992_p8), 0.0  }
 0x10f   : > { %v800_v7 = vadd.f32 %v792_v44, %v786_v0  ;;  %v787_v8 = vmul.f32 %v1395_v3, %v778_v43  ;;  %v730_v9 = vpop.f32.mrb[7].mxu0  ;;  %v826_v10 = vpack.c.bf16 %v819_v5, %v818_v4  ;;  %997 = vst.msk [vmem:[%s1630_s11] sm:$0xff] (%p992_p8), %vm543_vm0, %v1525_v57 }
 0x110   : > { %v798_v11 = vadd.f32 %v792_v44, %v784_v2  ;;  %v785_v12 = vmul.f32 %v778_v43, %v730_v9  ;;  %v957_v43 = vadd.s32 %v950_v26, %v947_v34 }
 0x111   : > { %v816_v13 = vmul.f32 0.2, %v800_v7  ;;  %v801_v14 = vadd.f32 %v792_v44, %v787_v8  ;;  %1404 = vmatprep.mubr.msk.bf16.mxu1 %vm543_vm0, %v826_v10  ;;  %vm808_vm5 = vcmp.gt.f32.partialorder %v800_v7, 0.0 }
 0x112   : > { %v814_v15 = vmul.f32 0.2, %v798_v11  ;;  %v799_v16 = vadd.f32 %v792_v44, %v785_v12  ;;  %1405 = vmatmul.mubr.msk.bf16.vlgmr.msra.gmra.mrb[0].mxu1 %vm543_vm0, %v827_v6  ;;  %vm806_vm6 = vcmp.gt.f32.partialorder %v798_v11, 0.0  ;;  %vm965_vm13 = vcmp.lt.s32.totalorder %v957_v43, 112 }
 0x113   : > { %vm809_vm7 = vcmp.gt.f32.partialorder %v801_v14, 0.0  ;;  %v817_v17 = vmul.f32 0.2, %v801_v14  ;;  %v824_v19 = vsel %vm808_vm5, %v800_v7, %v816_v13 }
 0x114   : > { %vm807_vm8 = vcmp.gt.f32.partialorder %v799_v16, 0.0  ;;  %v815_v18 = vmul.f32 0.2, %v799_v16  ;;  %v822_v21 = vsel %vm806_vm6, %v798_v11, %v814_v15 }
 0x115   : > { %v825_v20 = vsel %vm809_vm7, %v801_v14, %v817_v17 }
 0x116   : > { %v823_v22 = vsel %vm807_vm8, %v799_v16, %v815_v18  ;;  %v829_v23 = vpack.c.bf16 %v825_v20, %v824_v19 }
 0x117   : > { %v828_v24 = vpack.c.bf16 %v823_v22, %v822_v21 }
 0x119   : > { %1408 = vmatprep.mubr.msk.bf16.mxu1 %vm543_vm0, %v828_v24 }
 0x11a   : > { %1409 = vmatmul.mubr.msk.bf16.gmra.mrb[4].mxu1 %vm543_vm0, %v829_v23 }
 0x1e5   : > { %v1710_v36 = vpop.f32.mrb[0].mxu1 }
 0x1e6   : > { %v985_v38 = vsel %vm961_vm9, %v1710_v36, 0.0  ;;  %v1714_v39 = vpop.f32.mrb[1].mxu1 }
 0x1e7   : > { %v983_v41 = vsel %vm959_vm10, %v1714_v39, 0.0  ;;  %v1718_v42 = vpop.f32.mrb[2].mxu1 }
 0x1e8   : > { %v986_v44 = vsel %vm962_vm11, %v1718_v42, 0.0  ;;  %v1721_v45 = vpop.f32.mrb[3].mxu1 }
 0x1e9   : > { %v984_v47 = vsel %vm960_vm12, %v1721_v45, 0.0 }
 0x1eb   : > { %996 = sbr.rel (!%p992_p8) target bundleno = 498 (0x1f2), region = 56 }
 0x1ed   : > { %v1724_v50 = vpop.f32.mrb[4].mxu1 }
 0x1ee   : > { %v989_v31 = vsel %vm965_vm13, %v1724_v50, 0.0  ;;  %v1727_v51 = vpop.f32.mrb[5].mxu1 }
 0x1ef   : > { %v987_v52 = vsel %vm963_vm14, %v1727_v51, 0.0  ;;  %v1730_v53 = vpop.f32.mrb[6].mxu1 }
 0x1f0   : > { %v990_v54 = vsel %vm966_vm15, %v1730_v53, 0.0  ;;  %v1733_v55 = vpop.f32.mrb[7].mxu1 }
 0x1f1   : > { %v988_v56 = vsel %vm964_vm1, %v1733_v55, 0.0 }
 0x1f2 PF: > { %v999_v58 = vsel %vm543_vm0, %v983_v41, 0.0  ;;  %v1000_v59 = vsel %vm543_vm0, %v984_v47, 0.0  ;;  %v1002_v60 = vsel %vm543_vm0, %v985_v38, 0.0  ;;  %v1004_v62 = vsel %vm543_vm0, %v986_v44, 0.0  ;;  %v998_v43 = vld [vmem:[%s1630_s11] sm:$0x1] }
 0x1f3   : > { %v1001_v61 = vadd.f32 %v1000_v59, %v999_v58  ;;  %v1024_v63 = vmul.f32 %v983_v41, %v983_v41  ;;  %v1025_v0 = vmul.f32 %v984_v47, %v984_v47  ;;  %v1026_v2 = vmul.f32 %v985_v38, %v985_v38  ;;  %p1335_p9 = scmp.ne.s32.totalorder %s1506_s13, 0 }
 0x1f4   : > { %v1027_v3 = vmul.f32 %v986_v44, %v986_v44  ;;  %v1006_v4 = vsel %vm543_vm0, %v987_v52, 0.0  ;;  %v1028_v7 = vmul.f32 %v987_v52, %v987_v52  ;;  %v1008_v10 = vsel %vm543_vm0, %v988_v56, 0.0  ;;  %1058 = vst.msk [vmem:[%s1646_s19] sm:$0xff] (!%p1335_p9), %vm543_vm0, %v1714_v39  ;;  %1059 = vst.msk [vmem:[%s1646_s19 + $0x8] sm:$0xff] (!%p1335_p9), %vm543_vm0, %v1721_v45 }
 0x1f5   : > { %v1003_v1 = vadd.f32 %v1002_v60, %v1001_v61  ;;  %v1032_v5 = vsel %vm543_vm0, %v1024_v63, 0.0  ;;  %v1033_v8 = vsel %vm543_vm0, %v1025_v0, 0.0  ;;  %v1035_v9 = vsel %vm543_vm0, %v1026_v2, 0.0  ;;  %1060 = vst.msk [vmem:[%s1646_s19 + $0x10] sm:$0xff] (!%p1335_p9), %vm543_vm0, %v1710_v36  ;;  %1061 = vst.msk [vmem:[%s1646_s19 + $0x18] sm:$0xff] (!%p1335_p9), %vm543_vm0, %v1718_v42 }
 0x1f6   : > { %v1034_v11 = vadd.f32 %v1033_v8, %v1032_v5  ;;  %v1029_v13 = vmul.f32 %v988_v56, %v988_v56  ;;  %v1037_v14 = vsel %vm543_vm0, %v1027_v3, 0.0  ;;  %v1010_v15 = vsel %vm543_vm0, %v989_v31, 0.0  ;;  %1062 = vst.msk [vmem:[%s1646_s19 + $0x20] sm:$0xff] (!%p1335_p9), %vm543_vm0, %v1727_v51  ;;  %1063 = vst.msk [vmem:[%s1646_s19 + $0x28] sm:$0xff] (!%p1335_p9), %vm543_vm0, %v1733_v55 }
 0x1f7   : > { %v1005_v6 = vadd.f32 %v1004_v62, %v1003_v1  ;;  %v1030_v18 = vmul.f32 %v989_v31, %v989_v31  ;;  %v1039_v19 = vsel %vm543_vm0, %v1028_v7, 0.0  ;;  %v1012_v20 = vsel %vm543_vm0, %v990_v54, 0.0  ;;  %v1023_v31 = vld [vmem:[%s1630_s11 + $0x1] sm:$0x1]  ;;  %1064 = vst.msk [vmem:[%s1646_s19 + $0x30] sm:$0xff] (!%p1335_p9), %vm543_vm0, %v1724_v50  ;;  %1065 = vst.msk [vmem:[%s1646_s19 + $0x38] sm:$0xff] (!%p1335_p9), %vm543_vm0, %v1730_v53 }
 0x1f8   : > { %v1036_v16 = vadd.f32 %v1035_v9, %v1034_v11  ;;  %v1031_v23 = vmul.f32 %v990_v54, %v990_v54  ;;  %v1041_v24 = vsel %vm543_vm0, %v1029_v13, 0.0  ;;  %vm1021_vm2 = vcmask 516096   ;;  %1066 = vst.msk [vmem:[%s1651_s3] sm:$0xff] (!%p1335_p9), %vm543_vm0, %v1714_v39  ;;  %1067 = vst.msk [vmem:[%s1651_s3 + $0x8] sm:$0xff] (!%p1335_p9), %vm543_vm0, %v1721_v45 }
 0x1f9   : > { %v1007_v12 = vadd.f32 %v1006_v4, %v1005_v6  ;;  %v1043_v27 = vsel %vm543_vm0, %v1030_v18, 0.0  ;;  %1068 = vst.msk [vmem:[%s1651_s3 + $0x10] sm:$0xff] (!%p1335_p9), %vm543_vm0, %v1710_v36  ;;  %1069 = vst.msk [vmem:[%s1651_s3 + $0x18] sm:$0xff] (!%p1335_p9), %vm543_vm0, %v1718_v42 }
 0x1fa   : > { %v1038_v21 = vadd.f32 %v1037_v14, %v1036_v16  ;;  %v1045_v30 = vsel %vm543_vm0, %v1031_v23, 0.0  ;;  %1070 = vst.msk [vmem:[%s1651_s3 + $0x20] sm:$0xff] (!%p1335_p9), %vm543_vm0, %v1727_v51  ;;  %1071 = vst.msk [vmem:[%s1651_s3 + $0x28] sm:$0xff] (!%p1335_p9), %vm543_vm0, %v1733_v55 }
 0x1fb   : > { %v1009_v17 = vadd.f32 %v1008_v10, %v1007_v12  ;;  %1072 = vst.msk [vmem:[%s1651_s3 + $0x30] sm:$0xff] (!%p1335_p9), %vm543_vm0, %v1724_v50  ;;  %1073 = vst.msk [vmem:[%s1651_s3 + $0x38] sm:$0xff] (!%p1335_p9), %vm543_vm0, %v1730_v53 }
 0x1fc   : > { %v1040_v25 = vadd.f32 %v1039_v19, %v1038_v21 }
 0x1fd   : > { %v1011_v22 = vadd.f32 %v1010_v15, %v1009_v17 }
 0x1fe   : > { %v1042_v28 = vadd.f32 %v1041_v24, %v1040_v25 }
 0x1ff   : > { %v1013_v26 = vadd.f32 %v1012_v20, %v1011_v22 }
 0x200   : > { %v1044_v32 = vadd.f32 %v1043_v27, %v1042_v28 }
 0x201   : > { %v1014_v29 = vrot.slane %v1013_v26, 4 }
 0x202   : > { %v1046_v34 = vadd.f32 %v1045_v30, %v1044_v32 }
 0x203   : > { %v1015_v33 = vadd.f32 %v1014_v29, %v1013_v26 }
 0x204   : > { %v1047_v37 = vrot.slane %v1046_v34, 4 }
 0x205   : > { %v1016_v35 = vrot.slane %v1015_v33, 2 }
 0x206   : > { %v1048_v40 = vadd.f32 %v1047_v37, %v1046_v34 }
 0x207   : > { %v1017_v38 = vadd.f32 %v1016_v35, %v1015_v33 }
 0x208   : > { %v1049_v44 = vrot.slane %v1048_v40, 2 }
 0x209   : > { %v1018_v41 = vrot.slane %v1017_v38, 1 }
 0x20a   : > { %v1050_v47 = vadd.f32 %v1049_v44, %v1048_v40 }
 0x20b   : > { %v1019_v46 = vadd.f32 %v1018_v41, %v1017_v38 }
 0x20c   : > { %v1051_v49 = vrot.slane %v1050_v47, 1  ;;  %1057 = sbr.rel (%p1335_p9) target bundleno = 531 (0x213), region = 60 }
 0x20d   : > { %v1020_v48 = vadd.f32 %v1019_v46, %v998_v43 }
 0x20e   : > { %v1052_v52 = vadd.f32 %v1051_v49, %v1050_v47 }
 0x20f   : > { %1022 = vst.msk [vmem:[%s1630_s11] sm:$0x1] %vm1021_vm2, %v1020_v48 }
 0x210   : > { %v1053_v54 = vadd.f32 %v1052_v52, %v1023_v31 }
 0x212   : > { %1054 = vst.msk [vmem:[%s1630_s11 + $0x1] sm:$0x1] %vm1021_vm2, %v1053_v54 }
 0x213 PF: > { %p1336_p10 = scmp.le.s32.totalorder %s1506_s13, 0 }
 0x214   : > { %v1078_v56 = vld [vmem:[%s1646_s19] sm:$0xff] (!%p1336_p10)  ;;  %v1079_v57 = vld [vmem:[%s1646_s19 + $0x8] sm:$0xff] (!%p1336_p10)  ;;  %v1080_v58 = vld [vmem:[%s1646_s19 + $0x10] sm:$0xff] (!%p1336_p10) }
 0x215   : > { %1077 = sbr.rel (%p1336_p10) target bundleno = 543 (0x21f), region = 64  ;;  %v1086_v59 = vmax.f32 (!%p1336_p10), %v1078_v56, %v1714_v39  ;;  %v1087_v60 = vmax.f32 (!%p1336_p10), %v1079_v57, %v1721_v45  ;;  %v1088_v61 = vmax.f32 (!%p1336_p10), %v1080_v58, %v1710_v36  ;;  %v1081_v62 = vld [vmem:[%s1646_s19 + $0x18] sm:$0xff] (!%p1336_p10)  ;;  %v1082_v63 = vld [vmem:[%s1646_s19 + $0x20] sm:$0xff] (!%p1336_p10)  ;;  %v1083_v0 = vld [vmem:[%s1646_s19 + $0x28] sm:$0xff] (!%p1336_p10) }
 0x216   : > { %v1089_v1 = vmax.f32 (!%p1336_p10), %v1081_v62, %v1718_v42  ;;  %v1090_v2 = vmax.f32 (!%p1336_p10), %v1082_v63, %v1727_v51  ;;  %v1091_v3 = vmax.f32 (!%p1336_p10), %v1083_v0, %v1733_v55  ;;  %v1084_v4 = vld [vmem:[%s1646_s19 + $0x30] sm:$0xff] (!%p1336_p10)  ;;  %v1085_v5 = vld [vmem:[%s1646_s19 + $0x38] sm:$0xff] (!%p1336_p10)  ;;  %v1102_v6 = vld [vmem:[%s1651_s3] sm:$0xff] (!%p1336_p10) }
 0x217   : > { %1094 = vst.msk [vmem:[%s1646_s19] sm:$0xff] (!%p1336_p10), %vm543_vm0, %v1086_v59  ;;  %1095 = vst.msk [vmem:[%s1646_s19 + $0x8] sm:$0xff] (!%p1336_p10), %vm543_vm0, %v1087_v60  ;;  %v1092_v7 = vmax.f32 (!%p1336_p10), %v1084_v4, %v1724_v50  ;;  %v1093_v8 = vmax.f32 (!%p1336_p10), %v1085_v5, %v1730_v53  ;;  %v1110_v9 = vmin.f32 (!%p1336_p10), %v1102_v6, %v1714_v39  ;;  %v1103_v10 = vld [vmem:[%s1651_s3 + $0x8] sm:$0xff] (!%p1336_p10)  ;;  %v1104_v11 = vld [vmem:[%s1651_s3 + $0x10] sm:$0xff] (!%p1336_p10) }
 0x218   : > { %1096 = vst.msk [vmem:[%s1646_s19 + $0x10] sm:$0xff] (!%p1336_p10), %vm543_vm0, %v1088_v61  ;;  %v1105_v12 = vld [vmem:[%s1651_s3 + $0x18] sm:$0xff] (!%p1336_p10)  ;;  %1097 = vst.msk [vmem:[%s1646_s19 + $0x18] sm:$0xff] (!%p1336_p10), %vm543_vm0, %v1089_v1  ;;  %v1111_v13 = vmin.f32 (!%p1336_p10), %v1103_v10, %v1721_v45  ;;  %v1112_v14 = vmin.f32 (!%p1336_p10), %v1104_v11, %v1710_v36  ;;  %v1106_v15 = vld [vmem:[%s1651_s3 + $0x20] sm:$0xff] (!%p1336_p10) }
 0x219   : > { %1098 = vst.msk [vmem:[%s1646_s19 + $0x20] sm:$0xff] (!%p1336_p10), %vm543_vm0, %v1090_v2  ;;  %1099 = vst.msk [vmem:[%s1646_s19 + $0x28] sm:$0xff] (!%p1336_p10), %vm543_vm0, %v1091_v3  ;;  %v1113_v39 = vmin.f32 (!%p1336_p10), %v1105_v12, %v1718_v42  ;;  %v1107_v16 = vld [vmem:[%s1651_s3 + $0x28] sm:$0xff] (!%p1336_p10)  ;;  %v1108_v17 = vld [vmem:[%s1651_s3 + $0x30] sm:$0xff] (!%p1336_p10)  ;;  %v1114_v18 = vmin.f32 (!%p1336_p10), %v1106_v15, %v1727_v51 }
 0x21a   : > { %1100 = vst.msk [vmem:[%s1646_s19 + $0x30] sm:$0xff] (!%p1336_p10), %vm543_vm0, %v1092_v7  ;;  %1101 = vst.msk [vmem:[%s1646_s19 + $0x38] sm:$0xff] (!%p1336_p10), %vm543_vm0, %v1093_v8  ;;  %v1115_v45 = vmin.f32 (!%p1336_p10), %v1107_v16, %v1733_v55  ;;  %v1116_v36 = vmin.f32 (!%p1336_p10), %v1108_v17, %v1724_v50  ;;  %v1109_v19 = vld [vmem:[%s1651_s3 + $0x38] sm:$0xff] (!%p1336_p10) }
 0x21b   : > { %1118 = vst.msk [vmem:[%s1651_s3] sm:$0xff] (!%p1336_p10), %vm543_vm0, %v1110_v9  ;;  %1119 = vst.msk [vmem:[%s1651_s3 + $0x8] sm:$0xff] (!%p1336_p10), %vm543_vm0, %v1111_v13  ;;  %v1117_v42 = vmin.f32 (!%p1336_p10), %v1109_v19, %v1730_v53 }
 0x21c   : > { %1120 = vst.msk [vmem:[%s1651_s3 + $0x10] sm:$0xff] %vm543_vm0, %v1112_v14  ;;  %1121 = vst.msk [vmem:[%s1651_s3 + $0x18] sm:$0xff] %vm543_vm0, %v1113_v39 }
 0x21d   : > { %1122 = vst.msk [vmem:[%s1651_s3 + $0x20] sm:$0xff] %vm543_vm0, %v1114_v18  ;;  %1123 = vst.msk [vmem:[%s1651_s3 + $0x28] sm:$0xff] %vm543_vm0, %v1115_v45 }
 0x21e   : > { %1124 = vst.msk [vmem:[%s1651_s3 + $0x30] sm:$0xff] %vm543_vm0, %v1116_v36  ;;  %1125 = vst.msk [vmem:[%s1651_s3 + $0x38] sm:$0xff] %vm543_vm0, %v1117_v42 }
 0x21f PF: > { %s21_s17 = sadd.s32 1, %s1522_s17   ;;  %s1906_s19 = sld [smem:[#allocation2_spill]] }
 0x220   : > { %p18_p11 = scmp.ge.s32.totalorder %s21_s17, 34   ;;  %s1907_s11 = sld [smem:[#allocation3_spill]] }
 0x221   : > { %s1908_s13 = smov %s1514_s15  ;;  %s1909_s14 = smov %s1518_s16 }
 0x222   :  { %20 = sbr.rel (!%p18_p11) target bundleno = 4 (0x4), region = 121 }
 0x225   : > { %s1910_s15 = smov %s1906_s19 }
 0x226   : > { %s1911_s16 = smov %s1907_s11 }

// kernel: _mgm_forward_impl.10
= control target key start
LH: loop header
LB: loop body
LE: loop exit
PB: predicated region body
PF: predicated region fallthrough
CT: control target
= control target key end

     0   :  { %s910_s15 = smov 0   ;;  %s912_s16 = smov 0   ;;  %s1032_s0 = inlined_call_operand.vmem [shape: bf16[8,128,64], index: 0, kind: input, shape index: {}]   ;;  %s1033_s1 = inlined_call_operand.vmem [shape: bf16[128,64], index: 1, kind: input, shape index: {}]   ;;  %s1034_s2 = inlined_call_operand.vmem [shape: bf16[64,64], index: 2, kind: input, shape index: {}]   ;;  %s1035_s3 = inlined_call_operand.vmem [shape: bf16[64,64], index: 3, kind: input, shape index: {}]   ;;  %s1036_s4 = inlined_call_operand.vmem [shape: f32[16,64], index: 4, kind: output, shape index: {}]  }
   0x1   :  { %s914_s17 = smov 0   ;;  %s916_s18 = smov 0  }
   0x2   :  { %s918_s19 = smov 0  }
   0x3 LB: > { %s26_s20 = sadd.s32 1, %s874_s17  ;;  %s33_s21 = sadd.s32 1, %s878_s18  ;;  %s882_s19 = sphi %s918_s19, %s14_s19   ;;  %s878_s18 = sphi %s916_s18, %s1040_s18   ;;  %s874_s17 = sphi %s914_s17, %s1039_s17   ;;  %s870_s16 = sphi %s912_s16, %s1038_s16   ;;  %s866_s15 = sphi %s910_s15, %s1037_s15  }
   0x4   : > { %p27_p0 = scmp.ge.s32.totalorder %s26_s20, 8  ;;  %p696_p1 = scmp.ge.s32.totalorder %s882_s19, 1 }
   0x5   : > { %p207_p2 = scmp.lt.s32.totalorder %s882_s19, 17 }
   0x6   : > { %s1042_s20 = smov (%p27_p0, %s26_s20), 0  ;;  %s1044_s21 = smov (!%p27_p0, %s33_s21), %s878_s18 }
   0x7   : > { %p208_p3 = pnand %p696_p1, %p207_p2  ;;  %p35_p4 = scmp.ge.s32.totalorder %s1044_s21, 2 }
   0x8   : > { %p263_p5 = scmp.lt.s32.totalorder (!%p208_p3), %s870_s16, 1  ;;  %v828_v0 = vld [vmem:[%s1035_s3] sm:$0xff] (!%p208_p3)   ;;  %s697_s26 = sshll.u32 (!%p208_p3), %s870_s16, 3  ;;  %v830_v2 = vld [vmem:[%s1035_s3 + $0x8] sm:$0xff] (!%p208_p3)   ;;  %v832_v4 = vld [vmem:[%s1035_s3 + $0x10] sm:$0xff] (!%p208_p3)   ;;  %vm344_vm0 = vcmask (!%p208_p3), 523264  }
   0x9   : > { %s1046_s21 = smov (%p35_p4, %s1044_s21), 0  ;;  %211 = sbr.rel (%p208_p3) target bundleno = 284 (0x11c), region = 36 }
   0xa   : > { %v829_v1 = vld [vmem:[%s1034_s2] sm:$0xff] (!%p208_p3)   ;;  %747 = vmatprep.subr.bf16.mxu1 (!%p208_p3), %v828_v0  ;;  %v831_v3 = vld [vmem:[%s1034_s2 + $0x8] sm:$0xff] (!%p208_p3)   ;;  %p247_p6 = scmp.lt.s32.totalorder (!%p208_p3), %s697_s26, 15  ;;  %v833_v5 = vld [vmem:[%s1034_s2 + $0x10] sm:$0xff] (!%p208_p3)   ;;  %p245_p7 = scmp.lt.s32.totalorder (!%p208_p3), %s866_s15, 7 }
   0xb   : > { %763 = vmatprep.subr.bf16.mxu0 (!%p208_p3), %v829_v1  ;;  %748 = vmatpush3.bf16.msra.mxu1 (!%p208_p3), %v828_v0  ;;  %v834_v6 = vld [vmem:[%s1035_s3 + $0x18] sm:$0xff] (!%p208_p3)   ;;  %p544_p8 = scmp.eq.s32.totalorder (!%p208_p3), %s866_s15, 0 }
   0xc   : > { %764 = vmatpush3.bf16.msra.mxu0 (!%p208_p3), %v829_v1  ;;  %749 = vmatprep.subr.bf16.mxu1 (!%p208_p3), %v830_v2  ;;  %v835_v7 = vld [vmem:[%s1034_s2 + $0x18] sm:$0xff] (!%p208_p3)  }
   0xd   : > { %765 = vmatprep.subr.bf16.mxu0 (!%p208_p3), %v831_v3 }
   0xf   : > { %750 = vmatpush3.bf16.msra.mxu1 (!%p208_p3), %v830_v2 }
  0x10   : > { %s1048_s16 = smov (!%p263_p5, %s870_s16), 1  ;;  %s1050_s26 = smov (!%p247_p6, %s697_s26), 15  ;;  %766 = vmatpush3.bf16.msra.mxu0 %v831_v3  ;;  %751 = vmatprep.subr.bf16.mxu1 %v832_v4 }
  0x11   : > { %s702_s5 = sshll.u32 %s1048_s16, 3  ;;  %s701_s16 = sshll.u32 %s1050_s26, 2  ;;  %767 = vmatprep.subr.bf16.mxu0 %v833_v5  ;;  %v884_v40 = vmov (%p544_p8), 0.0  }
  0x12   : > { %s965_s10 = scalar_lea.vmem %s1036_s4, %s702_s5  ;;  %s260_s27 = scalar_lea.vmem %s1033_s1, %s701_s16 }
  0x13   : > { %v836_v8 = vld [vmem:[%s260_s27] sm:$0xff]   ;;  %s246_s28 = scalar_select %p245_p7, %s866_s15, 7  ;;  %752 = vmatpush3.bf16.msra.mxu1 %v832_v4  ;;  %v838_v9 = vld [vmem:[%s260_s27 + $0x8] sm:$0xff]   ;;  %v840_v10 = vld [vmem:[%s260_s27 + $0x10] sm:$0xff]  }
  0x14   : > { %768 = vmatpush3.bf16.msra.mxu0 %v833_v5  ;;  %753 = vmatprep.subr.bf16.mxu1 %v834_v6  ;;  %v842_v14 = vld [vmem:[%s260_s27 + $0x18] sm:$0xff]   ;;  %549 = vst.msk [vmem:[%s965_s10] sm:$0xff] (%p544_p8), %vm344_vm0, %v884_v40 }
  0x15   : > { %s698_s29 = sshll.u32 %s246_s28, 4  ;;  %769 = vmatprep.subr.bf16.mxu0 %v835_v7  ;;  %755 = vmatprep.mubr.msk.bf16.mxu1 %vm344_vm0, %v836_v8 }
  0x16   : > { %s250_s30 = sadd.s32 %s698_s29, %s1050_s26 }
  0x17   : > { %s699_s5 = sshll.u32 %s250_s30, 2  ;;  %754 = vmatpush3.bf16.msra.mxu1 %v834_v6 }
  0x18   : > { %s252_s8 = scalar_lea.vmem %s1032_s0, %s699_s5  ;;  %770 = vmatpush3.bf16.msra.mxu0 %v835_v7 }
  0x19   : > { %v837_v11 = vld [vmem:[%s252_s8] sm:$0xff]   ;;  %v839_v12 = vld [vmem:[%s252_s8 + $0x8] sm:$0xff]   ;;  %v841_v13 = vld [vmem:[%s252_s8 + $0x10] sm:$0xff]  }
  0x1a   : > { %771 = vmatprep.mubr.msk.bf16.mxu0 %vm344_vm0, %v837_v11  ;;  %756 = vmatmul.mubr.msk.bf16.vlgmr.msra.gmra.mrb[0].mxu1 %vm344_vm0, %v838_v9  ;;  %v843_v15 = vld [vmem:[%s252_s8 + $0x18] sm:$0xff]  }
  0x1b   : > { %772 = vmatmul.mubr.msk.bf16.vlgmr.msra.gmra.mrb[0].mxu0 %vm344_vm0, %v839_v12  ;;  %759 = vmatprep.mubr.msk.bf16.mxu1 %vm344_vm0, %v840_v10 }
  0x1c   : > { %775 = vmatprep.mubr.msk.bf16.mxu0 %vm344_vm0, %v841_v13 }
  0x22   : > { %760 = vmatmul.mubr.msk.bf16.gmra.mrb[4].mxu1 %vm344_vm0, %v842_v14 }
  0x23   : > { %776 = vmatmul.mubr.msk.bf16.gmra.mrb[4].mxu0 %vm344_vm0, %v843_v15 }
  0xed   : > { %v757_v16 = vpop.f32.mrb[0].mxu1 }
  0xee   : > { %v773_v17 = vpop.f32.mrb[0].mxu0  ;;  %v391_v18 = vpop.f32.mrb[1].mxu1 }
  0xef   : > { %v521_v19 = vadd.f32 %v773_v17, %v757_v16  ;;  %v512_v20 = vpop.f32.mrb[1].mxu0  ;;  %v758_v21 = vpop.f32.mrb[2].mxu1 }
  0xf0   : > { %v513_v22 = vadd.f32 %v512_v20, %v391_v18  ;;  %v774_v23 = vpop.f32.mrb[2].mxu0  ;;  %v394_v24 = vpop.f32.mrb[3].mxu1 }
  0xf1   : > { %v524_v25 = vadd.f32 %v774_v23, %v758_v21  ;;  %v515_v26 = vpop.f32.mrb[3].mxu0 }
  0xf2   : > { %v516_v27 = vadd.f32 %v515_v26, %v394_v24 }
  0xf4   : > { %548 = sbr.rel (!%p544_p8) target bundleno = 251 (0xfb), region = 40 }
  0xf5   : > { %v761_v28 = vpop.f32.mrb[4].mxu1 }
  0xf6   : > { %v777_v29 = vpop.f32.mrb[4].mxu0  ;;  %v407_v30 = vpop.f32.mrb[5].mxu1 }
  0xf7   : > { %v537_v31 = vadd.f32 %v777_v29, %v761_v28  ;;  %v528_v32 = vpop.f32.mrb[5].mxu0  ;;  %v762_v33 = vpop.f32.mrb[6].mxu1 }
  0xf8   : > { %v529_v34 = vadd.f32 %v528_v32, %v407_v30  ;;  %v778_v35 = vpop.f32.mrb[6].mxu0  ;;  %v410_v36 = vpop.f32.mrb[7].mxu1 }
  0xf9   : > { %v540_v37 = vadd.f32 %v778_v35, %v762_v33  ;;  %v531_v38 = vpop.f32.mrb[7].mxu0 }
  0xfa   : > { %v532_v39 = vadd.f32 %v531_v38, %v410_v36 }
  0xfb PF: > { %v551_v41 = vsel %vm344_vm0, %v513_v22, 0.0  ;;  %v552_v42 = vsel %vm344_vm0, %v516_v27, 0.0  ;;  %v554_v43 = vsel %vm344_vm0, %v521_v19, 0.0  ;;  %v556_v45 = vsel %vm344_vm0, %v524_v25, 0.0  ;;  %v575_v28 = vld [vmem:[%s965_s10 + $0x1] sm:$0x1] }
  0xfc   : > { %v553_v44 = vadd.f32 %v552_v42, %v551_v41  ;;  %v576_v46 = vmul.f32 %v513_v22, %v513_v22  ;;  %v577_v47 = vmul.f32 %v516_v27, %v516_v27  ;;  %v578_v49 = vmul.f32 %v521_v19, %v521_v19  ;;  %v550_v22 = vld [vmem:[%s965_s10] sm:$0x1] }
  0xfd   : > { %v579_v50 = vmul.f32 %v524_v25, %v524_v25  ;;  %v558_v51 = vsel %vm344_vm0, %v529_v34, 0.0  ;;  %v580_v54 = vmul.f32 %v529_v34, %v529_v34  ;;  %v560_v57 = vsel %vm344_vm0, %v532_v39, 0.0 }
  0xfe   : > { %v555_v48 = vadd.f32 %v554_v43, %v553_v44  ;;  %v584_v52 = vsel %vm344_vm0, %v576_v46, 0.0  ;;  %v585_v55 = vsel %vm344_vm0, %v577_v47, 0.0  ;;  %v587_v56 = vsel %vm344_vm0, %v578_v49, 0.0 }
  0xff   : > { %v586_v58 = vadd.f32 %v585_v55, %v584_v52  ;;  %v581_v60 = vmul.f32 %v532_v39, %v532_v39  ;;  %v589_v61 = vsel %vm344_vm0, %v579_v50, 0.0  ;;  %v562_v62 = vsel %vm344_vm0, %v537_v31, 0.0 }
 0x100   : > { %v557_v53 = vadd.f32 %v556_v45, %v555_v48  ;;  %v582_v1 = vmul.f32 %v537_v31, %v537_v31  ;;  %v591_v2 = vsel %vm344_vm0, %v580_v54, 0.0  ;;  %v564_v3 = vsel %vm344_vm0, %v540_v37, 0.0 }
 0x101   : > { %v588_v63 = vadd.f32 %v587_v56, %v586_v58  ;;  %v583_v6 = vmul.f32 %v540_v37, %v540_v37  ;;  %v593_v7 = vsel %vm344_vm0, %v581_v60, 0.0  ;;  %vm573_vm1 = vcmask 516096  }
 0x102   : > { %v559_v59 = vadd.f32 %v558_v51, %v557_v53  ;;  %v595_v10 = vsel %vm344_vm0, %v582_v1, 0.0 }
 0x103   : > { %v590_v4 = vadd.f32 %v589_v61, %v588_v63  ;;  %v597_v13 = vsel %vm344_vm0, %v583_v6, 0.0 }
 0x104   : > { %v561_v0 = vadd.f32 %v560_v57, %v559_v59 }
 0x105   : > { %v592_v8 = vadd.f32 %v591_v2, %v590_v4 }
 0x106   : > { %v563_v5 = vadd.f32 %v562_v62, %v561_v0 }
 0x107   : > { %v594_v11 = vadd.f32 %v593_v7, %v592_v8 }
 0x108   : > { %v565_v9 = vadd.f32 %v564_v3, %v563_v5 }
 0x109   : > { %v596_v14 = vadd.f32 %v595_v10, %v594_v11 }
 0x10a   : > { %v566_v12 = vrot.slane %v565_v9, 4 }
 0x10b   : > { %v598_v16 = vadd.f32 %v597_v13, %v596_v14 }
 0x10c   : > { %v567_v15 = vadd.f32 %v566_v12, %v565_v9 }
 0x10d   : > { %v599_v18 = vrot.slane %v598_v16, 4 }
 0x10e   : > { %v568_v17 = vrot.slane %v567_v15, 2 }
 0x10f   : > { %v600_v20 = vadd.f32 %v599_v18, %v598_v16 }
 0x110   : > { %v569_v19 = vadd.f32 %v568_v17, %v567_v15 }
 0x111   : > { %v601_v23 = vrot.slane %v600_v20, 2 }
 0x112   : > { %v570_v21 = vrot.slane %v569_v19, 1 }
 0x113   : > { %v602_v25 = vadd.f32 %v601_v23, %v600_v20 }
 0x114   : > { %v571_v24 = vadd.f32 %v570_v21, %v569_v19 }
 0x115   : > { %v603_v27 = vrot.slane %v602_v25, 1 }
 0x116   : > { %v572_v26 = vadd.f32 %v571_v24, %v550_v22 }
 0x117   : > { %v604_v29 = vadd.f32 %v603_v27, %v602_v25 }
 0x118   : > { %574 = vst.msk [vmem:[%s965_s10] sm:$0x1] %vm573_vm1, %v572_v26 }
 0x119   : > { %v605_v30 = vadd.f32 %v604_v29, %v575_v28 }
 0x11b   : > { %606 = vst.msk [vmem:[%s965_s10 + $0x1] sm:$0x1] %vm573_vm1, %v605_v30 }
 0x11c PF: > { %s14_s19 = sadd.s32 1, %s882_s19   ;;  %s1037_s15 = smov %s874_s17 }
 0x11d   : > { %p11_p9 = scmp.ge.s32.totalorder %s14_s19, 18   ;;  %s1038_s16 = smov %s878_s18 }
 0x11e   : > { %s1039_s17 = smov %s1042_s20  ;;  %s1040_s18 = smov %s1046_s21 }
 0x11f   :  { %13 = sbr.rel (!%p11_p9) target bundleno = 3 (0x3), region = 73 }

// kernel: _mgm_forward_impl.13
= control target key start
LH: loop header
LB: loop body
LE: loop exit
PB: predicated region body
PF: predicated region fallthrough
CT: control target
= control target key end

     0   :  { %s487_s18 = smov 0   ;;  %s562_s0 = inlined_call_operand.vmem [shape: f32[8,64], index: 0, kind: input, shape index: {}]   ;;  %s563_s1 = inlined_call_operand.vmem [shape: f32[1,64], index: 1, kind: input, shape index: {}]   ;;  %s564_s2 = inlined_call_operand.vmem [shape: f32[1,64], index: 2, kind: input, shape index: {}]   ;;  %s565_s3 = inlined_call_operand.vmem [shape: f32[128,64], index: 3, kind: input, shape index: {}]   ;;  %s566_s4 = inlined_call_operand.vmem [shape: f32[128,64], index: 4, kind: input, shape index: {}]   ;;  %s567_s5 = inlined_call_operand.vmem [shape: f32[128,64], index: 5, kind: output, shape index: {}]  }
   0x1 LB: > { %s424_s19 = sadd.s32 4294967295, %s454_s18   ;;  %p428_p0 = scmp.ge.s32.totalorder %s454_s18, 1  ;;  %s454_s18 = sphi %s487_s18, %s15_s18  }
   0x2   : > { %p199_p1 = scmp.lt.s32.totalorder %s454_s18, 3 }
   0x4   : > { %p200_p2 = pnand %p428_p0, %p199_p1 }
   0x5   : > { %v250_v0 = vld [vmem:[%s562_s0] sm:$0x1] (!%p200_p2)  ;;  %v252_v1 = vld [vmem:[%s562_s0 + $0x1] sm:$0x1] (!%p200_p2)  ;;  %s429_s24 = sshll.u32 (!%p200_p2), %s424_s19, 3  ;;  %v282_v8 = vlaneseq (!%p200_p2)  ;;  %v456_v20 = vmov (!%p200_p2), 0  }
   0x6   : > { %203 = sbr.rel (%p200_p2) target bundleno = 49 (0x31), region = 40  ;;  %v251_v2 = vmul.f32 (!%p200_p2), 0.0011160715, %v250_v0  ;;  %v253_v3 = vmul.f32 (!%p200_p2), 0.0011160715, %v252_v1  ;;  %p233_p3 = scmp.lt.s32.totalorder (!%p200_p2), %s429_s24, 15 }
   0x7   : > { %v283_v9 = vshrl.u32 (!%p200_p2), %v282_v8, 7  ;;  %v257_v10 = vld [vmem:[%s563_s1] sm:$0x1] (!%p200_p2)  ;;  %vm347_vm2 = vcmask (!%p200_p2), 523264  }
   0x8   : > { %v254_v4 = vmul.f32 (!%p200_p2), %v251_v2, %v251_v2  ;;  %v261_v14 = vld [vmem:[%s564_s2] sm:$0x1] (!%p200_p2) }
   0x9   : > { %v284_v13 = vsub.s32 (!%p200_p2), 0, %v283_v9 }
   0xa   : > { %v255_v5 = vsub.f32 (!%p200_p2), %v253_v3, %v254_v4 }
   0xc   : > { %v256_v6 = vmax.f32 (!%p200_p2), %v255_v5, 0.0 }
   0xd   : > { %s571_s24 = smov (!%p233_p3, %s429_s24), 15 }
   0xe   : > { %v258_v7 = vadd.f32 1e-05, %v256_v6  ;;  %s501_s25 = sshll.u32 %s571_s24, 3 }
   0xf   : > { %s236_s30 = scalar_lea.vmem %s565_s3, %s501_s25  ;;  %s242_s8 = scalar_lea.vmem %s566_s4, %s501_s25 }
  0x10   : > { %446 = vrsqrt.f32 %v258_v7  ;;  %v265_v16 = vld [vmem:[%s236_s30] sm:$0xff]  ;;  %v266_v18 = vld [vmem:[%s236_s30 + $0x8] sm:$0xff]  ;;  %v267_v22 = vld [vmem:[%s236_s30 + $0x10] sm:$0xff]  ;;  %s541_s13 = scalar_lea.vmem %s567_s5, %s501_s25 }
  0x11   : > { %v273_v17 = vld [vmem:[%s242_s8] sm:$0xff]  ;;  %v274_v19 = vld [vmem:[%s242_s8 + $0x8] sm:$0xff]  ;;  %v275_v23 = vld [vmem:[%s242_s8 + $0x10] sm:$0xff] }
  0x12   : > { %v268_v24 = vld [vmem:[%s236_s30 + $0x18] sm:$0xff]  ;;  %v269_v29 = vld [vmem:[%s236_s30 + $0x20] sm:$0xff]  ;;  %v270_v31 = vld [vmem:[%s236_s30 + $0x28] sm:$0xff] }
  0x13   : > { %v276_v28 = vld [vmem:[%s242_s8 + $0x18] sm:$0xff]  ;;  %v277_v30 = vld [vmem:[%s242_s8 + $0x20] sm:$0xff]  ;;  %v278_v32 = vld [vmem:[%s242_s8 + $0x28] sm:$0xff] }
  0x14   : > { %v271_v33 = vld [vmem:[%s236_s30 + $0x30] sm:$0xff]  ;;  %v272_v37 = vld [vmem:[%s236_s30 + $0x38] sm:$0xff] }
  0x15   : > { %v279_v36 = vld [vmem:[%s242_s8 + $0x30] sm:$0xff]  ;;  %v280_v38 = vld [vmem:[%s242_s8 + $0x38] sm:$0xff] }
  0x1a   : > { %v447_v11 = vpop.eup %446 }
  0x1b   : > { %v260_v12 = vmul.f32 %v447_v11, %v257_v10 }
  0x1d   : > { %v262_v15 = vmul.f32 %v260_v12, %v251_v2  ;;  %vm264_vm0 = vcmp.gt.f32.partialorder %v260_v12, 0.0  ;;  %v299_v27 = vrot.slane %v260_v12, %v284_v13 }
  0x1e   : > { %v281_v21 = vsel %vm264_vm0, 1, %v456_v20 }
  0x1f   : > { %v263_v25 = vsub.f32 %v261_v14, %v262_v15  ;;  %v285_v26 = vrot.slane %v281_v21, %v284_v13 }
  0x21   : > { %vm517_vm1 = vcmp.eq.s32.totalorder %v285_v26, 1  ;;  %v313_v35 = vrot.slane %v263_v25, %v284_v13 }
  0x22   : > { %v287_v39 = vsel %vm517_vm1, %v265_v16, %v273_v17  ;;  %v288_v40 = vsel %vm517_vm1, %v266_v18, %v274_v19  ;;  %v289_v41 = vsel %vm517_vm1, %v267_v22, %v275_v23  ;;  %v290_v42 = vsel %vm517_vm1, %v268_v24, %v276_v28 }
  0x23   : > { %v301_v43 = vmul.f32 %v299_v27, %v287_v39  ;;  %v302_v44 = vmul.f32 %v299_v27, %v288_v40  ;;  %v303_v45 = vmul.f32 %v299_v27, %v289_v41  ;;  %v304_v46 = vmul.f32 %v299_v27, %v290_v42 }
  0x24   : > { %v291_v47 = vsel %vm517_vm1, %v269_v29, %v277_v30  ;;  %v292_v48 = vsel %vm517_vm1, %v270_v31, %v278_v32  ;;  %v293_v49 = vsel %vm517_vm1, %v271_v33, %v279_v36  ;;  %v294_v50 = vsel %vm517_vm1, %v272_v37, %v280_v38 }
  0x25   : > { %v315_v51 = vadd.f32 %v313_v35, %v301_v43  ;;  %v316_v52 = vadd.f32 %v313_v35, %v302_v44  ;;  %v317_v53 = vadd.f32 %v313_v35, %v303_v45  ;;  %v318_v54 = vadd.f32 %v313_v35, %v304_v46 }
  0x26   : > { %v305_v55 = vmul.f32 %v299_v27, %v291_v47  ;;  %v306_v56 = vmul.f32 %v299_v27, %v292_v48  ;;  %v307_v57 = vmul.f32 %v299_v27, %v293_v49  ;;  %v308_v58 = vmul.f32 %v299_v27, %v294_v50 }
  0x27   : > { %vm323_vm3 = vcmp.gt.f32.partialorder %v315_v51, 0.0  ;;  %v331_v59 = vmul.f32 0.2, %v315_v51  ;;  %vm324_vm4 = vcmp.gt.f32.partialorder %v316_v52, 0.0  ;;  %v332_v60 = vmul.f32 0.2, %v316_v52 }
  0x28   : > { %vm325_vm5 = vcmp.gt.f32.partialorder %v317_v53, 0.0  ;;  %v333_v61 = vmul.f32 0.2, %v317_v53  ;;  %vm326_vm6 = vcmp.gt.f32.partialorder %v318_v54, 0.0  ;;  %v334_v62 = vmul.f32 0.2, %v318_v54 }
  0x29   : > { %v339_v63 = vsel %vm323_vm3, %v315_v51, %v331_v59  ;;  %v340_v0 = vsel %vm324_vm4, %v316_v52, %v332_v60  ;;  %v319_v1 = vadd.f32 %v313_v35, %v305_v55  ;;  %v320_v2 = vadd.f32 %v313_v35, %v306_v56 }
  0x2a   : > { %348 = vst.msk [vmem:[%s541_s13] sm:$0xff] %vm347_vm2, %v339_v63  ;;  %349 = vst.msk [vmem:[%s541_s13 + $0x8] sm:$0xff] %vm347_vm2, %v340_v0  ;;  %v341_v3 = vsel %vm325_vm5, %v317_v53, %v333_v61  ;;  %v342_v4 = vsel %vm326_vm6, %v318_v54, %v334_v62  ;;  %v321_v5 = vadd.f32 %v313_v35, %v307_v57 }
  0x2b   : > { %v322_v6 = vadd.f32 %v313_v35, %v308_v58  ;;  %350 = vst.msk [vmem:[%s541_s13 + $0x10] sm:$0xff] %vm347_vm2, %v341_v3  ;;  %351 = vst.msk [vmem:[%s541_s13 + $0x18] sm:$0xff] %vm347_vm2, %v342_v4  ;;  %vm327_vm7 = vcmp.gt.f32.partialorder %v319_v1, 0.0  ;;  %v335_v7 = vmul.f32 0.2, %v319_v1  ;;  %vm328_vm8 = vcmp.gt.f32.partialorder %v320_v2, 0.0 }
  0x2c   : > { %v336_v8 = vmul.f32 0.2, %v320_v2  ;;  %vm329_vm9 = vcmp.gt.f32.partialorder %v321_v5, 0.0  ;;  %v337_v9 = vmul.f32 0.2, %v321_v5 }
  0x2d   : > { %vm330_vm10 = vcmp.gt.f32.partialorder %v322_v6, 0.0  ;;  %v338_v10 = vmul.f32 0.2, %v322_v6  ;;  %v343_v11 = vsel %vm327_vm7, %v319_v1, %v335_v7 }
  0x2e   : > { %v344_v12 = vsel %vm328_vm8, %v320_v2, %v336_v8  ;;  %352 = vst.msk [vmem:[%s541_s13 + $0x20] sm:$0xff] %vm347_vm2, %v343_v11  ;;  %v345_v13 = vsel %vm329_vm9, %v321_v5, %v337_v9 }
  0x2f   : > { %353 = vst.msk [vmem:[%s541_s13 + $0x28] sm:$0xff] %vm347_vm2, %v344_v12  ;;  %v346_v14 = vsel %vm330_vm10, %v322_v6, %v338_v10  ;;  %354 = vst.msk [vmem:[%s541_s13 + $0x30] sm:$0xff] %vm347_vm2, %v345_v13 }
  0x30   : > { %355 = vst.msk [vmem:[%s541_s13 + $0x38] sm:$0xff] %vm347_vm2, %v346_v14 }
  0x31 PF: > { %s15_s18 = sadd.s32 1, %s454_s18  }
  0x32   : > { %p12_p4 = scmp.ge.s32.totalorder %s15_s18, 4  }
  0x34   :  { %14 = sbr.rel (!%p12_p4) target bundleno = 1 (0x1), region = 73 }

// kernel: _mgm_forward_impl.11
= control target key start
LH: loop header
LB: loop body
LE: loop exit
PB: predicated region body
PF: predicated region fallthrough
CT: control target
= control target key end

     0   :  { %16 = vsyncpa [#allocation3], 0  ;;  %s2178_s0 = inlined_call_operand.vmem [shape: bf16[8,128,64], index: 0, kind: input, shape index: {}]   ;;  %s2179_s1 = inlined_call_operand.vmem [shape: bf16[128,64], index: 1, kind: input, shape index: {}]   ;;  %s2180_s2 = inlined_call_operand.vmem [shape: bf16[64,64], index: 2, kind: input, shape index: {}]   ;;  %s2181_s3 = inlined_call_operand.vmem [shape: bf16[64,64], index: 3, kind: input, shape index: {}]   ;;  %s2182_s4 = inlined_call_operand.vmem [shape: f32[8,64], index: 4, kind: input, shape index: {}]   ;;  %s2183_s5 = inlined_call_operand.vmem [shape: f32[1,64], index: 5, kind: input, shape index: {}]   ;;  %s2184_s6 = inlined_call_operand.vmem [shape: f32[1,64], index: 6, kind: input, shape index: {}]   ;;  %s2185_s7 = inlined_call_operand.vmem [shape: bf16[64,64], index: 7, kind: input, shape index: {}]   ;;  %s2186_s8 = inlined_call_operand.vmem [shape: f32[16,64], index: 8, kind: output, shape index: {0}]   ;;  %s2187_s9 = inlined_call_operand.hbm [shape: f32[128,64], index: 9, kind: output, shape index: {1}]   ;;  %s2188_s10 = inlined_call_operand.hbm [shape: f32[128,64], index: 10, kind: output, shape index: {2}]  }
   0x1   :  { %18 = vsyncpa [#allocation3 + $0x1], 0 }
   0x2   :  { %19 = vsyncpa [#allocation5], 0 }
   0x3   :  { %21 = vsyncpa [#allocation5 + $0x1], 0  ;;  %s1745_s13 = smov 0   ;;  %s1747_s14 = smov 0  }
   0x4   :  { %s1749_s15 = smov 0   ;;  %s1751_s16 = smov 0  }
   0x5   :  { %s1753_s17 = smov 0   ;;  %s1755_s18 = smov 0  }
   0x6   :  { %s1757_s19 = smov 0   ;;  %s1759_s20 = smov 0  }
   0x7 LB: > { %2196 = sst [smem:[#allocation8_spill]] %s1654_s13  ;;  %s1314_s21 = sadd.s32 4294967295, %s1682_s20   ;;  %s1682_s20 = sphi %s1759_s20, %s27_s20   ;;  %s1678_s19 = sphi %s1757_s19, %s2217_s19   ;;  %s1674_s18 = sphi %s1755_s18, %s2216_s18   ;;  %s1670_s17 = sphi %s1753_s17, %s2215_s17   ;;  %s1666_s16 = sphi %s1751_s16, %s2214_s16   ;;  %s1662_s15 = sphi %s1749_s15, %s2213_s15   ;;  %s1658_s14 = sphi %s1747_s14, %s2212_s14   ;;  %s1654_s13 = sphi %s1745_s13, %s2211_s13  }
   0x8   : > { %2197 = sst [smem:[#allocation9_spill]] %s1658_s14  ;;  %s1315_s22 = sadd.s32 4294967294, %s1682_s20  }
   0x9   : > { %2198 = sst [smem:[#allocation10_spill]] %s1662_s15  ;;  %s39_s23 = sadd.s32 1, %s1674_s18 }
   0xa   : > { %2199 = sst [smem:[#allocation11_spill]] %s1674_s18  ;;  %p40_p0 = scmp.ge.s32.totalorder %s39_s23, 8 }
   0xb   : > { %2200 = sst [smem:[#allocation12_spill]] %s1678_s19  ;;  %s46_s24 = sadd.s32 1, %s1678_s19 }
   0xc   : > { %p275_p1 = scmp.ne.s32.totalorder %s1662_s15, %s1658_s14  ;;  %p276_p2 = scmp.eq.s32.totalorder %s1314_s21, 15 }
   0xd   : > { %s2219_s23 = smov (%p40_p0, %s39_s23), 0  ;;  %s2221_s24 = smov (!%p40_p0, %s46_s24), %s1678_s19 }
   0xe   : > { %2201 = sst [smem:[#allocation13_spill]] %s2219_s23  ;;  %p1794_p3 = por %p276_p2, %p275_p1 }
   0xf   : > { %p281_p4 = scmp.ne.s32.totalorder %s1658_s14, %s1654_s13  ;;  %p48_p5 = scmp.ge.s32.totalorder %s2221_s24, 2 }
  0x10   : > { %p282_p6 = scmp.eq.s32.totalorder %s1315_s22, 15  ;;  %p1318_p7 = scmp.ge.s32.totalorder %s1682_s20, 1 }
  0x11   : > { %p372_p8 = scmp.lt.s32.totalorder %s1682_s20, 17  ;;  %s2223_s24 = smov (%p48_p5, %s2221_s24), 0 }
  0x12   : > { %2203 = sst [smem:[#allocation14_spill]] %s2223_s24  ;;  %p1804_p9 = por %p282_p6, %p281_p4 }
  0x13   : > { %p373_p10 = pnand %p1318_p7, %p372_p8  ;;  %s262_s27 = ssub.s32 %s1678_s19, %s2223_s24 }
  0x14   : > { %s2204_s26 = scalar_select %p1804_p9, 1, 0 }
  0x15   : > { %s265_s28 = sadd.s32 1, %s1662_s15  ;;  %p263_p11 = scmp.eq.s32.totalorder %s262_s27, 0  ;;  %v1534_v0 = vld [vmem:[%s2181_s3] sm:$0xff] (!%p373_p10)   ;;  %v1535_v1 = vld [vmem:[%s2181_s3 + $0x8] sm:$0xff] (!%p373_p10)   ;;  %v1536_v2 = vld [vmem:[%s2181_s3 + $0x10] sm:$0xff] (!%p373_p10)   ;;  %vm535_vm0 = vcmask (!%p373_p10), 523264   ;;  %v750_v29 = vlaneseq (!%p373_p10) }
  0x16   : > { %2205 = sst [smem:[#allocation15_spill]] %s2204_s26  ;;  %376 = sbr.rel (%p373_p10) target bundleno = 598 (0x256), region = 52  ;;  %1398 = vmatprep.subr.bf16.mxu0 (!%p373_p10), %v1534_v0  ;;  %v1537_v3 = vld [vmem:[%s2181_s3 + $0x18] sm:$0xff] (!%p373_p10)   ;;  %v1550_v4 = vld [vmem:[%s2185_s7] sm:$0xff] (!%p373_p10)   ;;  %v1541_v9 = vld [vmem:[%s2180_s2 + $0x8] sm:$0xff] (!%p373_p10)  }
  0x17   : > { %s1812_s29 = scalar_select %p263_p11, %s1662_s15, %s265_s28  }
  0x18   : > { %s1815_s30 = sand.u32 (!%p373_p10), 1, %s1658_s14   ;;  %p450_p12 = scmp.lt.s32.totalorder (!%p373_p10), %s1670_s17, 1  ;;  %1399 = vmatpush3.bf16.msra.mxu0 (!%p373_p10), %v1534_v0  ;;  %1430 = vmatprep.subr.bf16.mxu1 (!%p373_p10), %v1550_v4  ;;  %v1540_v6 = vld [vmem:[%s2180_s2] sm:$0xff] (!%p373_p10)   ;;  %v1544_v10 = vld [vmem:[%s2180_s2 + $0x10] sm:$0xff] (!%p373_p10)   ;;  %v1545_v13 = vld [vmem:[%s2180_s2 + $0x18] sm:$0xff] (!%p373_p10)   ;;  %v1881_v31 = vshrl.u32 (!%p373_p10), %v750_v29, 7 }
  0x19   : > { %2206 = sst [smem:[#allocation16_spill]] %s1812_s29  ;;  %s1321_s19 = sshll.u32 (!%p373_p10), %s1670_s17, 3  ;;  %1400 = vmatprep.subr.bf16.mxu0 (!%p373_p10), %v1535_v1  ;;  %1431 = vmatpush3.bf16.msra.mxu1 (!%p373_p10), %v1550_v4  ;;  %v1551_v17 = vld [vmem:[%s2185_s7 + $0x8] sm:$0xff] (!%p373_p10)   ;;  %v1552_v18 = vld [vmem:[%s2185_s7 + $0x10] sm:$0xff] (!%p373_p10)   ;;  %v1553_v19 = vld [vmem:[%s2185_s7 + $0x18] sm:$0xff] (!%p373_p10)  }
  0x1a   : > { %p432_p13 = scmp.lt.s32.totalorder (!%p373_p10), %s1666_s16, 7  ;;  %p434_p0 = scmp.lt.s32.totalorder (!%p373_p10), %s1321_s19, 15  ;;  %1432 = vmatprep.subr.bf16.mxu1 (!%p373_p10), %v1551_v17  ;;  %v734_v20 = vld [vmem:[%s2182_s4] sm:$0xff] (!%p373_p10)  ;;  %v1684_v27 = vmov (!%p373_p10), 1966171168   ;;  %v769_v41 = vsub.s32 (!%p373_p10), 0, %v1881_v31 }
  0x1b   : > { %v737_v21 = vmul.f32 (!%p373_p10), 0.0011160715, %v734_v20  ;;  %v748_v28 = vunpack.c.l.s4 (!%p373_p10), %v1684_v27  ;;  %v735_v37 = vld [vmem:[%s2183_s5] sm:$0x1] (!%p373_p10)  ;;  %p984_p1 = scmp.eq.s32.totalorder (!%p373_p10), %s1666_s16, 0  ;;  %v936_v27 = vadd.s32 (!%p373_p10), 24, %v1881_v31 }
  0x1c   : > { %1401 = vmatpush3.bf16.msra.mxu0 (!%p373_p10), %v1535_v1  ;;  %v736_v40 = vld [vmem:[%s2184_s6] sm:$0x1] (!%p373_p10)  ;;  %s2207_s24 = sshll.u32 (!%p373_p10), %s1815_s30, 6 }
  0x1d   : > { %s451_s28 = scalar_select %p450_p12, %s1670_s17, 1  ;;  %1402 = vmatprep.subr.bf16.mxu0 %v1536_v2  ;;  %1433 = vmatpush3.bf16.msra.mxu1 %v1551_v17  ;;  %v738_v22 = vmul.f32 %v737_v21, %v737_v21  ;;  %v749_v30 = vunpack.c.0.s8 %v748_v28  ;;  %v934_v28 = vadd.s32 8, %v1881_v31 }
  0x1e   : > { %s433_s21 = scalar_select %p432_p13, %s1666_s16, 7  ;;  %1434 = vmatprep.subr.bf16.mxu1 %v1552_v18 }
  0x1f   : > { %s1326_s18 = sshll.u32 %s451_s28, 3  ;;  %s2225_s19 = smov (!%p434_p0, %s1321_s19), 15  ;;  %v740_v23 = vrot.slane %v738_v22, 7  ;;  %v752_v32 = vsub.s32 %v749_v30, %v1881_v31 }
  0x20   : > { %s1834_s12 = scalar_lea.vmem %s2186_s8, %s1326_s18  ;;  %s1322_s23 = sshll.u32 %s433_s21, 4  ;;  %1403 = vmatpush3.bf16.msra.mxu0 %v1536_v2 }
  0x21   : > { %s437_s28 = sadd.s32 %s1322_s23, %s2225_s19  ;;  %s1325_s14 = sshll.u32 %s2225_s19, 2  ;;  %1404 = vmatprep.subr.bf16.mxu0 %v1537_v3  ;;  %1435 = vmatpush3.bf16.msra.mxu1 %v1552_v18  ;;  %v742_v24 = vsub.f32 %v737_v21, %v740_v23 }
  0x22   : > { %s447_s18 = scalar_lea.vmem %s2179_s1, %s1325_s14  ;;  %s1323_s29 = sshll.u32 %s437_s28, 2  ;;  %1436 = vmatprep.subr.bf16.mxu1 %v1553_v19 }
  0x23   : > { %v1538_v5 = vld [vmem:[%s447_s18] sm:$0xff]   ;;  %s439_s19 = scalar_lea.vmem %s2178_s0, %s1323_s29  ;;  %v1539_v7 = vld [vmem:[%s447_s18 + $0x8] sm:$0xff]   ;;  %v1542_v8 = vld [vmem:[%s447_s18 + $0x10] sm:$0xff]   ;;  %v743_v25 = vmax.f32 %v742_v24, 0.0  ;;  %s1359_s23 = sshll.u32 %s1670_s17, 6 }
  0x24   : > { %1406 = vmatprep.mubr.msk.bf16.mxu0 %vm535_vm0, %v1538_v5  ;;  %1405 = vmatpush3.bf16.msra.mxu0 %v1537_v3  ;;  %v1543_v11 = vld [vmem:[%s447_s18 + $0x18] sm:$0xff]   ;;  %v1546_v12 = vld [vmem:[%s439_s19] sm:$0xff]   ;;  %v1547_v14 = vld [vmem:[%s439_s19 + $0x8] sm:$0xff]   ;;  %s1931_s28 = scalar_lea.vmem [#allocation2], %s2207_s24  ;;  %s2208_s18 = smov %s2207_s24 }
  0x25   : > { %1414 = vmatprep.subr.bf16.mxu0 %v1540_v6  ;;  %v1548_v15 = vld [vmem:[%s439_s19 + $0x10] sm:$0xff]   ;;  %v1549_v16 = vld [vmem:[%s439_s19 + $0x18] sm:$0xff]   ;;  %1437 = vmatpush3.bf16.msra.mxu1 %v1553_v19  ;;  %v744_v26 = vadd.f32 1e-05, %v743_v25  ;;  %v935_v25 = vadd.s32 16, %v1881_v31  ;;  %s1935_s29 = scalar_lea.vmem [#allocation4], %s2208_s18 }
  0x27   : > { %1407 = vmatmul.mubr.msk.bf16.vlgmr.msra.gmra.mrb[0].mxu0 %vm535_vm0, %v1539_v7  ;;  %1554 = vrsqrt.f32 %v744_v26  ;;  %v942_v26 = vstv %s1359_s23 }
  0x28   : > { %1415 = vmatpush3.bf16.msra.mxu0 %v1540_v6  ;;  %1410 = vmatprep.mubr.msk.bf16.mxu0 %vm535_vm0, %v1542_v8  ;;  %v945_v29 = vadd.s32 %v942_v26, %v935_v25  ;;  %v943_v30 = vadd.s32 %v942_v26, %v1881_v31 }
  0x29   : > { %1416 = vmatprep.subr.bf16.mxu0 %v1541_v9 }
  0x2a   : > { %vm953_vm9 = vcmp.lt.s32.totalorder %v945_v29, 112  ;;  %vm951_vm10 = vcmp.lt.s32.totalorder %v943_v30, 112 }
  0x2c   : > { %1417 = vmatpush3.bf16.msra.mxu0 %v1541_v9 }
  0x2d   : > { %1418 = vmatprep.subr.bf16.mxu0 %v1544_v10 }
  0x2f   : > { %1411 = vmatmul.mubr.msk.bf16.gmra.mrb[4].mxu0 %vm535_vm0, %v1543_v11 }
  0x30   : > { %1419 = vmatpush3.bf16.msra.mxu0 %v1544_v10  ;;  %1422 = vmatprep.mubr.msk.bf16.mxu0 %vm535_vm0, %v1546_v12 }
  0x31   : > { %1420 = vmatprep.subr.bf16.mxu0 %v1545_v13  ;;  %v1555_v33 = vpop.eup %1554 }
  0x32   : > { %v753_v34 = vrot.slane %v1555_v33, %v752_v32  ;;  %v944_v33 = vadd.s32 %v942_v26, %v934_v28 }
  0x34   : > { %1421 = vmatpush3.bf16.msra.mxu0 %v1545_v13  ;;  %v754_v35 = vcombine.high %v753_v34, %v753_v34  ;;  %v939_v34 = vadd.s32 48, %v1881_v31  ;;  %vm952_vm12 = vcmp.lt.s32.totalorder %v944_v33, 112 }
  0x36   : > { %v761_v36 = vrot.slane %v754_v35, %v752_v32  ;;  %v946_v32 = vadd.s32 %v942_v26, %v936_v27  ;;  %v937_v35 = vadd.s32 32, %v1881_v31 }
  0x37   : > { %1423 = vmatmul.mubr.msk.bf16.vlgmr.msra.gmra.mrb[0].mxu0 %vm535_vm0, %v1547_v14 }
  0x38   : > { %1426 = vmatprep.mubr.msk.bf16.mxu0 %vm535_vm0, %v1548_v15  ;;  %v763_v38 = vmul.f32 %v761_v36, %v735_v37  ;;  %vm954_vm11 = vcmp.lt.s32.totalorder %v946_v32, 112  ;;  %v940_v37 = vadd.s32 56, %v1881_v31 }
  0x3a   : > { %v764_v39 = vmul.f32 %v763_v38, %v737_v21  ;;  %v770_v43 = vrot.slane %v763_v38, %v769_v41 }
  0x3c   : > { %v765_v42 = vsub.f32 %v736_v40, %v764_v39  ;;  %v938_v40 = vadd.s32 40, %v1881_v31 }
  0x3e   : > { %v784_v44 = vrot.slane %v765_v42, %v769_v41 }
  0x3f   : > { %1427 = vmatmul.mubr.msk.bf16.gmra.mrb[4].mxu0 %vm535_vm0, %v1549_v16 }
 0x10a   : > { %v1424_v45 = vpop.f32.mrb[0].mxu0 }
 0x10b   : > { %v774_v46 = vmul.f32 %v1424_v45, %v770_v43  ;;  %v703_v47 = vpop.f32.mrb[1].mxu0 }
 0x10c   : > { %v772_v48 = vmul.f32 %v770_v43, %v703_v47  ;;  %v1425_v49 = vpop.f32.mrb[2].mxu0 }
 0x10d   : > { %v788_v50 = vadd.f32 %v784_v44, %v774_v46  ;;  %v775_v51 = vmul.f32 %v1425_v49, %v770_v43  ;;  %v706_v52 = vpop.f32.mrb[3].mxu0  ;;  %v947_v46 = vadd.s32 %v942_v26, %v937_v35  ;;  %v948_v49 = vadd.s32 %v942_v26, %v938_v40 }
 0x10e   : > { %v786_v53 = vadd.f32 %v784_v44, %v772_v48  ;;  %v773_v54 = vmul.f32 %v770_v43, %v706_v52  ;;  %v950_v48 = vadd.s32 %v942_v26, %v940_v37 }
 0x10f   : > { %v804_v55 = vmul.f32 0.2, %v788_v50  ;;  %v789_v56 = vadd.f32 %v784_v44, %v775_v51  ;;  %vm796_vm1 = vcmp.gt.f32.partialorder %v788_v50, 0.0  ;;  %vm955_vm14 = vcmp.lt.s32.totalorder %v947_v46, 112 }
 0x110   : > { %v787_v57 = vadd.f32 %v784_v44, %v773_v54  ;;  %v802_v58 = vmul.f32 0.2, %v786_v53  ;;  %vm794_vm3 = vcmp.gt.f32.partialorder %v786_v53, 0.0  ;;  %vm958_vm15 = vcmp.lt.s32.totalorder %v950_v48, 112 }
 0x111   : > { %vm797_vm2 = vcmp.gt.f32.partialorder %v789_v56, 0.0  ;;  %v805_v59 = vmul.f32 0.2, %v789_v56  ;;  %v812_v62 = vsel %vm796_vm1, %v788_v50, %v804_v55  ;;  %vm956_vm1 = vcmp.lt.s32.totalorder %v948_v49, 112 }
 0x112   : > { %v1428_v60 = vpop.f32.mrb[4].mxu0  ;;  %vm795_vm4 = vcmp.gt.f32.partialorder %v787_v57, 0.0  ;;  %v803_v61 = vmul.f32 0.2, %v787_v57  ;;  %v810_v4 = vsel %vm794_vm3, %v786_v53, %v802_v58 }
 0x113   : > { %v813_v63 = vsel %vm797_vm2, %v789_v56, %v805_v59  ;;  %v778_v0 = vmul.f32 %v1428_v60, %v770_v43  ;;  %v719_v1 = vpop.f32.mrb[5].mxu0 }
 0x114   : > { %v776_v2 = vmul.f32 %v770_v43, %v719_v1  ;;  %v1429_v3 = vpop.f32.mrb[6].mxu0  ;;  %v811_v5 = vsel %vm795_vm4, %v787_v57, %v803_v61  ;;  %v819_v6 = vpack.c.bf16 %v813_v63, %v812_v62  ;;  %v1685_v57 = vmov (%p984_p1), 0.0  }
 0x115   : > { %v792_v7 = vadd.f32 %v784_v44, %v778_v0  ;;  %v779_v8 = vmul.f32 %v1429_v3, %v770_v43  ;;  %v722_v9 = vpop.f32.mrb[7].mxu0  ;;  %v818_v10 = vpack.c.bf16 %v811_v5, %v810_v4  ;;  %989 = vst.msk [vmem:[%s1834_s12] sm:$0xff] (%p984_p1), %vm535_vm0, %v1685_v57 }
 0x116   : > { %v790_v11 = vadd.f32 %v784_v44, %v776_v2  ;;  %v777_v12 = vmul.f32 %v770_v43, %v722_v9  ;;  %v949_v43 = vadd.s32 %v942_v26, %v939_v34 }
 0x117   : > { %v808_v13 = vmul.f32 0.2, %v792_v7  ;;  %v793_v14 = vadd.f32 %v784_v44, %v779_v8  ;;  %1438 = vmatprep.mubr.msk.bf16.mxu1 %vm535_vm0, %v818_v10  ;;  %vm800_vm5 = vcmp.gt.f32.partialorder %v792_v7, 0.0 }
 0x118   : > { %v806_v15 = vmul.f32 0.2, %v790_v11  ;;  %v791_v16 = vadd.f32 %v784_v44, %v777_v12  ;;  %1439 = vmatmul.mubr.msk.bf16.vlgmr.msra.gmra.mrb[0].mxu1 %vm535_vm0, %v819_v6  ;;  %vm798_vm6 = vcmp.gt.f32.partialorder %v790_v11, 0.0  ;;  %vm957_vm13 = vcmp.lt.s32.totalorder %v949_v43, 112 }
 0x119   : > { %vm801_vm7 = vcmp.gt.f32.partialorder %v793_v14, 0.0  ;;  %v809_v17 = vmul.f32 0.2, %v793_v14  ;;  %v816_v19 = vsel %vm800_vm5, %v792_v7, %v808_v13 }
 0x11a   : > { %vm799_vm8 = vcmp.gt.f32.partialorder %v791_v16, 0.0  ;;  %v807_v18 = vmul.f32 0.2, %v791_v16  ;;  %v814_v21 = vsel %vm798_vm6, %v790_v11, %v806_v15 }
 0x11b   : > { %v817_v20 = vsel %vm801_vm7, %v793_v14, %v809_v17 }
 0x11c   : > { %v815_v22 = vsel %vm799_vm8, %v791_v16, %v807_v18  ;;  %v821_v23 = vpack.c.bf16 %v817_v20, %v816_v19 }
 0x11d   : > { %v820_v24 = vpack.c.bf16 %v815_v22, %v814_v21 }
 0x11f   : > { %1442 = vmatprep.mubr.msk.bf16.mxu1 %vm535_vm0, %v820_v24 }
 0x120   : > { %1443 = vmatmul.mubr.msk.bf16.gmra.mrb[4].mxu1 %vm535_vm0, %v821_v23 }
 0x1eb   : > { %v1903_v36 = vpop.f32.mrb[0].mxu1 }
 0x1ec   : > { %v977_v38 = vsel %vm953_vm9, %v1903_v36, 0.0  ;;  %v1907_v39 = vpop.f32.mrb[1].mxu1 }
 0x1ed   : > { %v975_v41 = vsel %vm951_vm10, %v1907_v39, 0.0  ;;  %v1911_v42 = vpop.f32.mrb[2].mxu1 }
 0x1ee   : > { %v978_v44 = vsel %vm954_vm11, %v1911_v42, 0.0  ;;  %v1914_v45 = vpop.f32.mrb[3].mxu1 }
 0x1ef   : > { %v976_v47 = vsel %vm952_vm12, %v1914_v45, 0.0 }
 0x1f1   : > { %988 = sbr.rel (!%p984_p1) target bundleno = 504 (0x1f8), region = 56 }
 0x1f3   : > { %v1917_v50 = vpop.f32.mrb[4].mxu1 }
 0x1f4   : > { %v981_v31 = vsel %vm957_vm13, %v1917_v50, 0.0  ;;  %v1920_v51 = vpop.f32.mrb[5].mxu1 }
 0x1f5   : > { %v979_v52 = vsel %vm955_vm14, %v1920_v51, 0.0  ;;  %v1923_v53 = vpop.f32.mrb[6].mxu1 }
 0x1f6   : > { %v982_v54 = vsel %vm958_vm15, %v1923_v53, 0.0  ;;  %v1926_v55 = vpop.f32.mrb[7].mxu1 }
 0x1f7   : > { %v980_v56 = vsel %vm956_vm1, %v1926_v55, 0.0 }
 0x1f8 PF: > { %v991_v58 = vsel %vm535_vm0, %v975_v41, 0.0  ;;  %v992_v59 = vsel %vm535_vm0, %v976_v47, 0.0  ;;  %v994_v60 = vsel %vm535_vm0, %v977_v38, 0.0  ;;  %v996_v62 = vsel %vm535_vm0, %v978_v44, 0.0  ;;  %v990_v43 = vld [vmem:[%s1834_s12] sm:$0x1] }
 0x1f9   : > { %v993_v61 = vadd.f32 %v992_v59, %v991_v58  ;;  %v1016_v63 = vmul.f32 %v975_v41, %v975_v41  ;;  %v1017_v0 = vmul.f32 %v976_v47, %v976_v47  ;;  %v1018_v2 = vmul.f32 %v977_v38, %v977_v38  ;;  %p1361_p2 = scmp.ne.s32.totalorder %s1666_s16, 0 }
 0x1fa   : > { %v1019_v3 = vmul.f32 %v978_v44, %v978_v44  ;;  %v998_v4 = vsel %vm535_vm0, %v979_v52, 0.0  ;;  %v1020_v7 = vmul.f32 %v979_v52, %v979_v52  ;;  %v1000_v10 = vsel %vm535_vm0, %v980_v56, 0.0  ;;  %1050 = vst.msk [vmem:[%s1931_s28] sm:$0xff] (!%p1361_p2), %vm535_vm0, %v1907_v39  ;;  %1051 = vst.msk [vmem:[%s1931_s28 + $0x8] sm:$0xff] (!%p1361_p2), %vm535_vm0, %v1914_v45 }
 0x1fb   : > { %v995_v1 = vadd.f32 %v994_v60, %v993_v61  ;;  %v1024_v5 = vsel %vm535_vm0, %v1016_v63, 0.0  ;;  %v1025_v8 = vsel %vm535_vm0, %v1017_v0, 0.0  ;;  %v1027_v9 = vsel %vm535_vm0, %v1018_v2, 0.0  ;;  %1052 = vst.msk [vmem:[%s1931_s28 + $0x10] sm:$0xff] (!%p1361_p2), %vm535_vm0, %v1903_v36  ;;  %1053 = vst.msk [vmem:[%s1931_s28 + $0x18] sm:$0xff] (!%p1361_p2), %vm535_vm0, %v1911_v42 }
 0x1fc   : > { %v1026_v11 = vadd.f32 %v1025_v8, %v1024_v5  ;;  %v1021_v13 = vmul.f32 %v980_v56, %v980_v56  ;;  %v1029_v14 = vsel %vm535_vm0, %v1019_v3, 0.0  ;;  %v1002_v15 = vsel %vm535_vm0, %v981_v31, 0.0  ;;  %1054 = vst.msk [vmem:[%s1931_s28 + $0x20] sm:$0xff] (!%p1361_p2), %vm535_vm0, %v1920_v51  ;;  %1055 = vst.msk [vmem:[%s1931_s28 + $0x28] sm:$0xff] (!%p1361_p2), %vm535_vm0, %v1926_v55 }
 0x1fd   : > { %v997_v6 = vadd.f32 %v996_v62, %v995_v1  ;;  %v1022_v18 = vmul.f32 %v981_v31, %v981_v31  ;;  %v1031_v19 = vsel %vm535_vm0, %v1020_v7, 0.0  ;;  %v1004_v20 = vsel %vm535_vm0, %v982_v54, 0.0  ;;  %v1015_v31 = vld [vmem:[%s1834_s12 + $0x1] sm:$0x1]  ;;  %1056 = vst.msk [vmem:[%s1931_s28 + $0x30] sm:$0xff] (!%p1361_p2), %vm535_vm0, %v1917_v50  ;;  %1057 = vst.msk [vmem:[%s1931_s28 + $0x38] sm:$0xff] (!%p1361_p2), %vm535_vm0, %v1923_v53 }
 0x1fe   : > { %v1028_v16 = vadd.f32 %v1027_v9, %v1026_v11  ;;  %v1023_v23 = vmul.f32 %v982_v54, %v982_v54  ;;  %v1033_v24 = vsel %vm535_vm0, %v1021_v13, 0.0  ;;  %vm1013_vm2 = vcmask 516096   ;;  %1058 = vst.msk [vmem:[%s1935_s29] sm:$0xff] (!%p1361_p2), %vm535_vm0, %v1907_v39  ;;  %1059 = vst.msk [vmem:[%s1935_s29 + $0x8] sm:$0xff] (!%p1361_p2), %vm535_vm0, %v1914_v45 }
 0x1ff   : > { %v999_v12 = vadd.f32 %v998_v4, %v997_v6  ;;  %v1035_v27 = vsel %vm535_vm0, %v1022_v18, 0.0  ;;  %1060 = vst.msk [vmem:[%s1935_s29 + $0x10] sm:$0xff] (!%p1361_p2), %vm535_vm0, %v1903_v36  ;;  %1061 = vst.msk [vmem:[%s1935_s29 + $0x18] sm:$0xff] (!%p1361_p2), %vm535_vm0, %v1911_v42 }
 0x200   : > { %v1030_v21 = vadd.f32 %v1029_v14, %v1028_v16  ;;  %v1037_v30 = vsel %vm535_vm0, %v1023_v23, 0.0  ;;  %1062 = vst.msk [vmem:[%s1935_s29 + $0x20] sm:$0xff] (!%p1361_p2), %vm535_vm0, %v1920_v51  ;;  %1063 = vst.msk [vmem:[%s1935_s29 + $0x28] sm:$0xff] (!%p1361_p2), %vm535_vm0, %v1926_v55 }
 0x201   : > { %v1001_v17 = vadd.f32 %v1000_v10, %v999_v12  ;;  %1064 = vst.msk [vmem:[%s1935_s29 + $0x30] sm:$0xff] (!%p1361_p2), %vm535_vm0, %v1917_v50  ;;  %1065 = vst.msk [vmem:[%s1935_s29 + $0x38] sm:$0xff] (!%p1361_p2), %vm535_vm0, %v1923_v53 }
 0x202   : > { %v1032_v25 = vadd.f32 %v1031_v19, %v1030_v21 }
 0x203   : > { %v1003_v22 = vadd.f32 %v1002_v15, %v1001_v17 }
 0x204   : > { %v1034_v28 = vadd.f32 %v1033_v24, %v1032_v25 }
 0x205   : > { %v1005_v26 = vadd.f32 %v1004_v20, %v1003_v22 }
 0x206   : > { %v1036_v32 = vadd.f32 %v1035_v27, %v1034_v28 }
 0x207   : > { %v1006_v29 = vrot.slane %v1005_v26, 4 }
 0x208   : > { %v1038_v34 = vadd.f32 %v1037_v30, %v1036_v32 }
 0x209   : > { %v1007_v33 = vadd.f32 %v1006_v29, %v1005_v26 }
 0x20a   : > { %v1039_v37 = vrot.slane %v1038_v34, 4 }
 0x20b   : > { %v1008_v35 = vrot.slane %v1007_v33, 2 }
 0x20c   : > { %v1040_v40 = vadd.f32 %v1039_v37, %v1038_v34 }
 0x20d   : > { %v1009_v38 = vadd.f32 %v1008_v35, %v1007_v33 }
 0x20e   : > { %v1041_v44 = vrot.slane %v1040_v40, 2 }
 0x20f   : > { %v1010_v41 = vrot.slane %v1009_v38, 1 }
 0x210   : > { %v1042_v47 = vadd.f32 %v1041_v44, %v1040_v40 }
 0x211   : > { %v1011_v46 = vadd.f32 %v1010_v41, %v1009_v38 }
 0x212   : > { %v1043_v49 = vrot.slane %v1042_v47, 1  ;;  %1049 = sbr.rel (%p1361_p2) target bundleno = 537 (0x219), region = 60 }
 0x213   : > { %v1012_v48 = vadd.f32 %v1011_v46, %v990_v43 }
 0x214   : > { %v1044_v52 = vadd.f32 %v1043_v49, %v1042_v47 }
 0x215   : > { %1014 = vst.msk [vmem:[%s1834_s12] sm:$0x1] %vm1013_vm2, %v1012_v48 }
 0x216   : > { %v1045_v54 = vadd.f32 %v1044_v52, %v1015_v31 }
 0x218   : > { %1046 = vst.msk [vmem:[%s1834_s12 + $0x1] sm:$0x1] %vm1013_vm2, %v1045_v54 }
 0x219 PF: > { %p1362_p4 = scmp.le.s32.totalorder %s1666_s16, 0 }
 0x21a   : > { %v1070_v56 = vld [vmem:[%s1931_s28] sm:$0xff] (!%p1362_p4)  ;;  %v1071_v57 = vld [vmem:[%s1931_s28 + $0x8] sm:$0xff] (!%p1362_p4)  ;;  %v1072_v58 = vld [vmem:[%s1931_s28 + $0x10] sm:$0xff] (!%p1362_p4) }
 0x21b   : > { %1069 = sbr.rel (%p1362_p4) target bundleno = 549 (0x225), region = 64  ;;  %v1078_v59 = vmax.f32 (!%p1362_p4), %v1070_v56, %v1907_v39  ;;  %v1079_v60 = vmax.f32 (!%p1362_p4), %v1071_v57, %v1914_v45  ;;  %v1080_v61 = vmax.f32 (!%p1362_p4), %v1072_v58, %v1903_v36  ;;  %v1073_v62 = vld [vmem:[%s1931_s28 + $0x18] sm:$0xff] (!%p1362_p4)  ;;  %v1074_v63 = vld [vmem:[%s1931_s28 + $0x20] sm:$0xff] (!%p1362_p4)  ;;  %v1075_v0 = vld [vmem:[%s1931_s28 + $0x28] sm:$0xff] (!%p1362_p4) }
 0x21c   : > { %v1081_v1 = vmax.f32 (!%p1362_p4), %v1073_v62, %v1911_v42  ;;  %v1082_v2 = vmax.f32 (!%p1362_p4), %v1074_v63, %v1920_v51  ;;  %v1083_v3 = vmax.f32 (!%p1362_p4), %v1075_v0, %v1926_v55  ;;  %v1076_v4 = vld [vmem:[%s1931_s28 + $0x30] sm:$0xff] (!%p1362_p4)  ;;  %v1077_v5 = vld [vmem:[%s1931_s28 + $0x38] sm:$0xff] (!%p1362_p4)  ;;  %v1094_v6 = vld [vmem:[%s1935_s29] sm:$0xff] (!%p1362_p4) }
 0x21d   : > { %1086 = vst.msk [vmem:[%s1931_s28] sm:$0xff] (!%p1362_p4), %vm535_vm0, %v1078_v59  ;;  %1087 = vst.msk [vmem:[%s1931_s28 + $0x8] sm:$0xff] (!%p1362_p4), %vm535_vm0, %v1079_v60  ;;  %v1084_v7 = vmax.f32 (!%p1362_p4), %v1076_v4, %v1917_v50  ;;  %v1085_v8 = vmax.f32 (!%p1362_p4), %v1077_v5, %v1923_v53  ;;  %v1102_v9 = vmin.f32 (!%p1362_p4), %v1094_v6, %v1907_v39  ;;  %v1095_v10 = vld [vmem:[%s1935_s29 + $0x8] sm:$0xff] (!%p1362_p4)  ;;  %v1096_v11 = vld [vmem:[%s1935_s29 + $0x10] sm:$0xff] (!%p1362_p4) }
 0x21e   : > { %1088 = vst.msk [vmem:[%s1931_s28 + $0x10] sm:$0xff] (!%p1362_p4), %vm535_vm0, %v1080_v61  ;;  %v1097_v12 = vld [vmem:[%s1935_s29 + $0x18] sm:$0xff] (!%p1362_p4)  ;;  %1089 = vst.msk [vmem:[%s1931_s28 + $0x18] sm:$0xff] (!%p1362_p4), %vm535_vm0, %v1081_v1  ;;  %v1103_v13 = vmin.f32 (!%p1362_p4), %v1095_v10, %v1914_v45  ;;  %v1104_v14 = vmin.f32 (!%p1362_p4), %v1096_v11, %v1903_v36  ;;  %v1098_v15 = vld [vmem:[%s1935_s29 + $0x20] sm:$0xff] (!%p1362_p4) }
 0x21f   : > { %1090 = vst.msk [vmem:[%s1931_s28 + $0x20] sm:$0xff] (!%p1362_p4), %vm535_vm0, %v1082_v2  ;;  %1091 = vst.msk [vmem:[%s1931_s28 + $0x28] sm:$0xff] (!%p1362_p4), %vm535_vm0, %v1083_v3  ;;  %v1105_v39 = vmin.f32 (!%p1362_p4), %v1097_v12, %v1911_v42  ;;  %v1099_v16 = vld [vmem:[%s1935_s29 + $0x28] sm:$0xff] (!%p1362_p4)  ;;  %v1100_v17 = vld [vmem:[%s1935_s29 + $0x30] sm:$0xff] (!%p1362_p4)  ;;  %v1106_v18 = vmin.f32 (!%p1362_p4), %v1098_v15, %v1920_v51 }
 0x220   : > { %1092 = vst.msk [vmem:[%s1931_s28 + $0x30] sm:$0xff] (!%p1362_p4), %vm535_vm0, %v1084_v7  ;;  %1093 = vst.msk [vmem:[%s1931_s28 + $0x38] sm:$0xff] (!%p1362_p4), %vm535_vm0, %v1085_v8  ;;  %v1107_v45 = vmin.f32 (!%p1362_p4), %v1099_v16, %v1926_v55  ;;  %v1108_v36 = vmin.f32 (!%p1362_p4), %v1100_v17, %v1917_v50  ;;  %v1101_v19 = vld [vmem:[%s1935_s29 + $0x38] sm:$0xff] (!%p1362_p4) }
 0x221   : > { %1110 = vst.msk [vmem:[%s1935_s29] sm:$0xff] (!%p1362_p4), %vm535_vm0, %v1102_v9  ;;  %1111 = vst.msk [vmem:[%s1935_s29 + $0x8] sm:$0xff] (!%p1362_p4), %vm535_vm0, %v1103_v13  ;;  %v1109_v42 = vmin.f32 (!%p1362_p4), %v1101_v19, %v1923_v53 }
 0x222   : > { %1112 = vst.msk [vmem:[%s1935_s29 + $0x10] sm:$0xff] %vm535_vm0, %v1104_v14  ;;  %1113 = vst.msk [vmem:[%s1935_s29 + $0x18] sm:$0xff] %vm535_vm0, %v1105_v39 }
 0x223   : > { %1114 = vst.msk [vmem:[%s1935_s29 + $0x20] sm:$0xff] %vm535_vm0, %v1106_v18  ;;  %1115 = vst.msk [vmem:[%s1935_s29 + $0x28] sm:$0xff] %vm535_vm0, %v1107_v45 }
 0x224   : > { %1116 = vst.msk [vmem:[%s1935_s29 + $0x30] sm:$0xff] %vm535_vm0, %v1108_v36  ;;  %1117 = vst.msk [vmem:[%s1935_s29 + $0x38] sm:$0xff] %vm535_vm0, %v1109_v42 }
 0x225 PF: > { %s1372_s16 = sshll.u32 %s1670_s17, 10  ;;  %s1145_s15 = sshll.u32 %s1931_s28, 4  ;;  %s2084_s15 = int_to_ptr.vmem [resolvable:$true] %s1145_s15 }
 0x226   : > { %s2081_s22 = scalar_lea.hbm %s2187_s9, %s1372_s16  ;;  %s1123_s21 = scalar_lea.sflag [#allocation3], %s1815_s30 }
 0x227   : > { %s1556_s19 = scalar_lea.vmem %s2084_s15, 1024  ;;  %s1686_s13 = smov [#allocation2]  }
 0x228   : > { %p1557_p5 = scmp.ne.s32.totalorder %s2084_s15, %s1556_s19  ;;  %s1560_s14 = sshll.u32 %s1686_s13, 4  ;;  %s1561_s14 = int_to_ptr.vmem [resolvable:$false] %s1560_s14 }
 0x229   : > { %s1562_s26 = scalar_lea.vmem %s1561_s14, 2048  ;;  %p1563_p8 = scmp.lt.s32.totalorder %s2084_s15, %s1561_s14 }
 0x22a   : > { %p1558_p6 = pnand %p1557_p5, %p1794_p3  ;;  %p1564_p10 = scmp.lt.s32.totalorder %s1562_s26, %s1556_s19 }
 0x22c   : > { %p1559_p7 = pneg %p1558_p6  ;;  %p1565_p11 = por %p1564_p10, %p1563_p8 }
 0x22e   : > { %p1566_p12 = pnand %p1565_p11, %p1559_p7 }
 0x230   : > { %1569 = shalt.err (!%p1566_p12)
}
 0x231   : > { %s1570_s27 = scalar_lea.hbm %s2081_s22, 1024  ;;  %s1574_s28 = scalar_lea.hbm %s2187_s9, 2048 }
 0x232   : > { %p1571_p13 = scmp.ne.s32.totalorder %s2081_s22, %s1570_s27  ;;  %p1575_p2 = scmp.lt.u32.totalorder %s2081_s22, %s2187_s9 }
 0x233   : > { %p1576_p4 = scmp.lt.u32.totalorder %s1574_s28, %s1570_s27  ;;  %p1578_p6 = scmp.lt.u32.totalorder %s1570_s27, %s2081_s22 }
 0x234   : > { %p1572_p0 = pnand %p1571_p13, %p1794_p3 }
 0x235   : > { %p1577_p5 = por %p1576_p4, %p1575_p2 }
 0x236   : > { %p1573_p1 = pneg %p1572_p0 }
 0x237   : > { %p1579_p7 = por %p1578_p6, %p1577_p5 }
 0x239   : > { %p1580_p8 = pnand %p1579_p7, %p1573_p1 }
 0x23b   : > { %1583 = shalt.err (!%p1580_p8)
}
 0x23c   : > { %s1687_s11 = smov 128   ;;  %s1688_s19 = smov 8  }
 0x23d   : > { %1454 = dma.vmem_to_hbm [thread:$0]  (%p1794_p3), %s2084_s15, 1024, %s2081_s22, %s1123_s21, %s1687_s11, %s1687_s11, %s1688_s19  }
 0x23e   : > { %s2118_s26 = scalar_lea.hbm %s2188_s10, %s1372_s16  ;;  %s1162_s27 = sshll.u32 %s1935_s29, 4  ;;  %s2121_s27 = int_to_ptr.vmem [resolvable:$true] %s1162_s27 }
 0x23f   : > { %s1128_s23 = scalar_lea.sflag [#allocation5], %s1815_s30  ;;  %s1584_s24 = scalar_lea.vmem %s2121_s27, 1024 }
 0x240   : > { %p1585_p10 = scmp.ne.s32.totalorder %s2121_s27, %s1584_s24  ;;  %s1689_s28 = smov [#allocation4]  }
 0x241   : > { %s1588_s22 = sshll.u32 %s1689_s28, 4  ;;  %s1589_s22 = int_to_ptr.vmem [resolvable:$false] %s1588_s22 }
 0x242   : > { %p1586_p11 = pnand %p1585_p10, %p1794_p3  ;;  %s1590_s17 = scalar_lea.vmem %s1589_s22, 2048 }
 0x243   : > { %p1591_p13 = scmp.lt.s32.totalorder %s2121_s27, %s1589_s22  ;;  %p1592_p0 = scmp.lt.s32.totalorder %s1590_s17, %s1584_s24 }
 0x244   : > { %p1587_p12 = pneg %p1586_p11 }
 0x245   : > { %p1593_p1 = por %p1592_p0, %p1591_p13 }
 0x247   : > { %p1594_p2 = pnand %p1593_p1, %p1587_p12 }
 0x249   : > { %1597 = shalt.err (!%p1594_p2)
}
 0x24a   : > { %s1598_s29 = scalar_lea.hbm %s2118_s26, 1024  ;;  %s1602_s21 = scalar_lea.hbm %s2188_s10, 2048 }
 0x24b   : > { %p1599_p4 = scmp.ne.s32.totalorder %s2118_s26, %s1598_s29  ;;  %p1603_p7 = scmp.lt.u32.totalorder %s2118_s26, %s2188_s10 }
 0x24c   : > { %p1604_p8 = scmp.lt.u32.totalorder %s1602_s21, %s1598_s29  ;;  %p1606_p11 = scmp.lt.u32.totalorder %s1598_s29, %s2118_s26 }
 0x24d   : > { %p1600_p5 = pnand %p1599_p4, %p1794_p3 }
 0x24e   : > { %p1605_p10 = por %p1604_p8, %p1603_p7 }
 0x24f   : > { %p1601_p6 = pneg %p1600_p5 }
 0x250   : > { %p1607_p12 = por %p1606_p11, %p1605_p10 }
 0x252   : > { %p1608_p13 = pnand %p1607_p12, %p1601_p6 }
 0x254   : > { %1611 = shalt.err (!%p1608_p13)
}
 0x255   : > { %1455 = dma.vmem_to_hbm [thread:$0]  (%p1794_p3), %s2121_s27, 1024, %s2118_s26, %s1128_s23, %s1687_s11, %s1687_s11, %s1688_s19  }
 0x256 PF: > { %s2209_s13 = sld [smem:[#allocation8_spill]]  ;;  %p1465_p0 = scmp.ge.s32.totalorder %s1682_s20, 2 }
 0x258   : > { %p1459_p1 = pnand %p1465_p0, %p1804_p9 }
 0x25c   : > { %s1184_s24 = sand.u32 1, %s2209_s13  }
 0x25d   : > { %s1185_s28 = scalar_lea.sflag [#allocation3], %s1184_s24 }
 0x25e   : > { %1645 = dma.done.wait (!%p1459_p1), %s1185_s28, 1024  }
 0x25f   : > { %1647 = vsyncadd (!%p1459_p1), %s1185_s28, 4294966272  ;;  %s1194_s25 = scalar_lea.sflag [#allocation5], %s1184_s24 }
 0x260   : > { %1649 = dma.done.wait (!%p1459_p1), %s1194_s25, 1024  }
 0x261   : > { %1651 = vsyncadd (!%p1459_p1), %s1194_s25, 4294966272  ;;  %s27_s20 = sadd.s32 1, %s1682_s20   ;;  %s2211_s13 = sld [smem:[#allocation9_spill]] }
 0x262   : > { %p24_p2 = scmp.ge.s32.totalorder %s27_s20, 18   ;;  %s2212_s14 = sld [smem:[#allocation10_spill]] }
 0x263   : > { %s2213_s15 = sld [smem:[#allocation16_spill]]  ;;  %s2214_s16 = sld [smem:[#allocation11_spill]] }
 0x264   : > { %s2215_s17 = sld [smem:[#allocation12_spill]]  ;;  %s2216_s18 = sld [smem:[#allocation13_spill]] }
 0x265   : > { %s2217_s19 = sld [smem:[#allocation14_spill]]  ;;  %26 = sbr.rel (!%p24_p2) target bundleno = 7 (0x7), region = 131 }
 0x26c   :  { %1199 = vsyncpa [#allocation3], 1 }
 0x26d   :  { %1201 = vsyncpa [#allocation3 + $0x1], 1 }
 0x26e   :  { %1202 = vsyncpa [#allocation5], 1 }
 0x26f   :  { %1204 = vsyncpa [#allocation5 + $0x1], 1 }

// kernel: _mgm_forward_impl.12
= control target key start
LH: loop header
LB: loop body
LE: loop exit
PB: predicated region body
PF: predicated region fallthrough
CT: control target
= control target key end

     0   :  { %s2248_s21 = smov 0   ;;  %s2250_s22 = smov 0   ;;  %s2637_s0 = inlined_call_operand.vmem [shape: bf16[8,128,64], index: 0, kind: input, shape index: {}]   ;;  %s2638_s1 = inlined_call_operand.vmem [shape: bf16[128,64], index: 1, kind: input, shape index: {}]   ;;  %s2639_s2 = inlined_call_operand.vmem [shape: bf16[64,64], index: 2, kind: input, shape index: {}]   ;;  %s2640_s3 = inlined_call_operand.vmem [shape: bf16[64,64], index: 3, kind: input, shape index: {}]   ;;  %s2641_s4 = inlined_call_operand.vmem [shape: f32[8,64], index: 4, kind: input, shape index: {}]   ;;  %s2642_s5 = inlined_call_operand.vmem [shape: f32[1,64], index: 5, kind: input, shape index: {}]   ;;  %s2643_s6 = inlined_call_operand.vmem [shape: f32[1,64], index: 6, kind: input, shape index: {}]   ;;  %s2644_s7 = inlined_call_operand.vmem [shape: bf16[64,64], index: 7, kind: input, shape index: {}]   ;;  %s2645_s8 = inlined_call_operand.vmem [shape: f32[8,64], index: 8, kind: input, shape index: {}]   ;;  %s2646_s9 = inlined_call_operand.vmem [shape: f32[1,64], index: 9, kind: input, shape index: {}]   ;;  %s2647_s10 = inlined_call_operand.vmem [shape: f32[1,64], index: 10, kind: input, shape index: {}]   ;;  %s2648_s11 = inlined_call_operand.vmem [shape: bf16[64,64], index: 11, kind: input, shape index: {}]   ;;  %s2649_s12 = inlined_call_operand.vmem [shape: bf16[64,64], index: 12, kind: input, shape index: {}]   ;;  %s2650_s13 = inlined_call_operand.vmem [shape: bf16[128,64], index: 13, kind: input, shape index: {}]   ;;  %s2651_s14 = inlined_call_operand.vmem [shape: f32[16,64], index: 14, kind: output, shape index: {0}]   ;;  %s2652_s15 = inlined_call_operand.vmem [shape: f32[128,64], index: 15, kind: output, shape index: {1}]   ;;  %s2653_s16 = inlined_call_operand.vmem [shape: f32[128,64], index: 16, kind: output, shape index: {2}]  }
   0x1   :  { %2659 = sst [smem:[#allocation8_spill]] %s2637_s0  ;;  %s2252_s23 = smov 0  }
   0x2   :  { %2660 = sst [smem:[#allocation9_spill]] %s2638_s1  ;;  %s2254_s24 = smov 0  }
   0x3   :  { %2661 = sst [smem:[#allocation10_spill]] %s2640_s3  ;;  %s2256_s25 = smov 0  }
   0x4   :  { %2662 = sst [smem:[#allocation11_spill]] %s2651_s14 }
   0x5 LB: > { %2663 = sst [smem:[#allocation2_spill]] %s2151_s23  ;;  %s39_s26 = sadd.s32 1, %s2151_s23  ;;  %s2159_s25 = sphi %s2256_s25, %s27_s25   ;;  %s2155_s24 = sphi %s2254_s24, %s2680_s24   ;;  %s2151_s23 = sphi %s2252_s23, %s2679_s23   ;;  %s2147_s22 = sphi %s2250_s22, %s2678_s22   ;;  %s2143_s21 = sphi %s2248_s21, %s2677_s21  }
   0x6   : > { %2664 = sst [smem:[#allocation3_spill]] %s2155_s24  ;;  %s46_s27 = sadd.s32 1, %s2155_s24 }
   0x7   : > { %2665 = sst [smem:[#allocation4_spill]] %s2159_s25  ;;  %p40_p0 = scmp.ge.s32.totalorder %s39_s26, 8 }
   0x8   : > { %p1827_p1 = scmp.ge.s32.totalorder %s2159_s25, 1  ;;  %p531_p2 = scmp.lt.s32.totalorder %s2159_s25, 17 }
   0x9   : > { %s2682_s26 = smov (%p40_p0, %s39_s26), 0  ;;  %s2684_s27 = smov (!%p40_p0, %s46_s27), %s2155_s24 }
   0xa   : > { %2666 = sst [smem:[#allocation5_spill]] %s2682_s26  ;;  %p532_p3 = pnand %p1827_p1, %p531_p2 }
   0xb   : > { %p48_p4 = scmp.ge.s32.totalorder %s2684_s27, 2 }
   0xc   : > { %535 = sbr.rel (%p532_p3) target bundleno = 777 (0x309), region = 76 }
   0xd   : > { %s2686_s27 = smov (%p48_p4, %s2684_s27), 0 }
   0xe   : > { %2667 = sst [smem:[#allocation6_spill]] %s2686_s27 }
  0x13   : > { %p637_p5 = scmp.lt.s32.totalorder %s2147_s22, 1  ;;  %s2668_s3 = sld [smem:[#allocation10_spill]]  ;;  %vm734_vm0 = vcmask 523264   ;;  %v2101_v4 = vld [vmem:[%s2644_s7] sm:$0xff]   ;;  %v2092_v9 = vld [vmem:[%s2639_s2 + $0x8] sm:$0xff]   ;;  %v2095_v10 = vld [vmem:[%s2639_s2 + $0x10] sm:$0xff]   ;;  %v949_v31 = vlaneseq }
  0x14   : > { %s1828_s17 = sshll.u32 %s2147_s22, 3  ;;  %s2669_s14 = sld [smem:[#allocation11_spill]]  ;;  %1971 = vmatprep.subr.bf16.mxu1 %v2101_v4  ;;  %v2091_v6 = vld [vmem:[%s2639_s2] sm:$0xff]   ;;  %v2096_v13 = vld [vmem:[%s2639_s2 + $0x18] sm:$0xff]   ;;  %v2102_v17 = vld [vmem:[%s2644_s7 + $0x8] sm:$0xff]  }
  0x15   : > { %s638_s18 = scalar_select %p637_p5, %s2147_s22, 1  ;;  %1972 = vmatpush3.bf16.msra.mxu1 %v2101_v4  ;;  %v2103_v18 = vld [vmem:[%s2644_s7 + $0x10] sm:$0xff]   ;;  %v2104_v19 = vld [vmem:[%s2644_s7 + $0x18] sm:$0xff]   ;;  %v2369_v20 = vld [vmem:[%s2649_s12] sm:$0xff]   ;;  %v2161_v29 = vmov 1966171168  }
  0x16   : > { %p613_p6 = scmp.lt.s32.totalorder %s1828_s17, 15  ;;  %p611_p7 = scmp.lt.s32.totalorder %s2143_s21, 7  ;;  %1973 = vmatprep.subr.bf16.mxu1 %v2102_v17  ;;  %v2375_v21 = vld [vmem:[%s2648_s11] sm:$0xff]   ;;  %v947_v30 = vunpack.c.l.s4 %v2161_v29  ;;  %v2382_v33 = vshrl.u32 %v949_v31, 7 }
  0x17   : > { %s1835_s19 = sshll.u32 %s638_s18, 3  ;;  %s2671_s1 = sld [smem:[#allocation9_spill]]  ;;  %v933_v22 = vld [vmem:[%s2641_s4] sm:$0xff] }
  0x18   : > { %s2688_s17 = smov (!%p613_p6, %s1828_s17), 15  ;;  %v936_v23 = vmul.f32 0.0011160715, %v933_v22  ;;  %v948_v32 = vunpack.c.0.s8 %v947_v30  ;;  %v934_v39 = vld [vmem:[%s2642_s5] sm:$0x1]  ;;  %v2396_v43 = vsub.s32 0, %v2382_v33 }
  0x19   : > { %v2085_v0 = vld [vmem:[%s2668_s3] sm:$0xff]   ;;  %v2086_v1 = vld [vmem:[%s2668_s3 + $0x8] sm:$0xff]   ;;  %v2087_v2 = vld [vmem:[%s2668_s3 + $0x10] sm:$0xff]   ;;  %s612_s0 = scalar_select %p611_p7, %s2143_s21, 7  ;;  %1974 = vmatpush3.bf16.msra.mxu1 %v2102_v17 }
  0x1a   : > { %1939 = vmatprep.subr.bf16.mxu0 %v2085_v0  ;;  %s2297_s28 = scalar_lea.vmem %s2669_s14, %s1835_s19  ;;  %v2088_v3 = vld [vmem:[%s2668_s3 + $0x18] sm:$0xff]   ;;  %s2658_s27 = sshll.u32 %s2688_s17, 2  ;;  %1975 = vmatprep.subr.bf16.mxu1 %v2103_v18  ;;  %v937_v24 = vmul.f32 %v936_v23, %v936_v23  ;;  %v2385_v34 = vsub.s32 %v948_v32, %v2382_v33  ;;  %v935_v42 = vld [vmem:[%s2643_s6] sm:$0x1] }
  0x1b   : > { %1940 = vmatpush3.bf16.msra.mxu0 %v2085_v0  ;;  %2670 = sst [smem:[#allocation7_spill]] %s2297_s28  ;;  %s1837_s18 = sshll.u32 %s2688_s17, 3 }
  0x1c   : > { %1941 = vmatprep.subr.bf16.mxu0 %v2086_v1  ;;  %s2319_s29 = scalar_lea.vmem %s2652_s15, %s1837_s18  ;;  %s2324_s28 = scalar_lea.vmem %s2653_s16, %s1837_s18  ;;  %v939_v25 = vrot.slane %v937_v24, 7  ;;  %v2107_v24 = vld [vmem:[%s2649_s12 + $0x10] sm:$0xff]  }
  0x1d   : > { %s626_s14 = scalar_lea.vmem %s2671_s1, %s2658_s27  ;;  %s1829_s24 = sshll.u32 %s612_s0, 4  ;;  %1976 = vmatpush3.bf16.msra.mxu1 %v2103_v18 }
  0x1e   : > { %v2089_v5 = vld [vmem:[%s626_s14] sm:$0xff]   ;;  %s616_s23 = sadd.s32 %s1829_s24, %s2688_s17  ;;  %v2090_v7 = vld [vmem:[%s626_s14 + $0x8] sm:$0xff]   ;;  %s2672_s18 = sld [smem:[#allocation8_spill]]  ;;  %v2093_v8 = vld [vmem:[%s626_s14 + $0x10] sm:$0xff]   ;;  %1977 = vmatprep.subr.bf16.mxu1 %v2104_v19  ;;  %v941_v26 = vsub.f32 %v936_v23, %v939_v25 }
  0x1f   : > { %1942 = vmatpush3.bf16.msra.mxu0 %v2086_v1  ;;  %1947 = vmatprep.mubr.msk.bf16.mxu0 %vm734_vm0, %v2089_v5  ;;  %s1830_s25 = sshll.u32 %s616_s23, 2  ;;  %v2094_v11 = vld [vmem:[%s626_s14 + $0x18] sm:$0xff]   ;;  %s2673_s24 = sshll.u32 %s2688_s17, 2 }
  0x20   : > { %1943 = vmatprep.subr.bf16.mxu0 %v2087_v2  ;;  %v942_v27 = vmax.f32 %v941_v26, 0.0  ;;  %p1517_p8 = scmp.eq.s32.totalorder %s2143_s21, 0  ;;  %s1892_s26 = sshll.u32 %s2147_s22, 6 }
  0x21   : > { %1978 = vmatpush3.bf16.msra.mxu1 %v2104_v19  ;;  %s2674_s22 = sld [smem:[#allocation7_spill]] (%p1517_p8) }
  0x22   : > { %1987 = vmatprep.subr.bf16.mxu1 %v2369_v20  ;;  %v943_v28 = vadd.f32 1e-05, %v942_v27 }
  0x23   : > { %1944 = vmatpush3.bf16.msra.mxu0 %v2087_v2 }
  0x24   : > { %1945 = vmatprep.subr.bf16.mxu0 %v2088_v3  ;;  %s618_s30 = scalar_lea.vmem %s2672_s18, %s1830_s25  ;;  %s2347_s25 = scalar_lea.vmem %s2650_s13, %s2673_s24  ;;  %2117 = vrsqrt.f32 %v943_v28 }
  0x25   : > { %v2097_v12 = vld [vmem:[%s618_s30] sm:$0xff]   ;;  %v2098_v14 = vld [vmem:[%s618_s30 + $0x8] sm:$0xff]   ;;  %v2099_v15 = vld [vmem:[%s618_s30 + $0x10] sm:$0xff]  }
  0x26   : > { %v2100_v16 = vld [vmem:[%s618_s30 + $0x18] sm:$0xff]   ;;  %v2110_v31 = vld [vmem:[%s2347_s25] sm:$0xff]   ;;  %v2111_v32 = vld [vmem:[%s2347_s25 + $0x8] sm:$0xff]  }
  0x27   : > { %1946 = vmatpush3.bf16.msra.mxu0 %v2088_v3 }
  0x28   : > { %1955 = vmatprep.subr.bf16.mxu0 %v2091_v6 }
  0x2a   : > { %1948 = vmatmul.mubr.msk.bf16.vlgmr.msra.gmra.mrb[0].mxu0 %vm734_vm0, %v2090_v7 }
  0x2b   : > { %1956 = vmatpush3.bf16.msra.mxu0 %v2091_v6  ;;  %1951 = vmatprep.mubr.msk.bf16.mxu0 %vm734_vm0, %v2093_v8 }
  0x2c   : > { %1957 = vmatprep.subr.bf16.mxu0 %v2092_v9 }
  0x2e   : > { %v2118_v35 = vpop.eup %2117 }
  0x2f   : > { %1958 = vmatpush3.bf16.msra.mxu0 %v2092_v9  ;;  %v952_v36 = vrot.slane %v2118_v35, %v2385_v34  ;;  %v2112_v35 = vld [vmem:[%s2648_s11 + $0x8] sm:$0xff]  }
  0x30   : > { %1959 = vmatprep.subr.bf16.mxu0 %v2095_v10 }
  0x31   : > { %v953_v37 = vcombine.high %v952_v36, %v952_v36  ;;  %v2113_v36 = vld [vmem:[%s2648_s11 + $0x10] sm:$0xff]  }
  0x32   : > { %1952 = vmatmul.mubr.msk.bf16.gmra.mrb[4].mxu0 %vm734_vm0, %v2094_v11 }
  0x33   : > { %1960 = vmatpush3.bf16.msra.mxu0 %v2095_v10  ;;  %1963 = vmatprep.mubr.msk.bf16.mxu0 %vm734_vm0, %v2097_v12  ;;  %v960_v38 = vrot.slane %v953_v37, %v2385_v34  ;;  %v2114_v37 = vld [vmem:[%s2347_s25 + $0x10] sm:$0xff]  }
  0x34   : > { %1961 = vmatprep.subr.bf16.mxu0 %v2096_v13 }
  0x35   : > { %v962_v40 = vmul.f32 %v960_v38, %v934_v39  ;;  %v2115_v38 = vld [vmem:[%s2347_s25 + $0x18] sm:$0xff]  }
  0x36   : > { %v2116_v39 = vld [vmem:[%s2648_s11 + $0x18] sm:$0xff]  }
  0x37   : > { %1962 = vmatpush3.bf16.msra.mxu0 %v2096_v13  ;;  %v963_v41 = vmul.f32 %v962_v40, %v936_v23  ;;  %v969_v45 = vrot.slane %v962_v40, %v2396_v43 }
  0x38   : > { %2003 = vmatprep.subr.bf16.mxu0 %v2375_v21 }
  0x39   : > { %v964_v44 = vsub.f32 %v935_v42, %v963_v41 }
  0x3a   : > { %1964 = vmatmul.mubr.msk.bf16.vlgmr.msra.gmra.mrb[0].mxu0 %vm734_vm0, %v2098_v14 }
  0x3b   : > { %1967 = vmatprep.mubr.msk.bf16.mxu0 %vm734_vm0, %v2099_v15  ;;  %2004 = vmatpush3.bf16.msra.mxu0 %v2375_v21  ;;  %v983_v46 = vrot.slane %v964_v44, %v2396_v43  ;;  %v2106_v15 = vld [vmem:[%s2649_s12 + $0x8] sm:$0xff]  }
  0x3c   : > { %2005 = vmatprep.subr.bf16.mxu0 %v2112_v35 }
  0x3f   : > { %2006 = vmatpush3.bf16.msra.mxu0 %v2112_v35 }
  0x40   : > { %2007 = vmatprep.subr.bf16.mxu0 %v2113_v36 }
  0x42   : > { %1968 = vmatmul.mubr.msk.bf16.gmra.mrb[4].mxu0 %vm734_vm0, %v2100_v16 }
  0x43   : > { %2008 = vmatpush3.bf16.msra.mxu0 %v2113_v36 }
  0x44   : > { %2009 = vmatprep.subr.bf16.mxu0 %v2116_v39 }
  0x47   : > { %2010 = vmatpush3.bf16.msra.mxu0 %v2116_v39 }
 0x10d   : > { %v1965_v47 = vpop.f32.mrb[0].mxu0 }
 0x10e   : > { %v973_v48 = vmul.f32 %v1965_v47, %v969_v45  ;;  %v902_v49 = vpop.f32.mrb[1].mxu0 }
 0x10f   : > { %v971_v50 = vmul.f32 %v969_v45, %v902_v49  ;;  %v1966_v51 = vpop.f32.mrb[2].mxu0 }
 0x110   : > { %v987_v52 = vadd.f32 %v983_v46, %v973_v48  ;;  %v974_v53 = vmul.f32 %v1966_v51, %v969_v45  ;;  %v905_v54 = vpop.f32.mrb[3].mxu0  ;;  %v1131_v51 = vld [vmem:[%s2646_s9] sm:$0x1] }
 0x111   : > { %v985_v55 = vadd.f32 %v983_v46, %v971_v50  ;;  %v972_v56 = vmul.f32 %v969_v45, %v905_v54  ;;  %v1132_v54 = vld [vmem:[%s2647_s10] sm:$0x1] }
 0x112   : > { %v1003_v57 = vmul.f32 0.2, %v987_v52  ;;  %v988_v58 = vadd.f32 %v983_v46, %v974_v53  ;;  %vm995_vm1 = vcmp.gt.f32.partialorder %v987_v52, 0.0 }
 0x113   : > { %v986_v59 = vadd.f32 %v983_v46, %v972_v56  ;;  %v1001_v60 = vmul.f32 0.2, %v985_v55  ;;  %vm993_vm3 = vcmp.gt.f32.partialorder %v985_v55, 0.0 }
 0x114   : > { %vm996_vm2 = vcmp.gt.f32.partialorder %v988_v58, 0.0  ;;  %v1004_v61 = vmul.f32 0.2, %v988_v58  ;;  %v1011_v0 = vsel %vm995_vm1, %v987_v52, %v1003_v57 }
 0x115   : > { %v1969_v62 = vpop.f32.mrb[4].mxu0  ;;  %vm994_vm4 = vcmp.gt.f32.partialorder %v986_v59, 0.0  ;;  %v1002_v63 = vmul.f32 0.2, %v986_v59  ;;  %v1009_v6 = vsel %vm993_vm3, %v985_v55, %v1001_v60 }
 0x116   : > { %v1012_v1 = vsel %vm996_vm2, %v988_v58, %v1004_v61  ;;  %v977_v2 = vmul.f32 %v1969_v62, %v969_v45  ;;  %v918_v3 = vpop.f32.mrb[5].mxu0 }
 0x117   : > { %v975_v4 = vmul.f32 %v969_v45, %v918_v3  ;;  %v1970_v5 = vpop.f32.mrb[6].mxu0  ;;  %v1010_v7 = vsel %vm994_vm4, %v986_v59, %v1002_v63  ;;  %v1018_v8 = vpack.c.bf16 %v1012_v1, %v1011_v0 }
 0x118   : > { %v991_v9 = vadd.f32 %v983_v46, %v977_v2  ;;  %v978_v10 = vmul.f32 %v1970_v5, %v969_v45  ;;  %v921_v11 = vpop.f32.mrb[7].mxu0  ;;  %v1017_v12 = vpack.c.bf16 %v1010_v7, %v1009_v6 }
 0x119   : > { %v989_v13 = vadd.f32 %v983_v46, %v975_v4  ;;  %v976_v14 = vmul.f32 %v969_v45, %v921_v11 }
 0x11a   : > { %v1007_v16 = vmul.f32 0.2, %v991_v9  ;;  %v992_v17 = vadd.f32 %v983_v46, %v978_v10  ;;  %1979 = vmatprep.mubr.msk.bf16.mxu1 %vm734_vm0, %v1017_v12  ;;  %vm999_vm5 = vcmp.gt.f32.partialorder %v991_v9, 0.0 }
 0x11b   : > { %v1005_v18 = vmul.f32 0.2, %v989_v13  ;;  %v990_v19 = vadd.f32 %v983_v46, %v976_v14  ;;  %1980 = vmatmul.mubr.msk.bf16.vlgmr.msra.gmra.mrb[0].mxu1 %vm734_vm0, %v1018_v8  ;;  %vm997_vm6 = vcmp.gt.f32.partialorder %v989_v13, 0.0 }
 0x11c   : > { %vm1000_vm7 = vcmp.gt.f32.partialorder %v992_v17, 0.0  ;;  %v1008_v22 = vmul.f32 0.2, %v992_v17  ;;  %1988 = vmatpush3.bf16.msra.mxu1 %v2369_v20  ;;  %v1015_v25 = vsel %vm999_vm5, %v991_v9, %v1007_v16  ;;  %v2108_v20 = vld [vmem:[%s2649_s12 + $0x18] sm:$0xff]  }
 0x11d   : > { %vm998_vm8 = vcmp.gt.f32.partialorder %v990_v19, 0.0  ;;  %v1006_v23 = vmul.f32 0.2, %v990_v19  ;;  %1989 = vmatprep.subr.bf16.mxu1 %v2106_v15  ;;  %v1013_v27 = vsel %vm997_vm6, %v989_v13, %v1005_v18 }
 0x11e   : > { %v1016_v26 = vsel %vm1000_vm7, %v992_v17, %v1008_v22 }
 0x11f   : > { %v1014_v28 = vsel %vm998_vm8, %v990_v19, %v1006_v23  ;;  %v1020_v29 = vpack.c.bf16 %v1016_v26, %v1015_v25 }
 0x120   : > { %v1019_v30 = vpack.c.bf16 %v1014_v28, %v1013_v27  ;;  %1990 = vmatpush3.bf16.msra.mxu1 %v2106_v15 }
 0x121   : > { %1991 = vmatprep.subr.bf16.mxu1 %v2107_v24 }
 0x122   : > { %1983 = vmatprep.mubr.msk.bf16.mxu1 %vm734_vm0, %v1019_v30 }
 0x123   : > { %1984 = vmatmul.mubr.msk.bf16.gmra.mrb[4].mxu1 %vm734_vm0, %v1020_v29 }
 0x124   : > { %1992 = vmatpush3.bf16.msra.mxu1 %v2107_v24  ;;  %1995 = vmatprep.mubr.msk.bf16.mxu1 %vm734_vm0, %v2110_v31 }
 0x125   : > { %1993 = vmatprep.subr.bf16.mxu1 %v2108_v20 }
 0x128   : > { %1994 = vmatpush3.bf16.msra.mxu1 %v2108_v20 }
 0x129   : > { %2019 = vmatprep.subr.bf16.mxu1 %v2375_v21 }
 0x12b   : > { %1996 = vmatmul.mubr.msk.bf16.vlgmr.msra.gmra.mrb[8].mxu1 %vm734_vm0, %v2111_v32 }
 0x12c   : > { %2023 = vmatpush3.bf16.msra.mxu1 %v2375_v21  ;;  %1999 = vmatprep.mubr.msk.bf16.mxu1 %vm734_vm0, %v2114_v37  ;;  %v1130_v21 = vld [vmem:[%s2645_s8] sm:$0xff] }
 0x12d   : > { %2020 = vmatprep.subr.bf16.mxu1 %v2112_v35  ;;  %v1133_v40 = vmul.f32 0.0011160715, %v1130_v21 }
 0x12f   : > { %v1134_v41 = vmul.f32 %v1133_v40, %v1133_v40 }
 0x130   : > { %2024 = vmatpush3.bf16.msra.mxu1 %v2112_v35 }
 0x131   : > { %2021 = vmatprep.subr.bf16.mxu1 %v2113_v36  ;;  %v1136_v42 = vrot.slane %v1134_v41, 7 }
 0x133   : > { %2000 = vmatmul.mubr.msk.bf16.gmra.mrb[12].mxu1 %vm734_vm0, %v2115_v38  ;;  %v1138_v44 = vsub.f32 %v1133_v40, %v1136_v42  ;;  %v1468_v42 = vadd.s32 16, %v2382_v33 }
 0x134   : > { %2025 = vmatpush3.bf16.msra.mxu1 %v2113_v36 }
 0x135   : > { %2022 = vmatprep.subr.bf16.mxu1 %v2116_v39  ;;  %v1139_v45 = vmax.f32 %v1138_v44, 0.0  ;;  %v1475_v44 = vstv %s1892_s26 }
 0x137   : > { %v1140_v46 = vadd.f32 1e-05, %v1139_v45  ;;  %v1469_v45 = vadd.s32 24, %v2382_v33 }
 0x138   : > { %2026 = vmatpush3.bf16.msra.mxu1 %v2116_v39 }
 0x139   : > { %2119 = vrsqrt.f32 %v1140_v46  ;;  %v1467_v46 = vadd.s32 8, %v2382_v33 }
 0x143   : > { %v2120_v47 = vpop.eup %2119 }
 0x144   : > { %v1149_v48 = vrot.slane %v2120_v47, %v2385_v34  ;;  %v1478_v47 = vadd.s32 %v1475_v44, %v1468_v42 }
 0x146   : > { %v1150_v49 = vcombine.high %v1149_v48, %v1149_v48  ;;  %v1476_v48 = vadd.s32 %v1475_v44, %v2382_v33  ;;  %vm1486_vm2 = vcmp.lt.s32.totalorder %v1478_v47, 112 }
 0x148   : > { %v1157_v50 = vrot.slane %v1150_v49, %v2385_v34  ;;  %v1479_v49 = vadd.s32 %v1475_v44, %v1469_v45  ;;  %vm1484_vm3 = vcmp.lt.s32.totalorder %v1476_v48, 112 }
 0x14a   : > { %v1159_v52 = vmul.f32 %v1157_v50, %v1131_v51  ;;  %v1472_v50 = vadd.s32 48, %v2382_v33  ;;  %v1477_v51 = vadd.s32 %v1475_v44, %v1467_v46  ;;  %vm1487_vm4 = vcmp.lt.s32.totalorder %v1479_v49, 112 }
 0x14c   : > { %v1160_v53 = vmul.f32 %v1159_v52, %v1133_v40  ;;  %v1166_v56 = vrot.slane %v1159_v52, %v2396_v43  ;;  %v1470_v52 = vadd.s32 32, %v2382_v33  ;;  %vm1485_vm5 = vcmp.lt.s32.totalorder %v1477_v51, 112 }
 0x14e   : > { %v1161_v55 = vsub.f32 %v1132_v54, %v1160_v53  ;;  %v1473_v54 = vadd.s32 56, %v2382_v33 }
 0x150   : > { %v1180_v57 = vrot.slane %v1161_v55, %v2396_v43 }
 0x1ee   : > { %v1981_v58 = vpop.f32.mrb[0].mxu1 }
 0x1ef   : > { %v1170_v59 = vmul.f32 %v1981_v58, %v1166_v56  ;;  %v1099_v60 = vpop.f32.mrb[1].mxu1 }
 0x1f0   : > { %v1168_v61 = vmul.f32 %v1166_v56, %v1099_v60  ;;  %v1982_v34 = vpop.f32.mrb[2].mxu1  ;;  %v1482_v60 = vadd.s32 %v1475_v44, %v1472_v50 }
 0x1f1   : > { %v1184_v62 = vadd.f32 %v1180_v57, %v1170_v59  ;;  %v1171_v63 = vmul.f32 %v1982_v34, %v1166_v56  ;;  %v1102_v0 = vpop.f32.mrb[3].mxu1 }
 0x1f2   : > { %v1182_v1 = vadd.f32 %v1180_v57, %v1168_v61  ;;  %v1169_v2 = vmul.f32 %v1166_v56, %v1102_v0  ;;  %vm1490_vm6 = vcmp.lt.s32.totalorder %v1482_v60, 112 }
 0x1f3   : > { %v1200_v3 = vmul.f32 0.2, %v1184_v62  ;;  %v1185_v4 = vadd.f32 %v1180_v57, %v1171_v63  ;;  %vm1192_vm9 = vcmp.gt.f32.partialorder %v1184_v62, 0.0  ;;  %v1480_v63 = vadd.s32 %v1475_v44, %v1470_v52 }
 0x1f4   : > { %v1198_v5 = vmul.f32 0.2, %v1182_v1  ;;  %v1183_v6 = vadd.f32 %v1180_v57, %v1169_v2  ;;  %vm1190_vm10 = vcmp.gt.f32.partialorder %v1182_v1, 0.0  ;;  %v1483_v2 = vadd.s32 %v1475_v44, %v1473_v54 }
 0x1f5   : > { %vm1193_vm11 = vcmp.gt.f32.partialorder %v1185_v4, 0.0  ;;  %v1201_v7 = vmul.f32 0.2, %v1185_v4  ;;  %v1208_v9 = vsel %vm1192_vm9, %v1184_v62, %v1200_v3  ;;  %vm1488_vm7 = vcmp.lt.s32.totalorder %v1480_v63, 112 }
 0x1f6   : > { %vm1191_vm12 = vcmp.gt.f32.partialorder %v1183_v6, 0.0  ;;  %v1199_v43 = vmul.f32 0.2, %v1183_v6  ;;  %v1985_v8 = vpop.f32.mrb[4].mxu1  ;;  %v1206_v13 = vsel %vm1190_vm10, %v1182_v1, %v1198_v5  ;;  %vm1491_vm8 = vcmp.lt.s32.totalorder %v1483_v2, 112 }
 0x1f7   : > { %v1209_v10 = vsel %vm1193_vm11, %v1185_v4, %v1201_v7  ;;  %v1174_v11 = vmul.f32 %v1985_v8, %v1166_v56  ;;  %v1115_v12 = vpop.f32.mrb[5].mxu1 }
 0x1f8   : > { %v1215_v14 = vpack.c.bf16 %v1209_v10, %v1208_v9  ;;  %v1207_v15 = vsel %vm1191_vm12, %v1183_v6, %v1199_v43  ;;  %v1172_v16 = vmul.f32 %v1166_v56, %v1115_v12  ;;  %v1986_v17 = vpop.f32.mrb[6].mxu1  ;;  %v2162_v12 = vmov (%p1517_p8), 0.0  }
 0x1f9   : > { %v1188_v18 = vadd.f32 %v1180_v57, %v1174_v11  ;;  %v1175_v19 = vmul.f32 %v1986_v17, %v1166_v56  ;;  %v1118_v22 = vpop.f32.mrb[7].mxu1  ;;  %v1214_v23 = vpack.c.bf16 %v1207_v15, %v1206_v13  ;;  %1522 = vst.msk [vmem:[%s2674_s22] sm:$0xff] (%p1517_p8), %vm734_vm0, %v2162_v12 }
 0x1fa   : > { %v1186_v24 = vadd.f32 %v1180_v57, %v1172_v16  ;;  %v1173_v25 = vmul.f32 %v1166_v56, %v1118_v22 }
 0x1fb   : > { %v1204_v26 = vmul.f32 0.2, %v1188_v18  ;;  %v1189_v27 = vadd.f32 %v1180_v57, %v1175_v19  ;;  %2011 = vmatprep.mubr.msk.bf16.mxu0 %vm734_vm0, %v1214_v23  ;;  %vm1196_vm13 = vcmp.gt.f32.partialorder %v1188_v18, 0.0 }
 0x1fc   : > { %v1202_v28 = vmul.f32 0.2, %v1186_v24  ;;  %v1187_v29 = vadd.f32 %v1180_v57, %v1173_v25  ;;  %2012 = vmatmul.mubr.msk.bf16.vlgmr.msra.gmra.mrb[8].mxu0 %vm734_vm0, %v1215_v14  ;;  %vm1194_vm14 = vcmp.gt.f32.partialorder %v1186_v24, 0.0  ;;  %v1471_v57 = vadd.s32 40, %v2382_v33 }
 0x1fd   : > { %vm1197_vm15 = vcmp.gt.f32.partialorder %v1189_v27, 0.0  ;;  %v1205_v30 = vmul.f32 0.2, %v1189_v27  ;;  %v1212_v20 = vsel %vm1196_vm13, %v1188_v18, %v1204_v26 }
 0x1fe   : > { %vm1195_vm1 = vcmp.gt.f32.partialorder %v1187_v29, 0.0  ;;  %v1203_v31 = vmul.f32 0.2, %v1187_v29  ;;  %v1210_v35 = vsel %vm1194_vm14, %v1186_v24, %v1202_v28  ;;  %v1997_v39 = vpop.f32.mrb[8].mxu1  ;;  %v1481_v33 = vadd.s32 %v1475_v44, %v1471_v57 }
 0x1ff   : > { %v1213_v32 = vsel %vm1197_vm15, %v1189_v27, %v1205_v30  ;;  %v1332_v21 = vpop.f32.mrb[9].mxu1 }
 0x200   : > { %v1217_v36 = vpack.c.bf16 %v1213_v32, %v1212_v20  ;;  %v1211_v37 = vsel %vm1195_vm1, %v1187_v29, %v1203_v31  ;;  %v1998_v40 = vpop.f32.mrb[10].mxu1  ;;  %vm1489_vm9 = vcmp.lt.s32.totalorder %v1481_v33, 112 }
 0x201   : > { %v1216_v38 = vpack.c.bf16 %v1211_v37, %v1210_v35  ;;  %v1335_v41 = vpop.f32.mrb[11].mxu1 }
 0x203   : > { %2015 = vmatprep.mubr.msk.bf16.mxu1 %vm734_vm0, %v1216_v38 }
 0x204   : > { %2016 = vmatmul.mubr.msk.bf16.vlgmr.msra.gmra.mrb[12].mxu1 %vm734_vm0, %v1217_v36 }
 0x2cf   : > { %v2013_v53 = vpop.f32.mrb[8].mxu0 }
 0x2d0   : > { %v2459_v55 = vadd.f32 %v2013_v53, %v1997_v39  ;;  %v1433_v56 = vpop.f32.mrb[9].mxu0 }
 0x2d1   : > { %v2462_v58 = vadd.f32 %v1433_v56, %v1332_v21  ;;  %v2014_v59 = vpop.f32.mrb[10].mxu0 }
 0x2d2   : > { %v1510_v61 = vsel %vm1486_vm2, %v2459_v55, 0.0  ;;  %v2465_v34 = vadd.f32 %v2014_v59, %v1998_v40  ;;  %v1436_v62 = vpop.f32.mrb[11].mxu0 }
 0x2d3   : > { %v1508_v0 = vsel %vm1484_vm3, %v2462_v58, 0.0  ;;  %v2468_v1 = vadd.f32 %v1436_v62, %v1335_v41 }
 0x2d4   : > { %v1511_v3 = vsel %vm1487_vm4, %v2465_v34, 0.0 }
 0x2d5   : > { %v1509_v4 = vsel %vm1485_vm5, %v2468_v1, 0.0  ;;  %1521 = sbr.rel (!%p1517_p8) target bundleno = 732 (0x2dc), region = 80 }
 0x2d7   : > { %v2472_v5 = vpop.f32.mrb[12].mxu1 }
 0x2d8   : > { %v1514_v6 = vsel %vm1490_vm6, %v2472_v5, 0.0  ;;  %v2475_v7 = vpop.f32.mrb[13].mxu1 }
 0x2d9   : > { %v1512_v43 = vsel %vm1488_vm7, %v2475_v7, 0.0  ;;  %v2478_v8 = vpop.f32.mrb[14].mxu1 }
 0x2da   : > { %v1515_v9 = vsel %vm1491_vm8, %v2478_v8, 0.0  ;;  %v2481_v10 = vpop.f32.mrb[15].mxu1 }
 0x2db   : > { %v1513_v11 = vsel %vm1489_vm9, %v2481_v10, 0.0 }
 0x2dc PF: > { %v1524_v13 = vsel %vm734_vm0, %v1508_v0, 0.0  ;;  %v1525_v14 = vsel %vm734_vm0, %v1509_v4, 0.0  ;;  %v1527_v15 = vsel %vm734_vm0, %v1510_v61, 0.0  ;;  %v1529_v17 = vsel %vm734_vm0, %v1511_v3, 0.0  ;;  %s2675_s24 = sld [smem:[#allocation7_spill]]  ;;  %p1894_p9 = scmp.ne.s32.totalorder %s2143_s21, 0 }
 0x2dd   : > { %v1526_v16 = vadd.f32 %v1525_v14, %v1524_v13  ;;  %v1549_v18 = vmul.f32 %v1508_v0, %v1508_v0  ;;  %v1550_v19 = vmul.f32 %v1509_v4, %v1509_v4  ;;  %v1551_v23 = vmul.f32 %v1510_v61, %v1510_v61  ;;  %1583 = vst.msk [vmem:[%s2319_s29] sm:$0xff] (!%p1894_p9), %vm734_vm0, %v2462_v58 }
 0x2de   : > { %v1552_v24 = vmul.f32 %v1511_v3, %v1511_v3  ;;  %v1531_v25 = vsel %vm734_vm0, %v1512_v43, 0.0  ;;  %v1553_v28 = vmul.f32 %v1512_v43, %v1512_v43  ;;  %v1533_v31 = vsel %vm734_vm0, %v1513_v11, 0.0  ;;  %1584 = vst.msk [vmem:[%s2319_s29 + $0x8] sm:$0xff] (!%p1894_p9), %vm734_vm0, %v2468_v1  ;;  %1585 = vst.msk [vmem:[%s2319_s29 + $0x10] sm:$0xff] (!%p1894_p9), %vm734_vm0, %v2459_v55 }
 0x2df   : > { %v1528_v22 = vadd.f32 %v1527_v15, %v1526_v16  ;;  %v1557_v26 = vsel %vm734_vm0, %v1549_v18, 0.0  ;;  %v1558_v29 = vsel %vm734_vm0, %v1550_v19, 0.0  ;;  %v1560_v30 = vsel %vm734_vm0, %v1551_v23, 0.0  ;;  %1586 = vst.msk [vmem:[%s2319_s29 + $0x18] sm:$0xff] (!%p1894_p9), %vm734_vm0, %v2465_v34  ;;  %1587 = vst.msk [vmem:[%s2319_s29 + $0x20] sm:$0xff] (!%p1894_p9), %vm734_vm0, %v2475_v7 }
 0x2e0   : > { %v1559_v20 = vadd.f32 %v1558_v29, %v1557_v26  ;;  %v1554_v35 = vmul.f32 %v1513_v11, %v1513_v11  ;;  %v1562_v36 = vsel %vm734_vm0, %v1552_v24, 0.0  ;;  %v1535_v37 = vsel %vm734_vm0, %v1514_v6, 0.0  ;;  %1588 = vst.msk [vmem:[%s2319_s29 + $0x28] sm:$0xff] (!%p1894_p9), %vm734_vm0, %v2481_v10  ;;  %1589 = vst.msk [vmem:[%s2319_s29 + $0x30] sm:$0xff] (!%p1894_p9), %vm734_vm0, %v2472_v5 }
 0x2e1   : > { %v1530_v27 = vadd.f32 %v1529_v17, %v1528_v22  ;;  %v1555_v21 = vmul.f32 %v1514_v6, %v1514_v6  ;;  %v1564_v40 = vsel %vm734_vm0, %v1553_v28, 0.0  ;;  %v1537_v41 = vsel %vm734_vm0, %v1515_v9, 0.0  ;;  %1590 = vst.msk [vmem:[%s2319_s29 + $0x38] sm:$0xff] (!%p1894_p9), %vm734_vm0, %v2478_v8  ;;  %1591 = vst.msk [vmem:[%s2324_s28] sm:$0xff] (!%p1894_p9), %vm734_vm0, %v2462_v58 }
 0x2e2   : > { %v1561_v38 = vadd.f32 %v1560_v30, %v1559_v20  ;;  %v1556_v45 = vmul.f32 %v1515_v9, %v1515_v9  ;;  %v1566_v46 = vsel %vm734_vm0, %v1554_v35, 0.0  ;;  %v1523_v63 = vld [vmem:[%s2675_s24] sm:$0x1]  ;;  %vm1546_vm10 = vcmask 516096   ;;  %v1548_v6 = vld [vmem:[%s2675_s24 + $0x1] sm:$0x1] }
 0x2e3   : > { %v1532_v32 = vadd.f32 %v1531_v25, %v1530_v27  ;;  %v1568_v49 = vsel %vm734_vm0, %v1555_v21, 0.0  ;;  %1592 = vst.msk [vmem:[%s2324_s28 + $0x8] sm:$0xff] (!%p1894_p9), %vm734_vm0, %v2468_v1  ;;  %1593 = vst.msk [vmem:[%s2324_s28 + $0x10] sm:$0xff] (!%p1894_p9), %vm734_vm0, %v2459_v55 }
 0x2e4   : > { %v1563_v42 = vadd.f32 %v1562_v36, %v1561_v38  ;;  %v1570_v52 = vsel %vm734_vm0, %v1556_v45, 0.0  ;;  %1594 = vst.msk [vmem:[%s2324_s28 + $0x18] sm:$0xff] (!%p1894_p9), %vm734_vm0, %v2465_v34  ;;  %1595 = vst.msk [vmem:[%s2324_s28 + $0x20] sm:$0xff] (!%p1894_p9), %vm734_vm0, %v2475_v7 }
 0x2e5   : > { %v1534_v39 = vadd.f32 %v1533_v31, %v1532_v32  ;;  %1596 = vst.msk [vmem:[%s2324_s28 + $0x28] sm:$0xff] (!%p1894_p9), %vm734_vm0, %v2481_v10  ;;  %1597 = vst.msk [vmem:[%s2324_s28 + $0x30] sm:$0xff] (!%p1894_p9), %vm734_vm0, %v2472_v5 }
 0x2e6   : > { %v1565_v47 = vadd.f32 %v1564_v40, %v1563_v42  ;;  %1598 = vst.msk [vmem:[%s2324_s28 + $0x38] sm:$0xff] (!%p1894_p9), %vm734_vm0, %v2478_v8 }
 0x2e7   : > { %v1536_v44 = vadd.f32 %v1535_v37, %v1534_v39 }
 0x2e8   : > { %v1567_v50 = vadd.f32 %v1566_v46, %v1565_v47 }
 0x2e9   : > { %v1538_v48 = vadd.f32 %v1537_v41, %v1536_v44 }
 0x2ea   : > { %v1569_v53 = vadd.f32 %v1568_v49, %v1567_v50 }
 0x2eb   : > { %v1539_v51 = vrot.slane %v1538_v48, 4 }
 0x2ec   : > { %v1571_v56 = vadd.f32 %v1570_v52, %v1569_v53 }
 0x2ed   : > { %v1540_v54 = vadd.f32 %v1539_v51, %v1538_v48 }
 0x2ee   : > { %v1572_v59 = vrot.slane %v1571_v56, 4 }
 0x2ef   : > { %v1541_v57 = vrot.slane %v1540_v54, 2 }
 0x2f0   : > { %v1573_v61 = vadd.f32 %v1572_v59, %v1571_v56 }
 0x2f1   : > { %v1542_v60 = vadd.f32 %v1541_v57, %v1540_v54 }
 0x2f2   : > { %v1574_v0 = vrot.slane %v1573_v61, 2 }
 0x2f3   : > { %v1543_v62 = vrot.slane %v1542_v60, 1 }
 0x2f4   : > { %v1575_v3 = vadd.f32 %v1574_v0, %v1573_v61 }
 0x2f5   : > { %v1544_v2 = vadd.f32 %v1543_v62, %v1542_v60 }
 0x2f6   : > { %v1576_v4 = vrot.slane %v1575_v3, 1  ;;  %1582 = sbr.rel (%p1894_p9) target bundleno = 765 (0x2fd), region = 84 }
 0x2f7   : > { %v1545_v33 = vadd.f32 %v1544_v2, %v1523_v63 }
 0x2f8   : > { %v1577_v43 = vadd.f32 %v1576_v4, %v1575_v3 }
 0x2f9   : > { %1547 = vst.msk [vmem:[%s2675_s24] sm:$0x1] %vm1546_vm10, %v1545_v33 }
 0x2fa   : > { %v1578_v9 = vadd.f32 %v1577_v43, %v1548_v6 }
 0x2fc   : > { %1579 = vst.msk [vmem:[%s2675_s24 + $0x1] sm:$0x1] %vm1546_vm10, %v1578_v9 }
 0x2fd PF: > { %p1895_p10 = scmp.le.s32.totalorder %s2143_s21, 0 }
 0x2fe   : > { %v1603_v11 = vld [vmem:[%s2319_s29] sm:$0xff] (!%p1895_p10)  ;;  %v1604_v12 = vld [vmem:[%s2319_s29 + $0x8] sm:$0xff] (!%p1895_p10)  ;;  %v1605_v13 = vld [vmem:[%s2319_s29 + $0x10] sm:$0xff] (!%p1895_p10) }
 0x2ff   : > { %1602 = sbr.rel (%p1895_p10) target bundleno = 777 (0x309), region = 88  ;;  %v1611_v14 = vmax.f32 (!%p1895_p10), %v1603_v11, %v2462_v58  ;;  %v1612_v15 = vmax.f32 (!%p1895_p10), %v1604_v12, %v2468_v1  ;;  %v1613_v16 = vmax.f32 (!%p1895_p10), %v1605_v13, %v2459_v55  ;;  %v1606_v17 = vld [vmem:[%s2319_s29 + $0x18] sm:$0xff] (!%p1895_p10)  ;;  %v1607_v18 = vld [vmem:[%s2319_s29 + $0x20] sm:$0xff] (!%p1895_p10)  ;;  %v1608_v19 = vld [vmem:[%s2319_s29 + $0x28] sm:$0xff] (!%p1895_p10) }
 0x300   : > { %v1614_v22 = vmax.f32 (!%p1895_p10), %v1606_v17, %v2465_v34  ;;  %v1615_v23 = vmax.f32 (!%p1895_p10), %v1607_v18, %v2475_v7  ;;  %v1616_v24 = vmax.f32 (!%p1895_p10), %v1608_v19, %v2481_v10  ;;  %v1609_v25 = vld [vmem:[%s2319_s29 + $0x30] sm:$0xff] (!%p1895_p10)  ;;  %v1610_v26 = vld [vmem:[%s2319_s29 + $0x38] sm:$0xff] (!%p1895_p10)  ;;  %v1627_v27 = vld [vmem:[%s2324_s28] sm:$0xff] (!%p1895_p10) }
 0x301   : > { %1619 = vst.msk [vmem:[%s2319_s29] sm:$0xff] (!%p1895_p10), %vm734_vm0, %v1611_v14  ;;  %1620 = vst.msk [vmem:[%s2319_s29 + $0x8] sm:$0xff] (!%p1895_p10), %vm734_vm0, %v1612_v15  ;;  %v1617_v28 = vmax.f32 (!%p1895_p10), %v1609_v25, %v2472_v5  ;;  %v1618_v29 = vmax.f32 (!%p1895_p10), %v1610_v26, %v2478_v8  ;;  %v1635_v30 = vmin.f32 (!%p1895_p10), %v1627_v27, %v2462_v58  ;;  %v1628_v31 = vld [vmem:[%s2324_s28 + $0x8] sm:$0xff] (!%p1895_p10)  ;;  %v1629_v20 = vld [vmem:[%s2324_s28 + $0x10] sm:$0xff] (!%p1895_p10) }
 0x302   : > { %1621 = vst.msk [vmem:[%s2319_s29 + $0x10] sm:$0xff] (!%p1895_p10), %vm734_vm0, %v1613_v16  ;;  %v1630_v32 = vld [vmem:[%s2324_s28 + $0x18] sm:$0xff] (!%p1895_p10)  ;;  %1622 = vst.msk [vmem:[%s2319_s29 + $0x18] sm:$0xff] (!%p1895_p10), %vm734_vm0, %v1614_v22  ;;  %v1636_v35 = vmin.f32 (!%p1895_p10), %v1628_v31, %v2468_v1  ;;  %v1637_v36 = vmin.f32 (!%p1895_p10), %v1629_v20, %v2459_v55  ;;  %v1631_v37 = vld [vmem:[%s2324_s28 + $0x20] sm:$0xff] (!%p1895_p10) }
 0x303   : > { %1623 = vst.msk [vmem:[%s2319_s29 + $0x20] sm:$0xff] (!%p1895_p10), %vm734_vm0, %v1615_v23  ;;  %1624 = vst.msk [vmem:[%s2319_s29 + $0x28] sm:$0xff] (!%p1895_p10), %vm734_vm0, %v1616_v24  ;;  %v1638_v58 = vmin.f32 (!%p1895_p10), %v1630_v32, %v2465_v34  ;;  %v1632_v38 = vld [vmem:[%s2324_s28 + $0x28] sm:$0xff] (!%p1895_p10)  ;;  %v1633_v39 = vld [vmem:[%s2324_s28 + $0x30] sm:$0xff] (!%p1895_p10)  ;;  %v1639_v21 = vmin.f32 (!%p1895_p10), %v1631_v37, %v2475_v7 }
 0x304   : > { %1625 = vst.msk [vmem:[%s2319_s29 + $0x30] sm:$0xff] (!%p1895_p10), %vm734_vm0, %v1617_v28  ;;  %1626 = vst.msk [vmem:[%s2319_s29 + $0x38] sm:$0xff] (!%p1895_p10), %vm734_vm0, %v1618_v29  ;;  %v1640_v1 = vmin.f32 (!%p1895_p10), %v1632_v38, %v2481_v10  ;;  %v1641_v55 = vmin.f32 (!%p1895_p10), %v1633_v39, %v2472_v5  ;;  %v1634_v40 = vld [vmem:[%s2324_s28 + $0x38] sm:$0xff] (!%p1895_p10) }
 0x305   : > { %1643 = vst.msk [vmem:[%s2324_s28] sm:$0xff] (!%p1895_p10), %vm734_vm0, %v1635_v30  ;;  %1644 = vst.msk [vmem:[%s2324_s28 + $0x8] sm:$0xff] (!%p1895_p10), %vm734_vm0, %v1636_v35  ;;  %v1642_v34 = vmin.f32 (!%p1895_p10), %v1634_v40, %v2478_v8 }
 0x306   : > { %1645 = vst.msk [vmem:[%s2324_s28 + $0x10] sm:$0xff] %vm734_vm0, %v1637_v36  ;;  %1646 = vst.msk [vmem:[%s2324_s28 + $0x18] sm:$0xff] %vm734_vm0, %v1638_v58 }
 0x307   : > { %1647 = vst.msk [vmem:[%s2324_s28 + $0x20] sm:$0xff] %vm734_vm0, %v1639_v21  ;;  %1648 = vst.msk [vmem:[%s2324_s28 + $0x28] sm:$0xff] %vm734_vm0, %v1640_v1 }
 0x308   : > { %1649 = vst.msk [vmem:[%s2324_s28 + $0x30] sm:$0xff] %vm734_vm0, %v1641_v55  ;;  %1650 = vst.msk [vmem:[%s2324_s28 + $0x38] sm:$0xff] %vm734_vm0, %v1642_v34 }
 0x309 PF: > { %s2676_s21 = sld [smem:[#allocation4_spill]]  ;;  %s2678_s22 = sld [smem:[#allocation3_spill]] }
 0x30a   : > { %s2679_s23 = sld [smem:[#allocation5_spill]]  ;;  %s2680_s24 = sld [smem:[#allocation6_spill]] }
 0x30f   : > { %s27_s25 = sadd.s32 1, %s2676_s21   ;;  %s2677_s21 = sld [smem:[#allocation2_spill]] }
 0x310   : > { %p24_p11 = scmp.ge.s32.totalorder %s27_s25, 18  }
 0x312   :  { %26 = sbr.rel (!%p24_p11) target bundleno = 5 (0x5), region = 148 }

</bundles_post_ra>
